<compile_context>
chip_gen: v5e
topology: v5e:2x2
jax: 0.10.0
libtpu: 0.0.40
codegen_flags: <defaults>
</compile_context>

<pallas_src>
import functools

import jax
import jax.numpy as jnp
import numpy as np
from jax.experimental import pallas as pl
from jax.experimental.pallas import tpu as pltpu


# ----------------------------------------------------------------------------
# Parameter initialization (mirrors SineLayer.init_weights / nn.Linear defaults)
# ----------------------------------------------------------------------------
def init_siren_params(key, in_features, hidden_features, hidden_layers,
                      out_features, outermost_linear=False,
                      first_omega_0=30.0, hidden_omega_0=30.0):
    """Torch-layout params: per layer W is [out, in], b is [out].
    Returns (raw_params, omegas, is_sine)."""
    dims = ([in_features] + [hidden_features] * (hidden_layers + 1)
            + [out_features])
    n_layers = len(dims) - 1
    params, omegas, is_sine = [], [], []
    for l in range(n_layers):
        fan_in, fan_out = dims[l], dims[l + 1]
        key, kw, kb = jax.random.split(key, 3)
        last = (l == n_layers - 1)
        if l == 0:
            bound_w = 1.0 / fan_in
            omega = first_omega_0
        else:
            bound_w = float(np.sqrt(6.0 / fan_in)) / hidden_omega_0
            omega = hidden_omega_0
        w = jax.random.uniform(kw, (fan_out, fan_in), jnp.float32,
                               minval=-bound_w, maxval=bound_w)
        # torch nn.Linear default bias init: U(-1/sqrt(fan_in), 1/sqrt(fan_in))
        bound_b = 1.0 / float(np.sqrt(fan_in))
        b = jax.random.uniform(kb, (fan_out,), jnp.float32,
                               minval=-bound_b, maxval=bound_b)
        params += [w, b]
        omegas.append(omega)
        is_sine.append(not (last and outermost_linear))
    return params, tuple(omegas), tuple(is_sine)


def fold_siren_params(raw_params, omegas, is_sine, dtype=jnp.float32):
    """One-time constant fold of omega into sine-layer weights/biases.
    Kernel layout: W [out, in], b [out, 1]. Use dtype=jnp.bfloat16 on v5e to
    halve weight VMEM / vld bytes (document the looser precision contract)."""
    folded = []
    n_layers = len(raw_params) // 2
    for l in range(n_layers):
        w = raw_params[2 * l]
        b = raw_params[2 * l + 1]
        scale = omegas[l] if is_sine[l] else 1.0
        folded.append((scale * w).astype(dtype))
        folded.append((scale * b).astype(dtype).reshape(-1, 1))
    return folded


# ----------------------------------------------------------------------------
# Bounded-argument fast sine (valid for |z| up to ~1e4; SIREN gives |z| <= ~60)
# ----------------------------------------------------------------------------
_INV_PI = np.float32(1.0 / np.pi)
_PI_HI = np.float32(3.140625)               # 8 mantissa bits -> k*PI_HI exact for |k| <= 2^16
_PI_LO = np.float32(np.pi - 3.140625)       # residual; k*PI_LO error ~1e-10 per unit k
# Odd minimax coefficients for sin on [-pi, pi] (superset of the reduced
# [-pi/2, pi/2] range). Max error over the reduced range ~1e-7 in f32.
_SIN_COEFS = (-2.3889859e-08, 2.7525562e-06, -1.9840874e-04,
              8.3333310e-03, -1.6666667e-01, 1.0)


def fast_sin(z, *, poly_bf16=False):
    """sin(z) with a single Cody-Waite reduction + odd polynomial.

    Roughly half the VALU ops of the library sine. `poly_bf16=True` runs the
    polynomial on the bf16 VALU (v6e/v7x only; ~2x poly rate, ~3 fewer digits);
    the range reduction and output stay in f32 either way.
    """
    z = z.astype(jnp.float32)
    k = jnp.floor(z * _INV_PI + np.float32(0.5))   # round(z / pi)
    r = z - k * _PI_HI                             # exact (cancellation is exact)
    r = r - k * _PI_LO                             # r in ~[-pi/2, pi/2]
    rp = r.astype(jnp.bfloat16) if poly_bf16 else r
    r2 = rp * rp
    p = jnp.asarray(_SIN_COEFS[0], rp.dtype)
    for c in _SIN_COEFS[1:]:
        p = p * r2 + jnp.asarray(c, rp.dtype)
    p = (p * rp).astype(jnp.float32)
    odd = (k.astype(jnp.int32) & 1) == 1           # sin(z) = (-1)^k * sin(r)
    return jnp.where(odd, -p, p)


# ----------------------------------------------------------------------------
# Pallas kernel: fused Siren forward over one (lane-dense) row tile
# ----------------------------------------------------------------------------
def _siren_kernel(*refs, is_sine, poly_bf16):
    # refs = (x_ref, w0, b0, w1, b1, ..., out_ref)
    # x_ref:   [in_features, row_tile]  (rows on lanes)
    # w_l:     [out_l, in_l]            (native torch layout, omega pre-folded)
    # b_l:     [out_l, 1]
    # out_ref: [out_features, row_tile]
    x_ref = refs[0]
    out_ref = refs[-1]
    param_refs = refs[1:-1]
    n_layers = len(param_refs) // 2

    h = x_ref[...]
    # Static unroll over layers. For very deep nets stack identical hidden
    # layers into one [L, H, H] array + lax.fori_loop to bound live ranges.
    for l in range(n_layers):
        w = param_refs[2 * l][...]
        b = param_refs[2 * l + 1][...]
        z = jnp.dot(w, h, preferred_element_type=jnp.float32) + b
        h = fast_sin(z, poly_bf16=poly_bf16) if is_sine[l] else z
    out_ref[...] = h.astype(out_ref.dtype)


# ----------------------------------------------------------------------------
# Tile / VMEM sizing heuristics
# ----------------------------------------------------------------------------
def _auto_row_tile(n_rows, max_width):
    """Bigger tiles for narrow nets (amortize ~0.35us grid-step overhead),
    smaller for wide nets (VMEM). Multiple of 256 (MXU N dim on v6e/v7x,
    128-lane aligned everywhere). NOTE(v7x): re-check against 64 MiB/TC."""
    if max_width <= 64:
        base = 2048
    elif max_width <= 256:
        base = 1024
    else:
        base = 512
    if n_rows >= 256:
        # Keep full tiles <= the array; the last (partial) tile is masked.
        base = min(base, (n_rows // 256) * 256)
    else:
        base = 256
    return base


def _vmem_limit_bytes(folded_params, in_features, out_features, max_width,
                      row_tile):
    """Weights (single-buffered) + double-buffered streamed tiles + a few live
    activation tiles, with headroom. Clamped to [32 MiB, 48 MiB] so it is safe
    on every generation (v7x physical VMEM is 64 MiB/TC)."""
    weight_bytes = sum(int(p.size) * p.dtype.itemsize for p in folded_params)
    io_bytes = 2 * (in_features + out_features) * row_tile * 4
    act_bytes = 4 * max_width * row_tile * 4
    need = int(1.5 * (weight_bytes + io_bytes + act_bytes)) + (4 << 20)
    return int(min(max(need, 32 << 20), 48 << 20))


# ----------------------------------------------------------------------------
# Wrappers
# ----------------------------------------------------------------------------
def siren_forward_t(coords_t, folded_params, is_sine, *, row_tile=None,
                    poly_bf16=False):
    """Transposed-layout contract (preferred: no wrapper HBM transposes).
    coords_t: [in_features, N] f32  ->  returns [out_features, N] f32."""
    in_features, n = coords_t.shape
    out_features = folded_params[-2].shape[0]
    widths = [in_features] + [w.shape[0] for w in folded_params[::2]]
    max_width = max(widths)
    if row_tile is None:
        row_tile = _auto_row_tile(n, max_width)

    kernel = functools.partial(_siren_kernel, is_sine=tuple(is_sine),
                               poly_bf16=poly_bf16)

    in_specs = [pl.BlockSpec((in_features, row_tile), lambda i: (0, i))]
    for p in folded_params:
        # Constant index_map -> VMEM-resident across grid steps; Buffered(1)
        # because double-buffering a never-changing block is pure VMEM waste.
        in_specs.append(pl.BlockSpec(p.shape, lambda i: (0, 0),
                                     pipeline_mode=pl.Buffered(1)))

    grid = (pl.cdiv(n, row_tile),)  # tail block masked by Pallas (no pad/slice)

    out_t = pl.pallas_call(
        kernel,
        out_shape=jax.ShapeDtypeStruct((out_features, n), jnp.float32),
        grid_spec=pltpu.PrefetchScalarGridSpec(
            num_scalar_prefetch=0,
            grid=grid,
            in_specs=in_specs,
            out_specs=pl.BlockSpec((out_features, row_tile),
                                   lambda i: (0, i)),
        ),
        compiler_params=pltpu.CompilerParams(
            dimension_semantics=("parallel",),
            vmem_limit_bytes=_vmem_limit_bytes(
                folded_params, in_features, out_features, max_width, row_tile),
        ),
    )(coords_t, *folded_params)
    return out_t


def siren_forward(coords, folded_params, is_sine, **kwargs):
    """Module-compatible contract: coords [N, in_features] f32.
    Returns (output [N, out_features], coords), matching Siren.forward.
    The two transposes are fixed HBM passes; generate the coordinate grid
    directly in [in_features, N] layout and call siren_forward_t to skip them.
    """
    out_t = siren_forward_t(coords.T, folded_params, is_sine, **kwargs)
    return out_t.T, coords


# ----------------------------------------------------------------------------
# Reference (plain JAX, torch semantics with explicit omega) for sanity check
# ----------------------------------------------------------------------------
def siren_ref(coords, raw_params, omegas, is_sine):
    h = coords
    n_layers = len(raw_params) // 2
    for l in range(n_layers):
        w = raw_params[2 * l]        # [out, in]
        b = raw_params[2 * l + 1]    # [out]
        z = jnp.dot(h, w.T, precision=jax.lax.Precision.HIGHEST) + b
        h = jnp.sin(omegas[l] * z) if is_sine[l] else z
    return h


if __name__ == "__main__":
    key = jax.random.PRNGKey(0)

    # Small, module-consistent shapes: 2-D coords -> 32 hidden -> 1 output.
    in_features = 2
    hidden_features = 32
    hidden_layers = 2
    out_features = 1
    N = 1000  # deliberately NOT a multiple of the row tile -> masked tail block

    k_params, k_coords = jax.random.split(key)
    coords = jax.random.uniform(k_coords, (N, in_features), jnp.float32,
                                minval=-1.0, maxval=1.0)

    # 0) Validate the bounded-range fast sine against jnp.sin over a range that
    #    covers SIREN pre-activations (|z| <= ~omega_0 + sqrt(6*fan_in) ~ 60).
    z_chk = jnp.linspace(-200.0, 200.0, 8193, dtype=jnp.float32)
    np.testing.assert_allclose(np.asarray(fast_sin(z_chk)),
                               np.asarray(jnp.sin(z_chk)), atol=1e-5)

    # 1) outermost sine (default Siren config)
    raw_params, omegas, is_sine = init_siren_params(
        k_params, in_features, hidden_features, hidden_layers, out_features,
        outermost_linear=False, first_omega_0=30.0, hidden_omega_0=30.0)
    folded_params = fold_siren_params(raw_params, omegas, is_sine)

    out, coords_out = siren_forward(coords, folded_params, is_sine)
    out = jax.block_until_ready(out)
    ref = siren_ref(coords, raw_params, omegas, is_sine)
    np.testing.assert_allclose(np.asarray(out), np.asarray(ref),
                               rtol=1e-4, atol=1e-4)

    # 2) outermost linear layer (exercises the is_sine gating)
    raw_params2, omegas2, is_sine2 = init_siren_params(
        k_params, in_features, hidden_features, hidden_layers, out_features,
        outermost_linear=True, first_omega_0=30.0, hidden_omega_0=30.0)
    folded_params2 = fold_siren_params(raw_params2, omegas2, is_sine2)

    out2, _ = siren_forward(coords, folded_params2, is_sine2)
    out2 = jax.block_until_ready(out2)
    ref2 = siren_ref(coords, raw_params2, omegas2, is_sine2)
    np.testing.assert_allclose(np.asarray(out2), np.asarray(ref2),
                               rtol=1e-4, atol=1e-4)

    print("KERNEL_OK")
</pallas_src>

<mosaic_0001>
module attributes {stable_mosaic.version = 11 : i64} {
  func.func @_siren_kernel(%arg0: i32, %arg1: memref<2x768xf32, #tpu.memory_space<vmem>>, %arg2: memref<32x2xf32, #tpu.memory_space<vmem>>, %arg3: memref<32x1xf32, #tpu.memory_space<vmem>>, %arg4: memref<32x32xf32, #tpu.memory_space<vmem>>, %arg5: memref<32x1xf32, #tpu.memory_space<vmem>>, %arg6: memref<32x32xf32, #tpu.memory_space<vmem>>, %arg7: memref<32x1xf32, #tpu.memory_space<vmem>>, %arg8: memref<1x32xf32, #tpu.memory_space<vmem>>, %arg9: memref<1x1xf32, #tpu.memory_space<vmem>>, %arg10: memref<1x768xf32, #tpu.memory_space<vmem>>) attributes {dimension_semantics = [#tpu.dimension_semantics<parallel>], iteration_bounds = array<i64: 2>, scalar_prefetch = 0 : i64, scratch_operands = 0 : i64, tpu.core_type = #tpu.core_type<tc>, window_params = [{transform_indices = @transform_0, window_bounds = array<i64: 2, 768>}, {pipeline_mode = #tpu.pipeline_mode<synchronous>, transform_indices = @transform_1, window_bounds = array<i64: 32, 2>}, {pipeline_mode = #tpu.pipeline_mode<synchronous>, transform_indices = @transform_2, window_bounds = array<i64: 32, 1>}, {pipeline_mode = #tpu.pipeline_mode<synchronous>, transform_indices = @transform_3, window_bounds = array<i64: 32, 32>}, {pipeline_mode = #tpu.pipeline_mode<synchronous>, transform_indices = @transform_4, window_bounds = array<i64: 32, 1>}, {pipeline_mode = #tpu.pipeline_mode<synchronous>, transform_indices = @transform_5, window_bounds = array<i64: 32, 32>}, {pipeline_mode = #tpu.pipeline_mode<synchronous>, transform_indices = @transform_6, window_bounds = array<i64: 32, 1>}, {pipeline_mode = #tpu.pipeline_mode<synchronous>, transform_indices = @transform_7, window_bounds = array<i64: 1, 32>}, {pipeline_mode = #tpu.pipeline_mode<synchronous>, transform_indices = @transform_8, window_bounds = array<i64: 1, 1>}, {transform_indices = @transform_9, window_bounds = array<i64: 1, 768>}]} {
    %c0 = arith.constant 0 : index
    %c0_0 = arith.constant 0 : index
    %0 = vector.load %arg1[%c0, %c0_0] : memref<2x768xf32, #tpu.memory_space<vmem>>, vector<2x768xf32>
    %c0_1 = arith.constant 0 : index
    %c0_2 = arith.constant 0 : index
    %1 = vector.load %arg2[%c0_1, %c0_2] : memref<32x2xf32, #tpu.memory_space<vmem>>, vector<32x2xf32>
    %c0_3 = arith.constant 0 : index
    %c0_4 = arith.constant 0 : index
    %2 = vector.load %arg3[%c0_3, %c0_4] : memref<32x1xf32, #tpu.memory_space<vmem>>, vector<32x1xf32>
    %cst = arith.constant dense<0.000000e+00> : vector<32x768xf32>
    %3 = tpu.matmul %1, %0, %cst {dimension_numbers = #tpu.dot_dimension_numbers<[1], [0], [0], [1], [0, 0, 1, 1], [], []>} : vector<32x2xf32>, vector<2x768xf32>, vector<32x768xf32> -> vector<32x768xf32>
    %4 = vector.broadcast %2 : vector<32x1xf32> to vector<32x768xf32>
    %5 = arith.addf %3, %4 : vector<32x768xf32>
    %cst_5 = arith.constant 0.318309873 : f32
    %6 = vector.broadcast %cst_5 : f32 to vector<32x768xf32>
    %7 = arith.mulf %5, %6 : vector<32x768xf32>
    %cst_6 = arith.constant 5.000000e-01 : f32
    %8 = vector.broadcast %cst_6 : f32 to vector<32x768xf32>
    %9 = arith.addf %7, %8 : vector<32x768xf32>
    %10 = math.floor %9 : vector<32x768xf32>
    %cst_7 = arith.constant 3.140625 : f32
    %11 = vector.broadcast %cst_7 : f32 to vector<32x768xf32>
    %12 = arith.mulf %10, %11 : vector<32x768xf32>
    %13 = arith.subf %5, %12 : vector<32x768xf32>
    %cst_8 = arith.constant 9.67653584E-4 : f32
    %14 = vector.broadcast %cst_8 : f32 to vector<32x768xf32>
    %15 = arith.mulf %10, %14 : vector<32x768xf32>
    %16 = arith.subf %13, %15 : vector<32x768xf32>
    %17 = arith.mulf %16, %16 : vector<32x768xf32>
    %cst_9 = arith.constant -2.3889859E-8 : f32
    %18 = vector.broadcast %cst_9 : f32 to vector<32x768xf32>
    %19 = arith.mulf %18, %17 : vector<32x768xf32>
    %cst_10 = arith.constant 2.75255616E-6 : f32
    %20 = vector.broadcast %cst_10 : f32 to vector<32x768xf32>
    %21 = arith.addf %19, %20 : vector<32x768xf32>
    %22 = arith.mulf %21, %17 : vector<32x768xf32>
    %cst_11 = arith.constant -1.98408743E-4 : f32
    %23 = vector.broadcast %cst_11 : f32 to vector<32x768xf32>
    %24 = arith.addf %22, %23 : vector<32x768xf32>
    %25 = arith.mulf %24, %17 : vector<32x768xf32>
    %cst_12 = arith.constant 0.00833333097 : f32
    %26 = vector.broadcast %cst_12 : f32 to vector<32x768xf32>
    %27 = arith.addf %25, %26 : vector<32x768xf32>
    %28 = arith.mulf %27, %17 : vector<32x768xf32>
    %cst_13 = arith.constant -0.166666672 : f32
    %29 = vector.broadcast %cst_13 : f32 to vector<32x768xf32>
    %30 = arith.addf %28, %29 : vector<32x768xf32>
    %31 = arith.mulf %30, %17 : vector<32x768xf32>
    %cst_14 = arith.constant 1.000000e+00 : f32
    %32 = vector.broadcast %cst_14 : f32 to vector<32x768xf32>
    %33 = arith.addf %31, %32 : vector<32x768xf32>
    %34 = arith.mulf %33, %16 : vector<32x768xf32>
    %35 = arith.fptosi %10 : vector<32x768xf32> to vector<32x768xi32>
    %c1_i32 = arith.constant 1 : i32
    %36 = vector.broadcast %c1_i32 : i32 to vector<32x768xi32>
    %37 = arith.andi %35, %36 : vector<32x768xi32>
    %c1_i32_15 = arith.constant 1 : i32
    %38 = vector.broadcast %c1_i32_15 : i32 to vector<32x768xi32>
    %39 = arith.cmpi eq, %37, %38 : vector<32x768xi32>
    %cst_16 = arith.constant 0.000000e+00 : f32
    %40 = vector.broadcast %cst_16 : f32 to vector<32x768xf32>
    %41 = arith.subf %40, %34 : vector<32x768xf32>
    %42 = arith.select %39, %41, %34 : vector<32x768xi1>, vector<32x768xf32>
    %c0_17 = arith.constant 0 : index
    %c0_18 = arith.constant 0 : index
    %43 = vector.load %arg4[%c0_17, %c0_18] : memref<32x32xf32, #tpu.memory_space<vmem>>, vector<32x32xf32>
    %c0_19 = arith.constant 0 : index
    %c0_20 = arith.constant 0 : index
    %44 = vector.load %arg5[%c0_19, %c0_20] : memref<32x1xf32, #tpu.memory_space<vmem>>, vector<32x1xf32>
    %cst_21 = arith.constant dense<0.000000e+00> : vector<32x768xf32>
    %45 = tpu.matmul %43, %42, %cst_21 {dimension_numbers = #tpu.dot_dimension_numbers<[1], [0], [0], [1], [0, 0, 1, 1], [], []>} : vector<32x32xf32>, vector<32x768xf32>, vector<32x768xf32> -> vector<32x768xf32>
    %46 = vector.broadcast %44 : vector<32x1xf32> to vector<32x768xf32>
    %47 = arith.addf %45, %46 : vector<32x768xf32>
    %cst_22 = arith.constant 0.318309873 : f32
    %48 = vector.broadcast %cst_22 : f32 to vector<32x768xf32>
    %49 = arith.mulf %47, %48 : vector<32x768xf32>
    %cst_23 = arith.constant 5.000000e-01 : f32
    %50 = vector.broadcast %cst_23 : f32 to vector<32x768xf32>
    %51 = arith.addf %49, %50 : vector<32x768xf32>
    %52 = math.floor %51 : vector<32x768xf32>
    %cst_24 = arith.constant 3.140625 : f32
    %53 = vector.broadcast %cst_24 : f32 to vector<32x768xf32>
    %54 = arith.mulf %52, %53 : vector<32x768xf32>
    %55 = arith.subf %47, %54 : vector<32x768xf32>
    %cst_25 = arith.constant 9.67653584E-4 : f32
    %56 = vector.broadcast %cst_25 : f32 to vector<32x768xf32>
    %57 = arith.mulf %52, %56 : vector<32x768xf32>
    %58 = arith.subf %55, %57 : vector<32x768xf32>
    %59 = arith.mulf %58, %58 : vector<32x768xf32>
    %cst_26 = arith.constant -2.3889859E-8 : f32
    %60 = vector.broadcast %cst_26 : f32 to vector<32x768xf32>
    %61 = arith.mulf %60, %59 : vector<32x768xf32>
    %cst_27 = arith.constant 2.75255616E-6 : f32
    %62 = vector.broadcast %cst_27 : f32 to vector<32x768xf32>
    %63 = arith.addf %61, %62 : vector<32x768xf32>
    %64 = arith.mulf %63, %59 : vector<32x768xf32>
    %cst_28 = arith.constant -1.98408743E-4 : f32
    %65 = vector.broadcast %cst_28 : f32 to vector<32x768xf32>
    %66 = arith.addf %64, %65 : vector<32x768xf32>
    %67 = arith.mulf %66, %59 : vector<32x768xf32>
    %cst_29 = arith.constant 0.00833333097 : f32
    %68 = vector.broadcast %cst_29 : f32 to vector<32x768xf32>
    %69 = arith.addf %67, %68 : vector<32x768xf32>
    %70 = arith.mulf %69, %59 : vector<32x768xf32>
    %cst_30 = arith.constant -0.166666672 : f32
    %71 = vector.broadcast %cst_30 : f32 to vector<32x768xf32>
    %72 = arith.addf %70, %71 : vector<32x768xf32>
    %73 = arith.mulf %72, %59 : vector<32x768xf32>
    %cst_31 = arith.constant 1.000000e+00 : f32
    %74 = vector.broadcast %cst_31 : f32 to vector<32x768xf32>
    %75 = arith.addf %73, %74 : vector<32x768xf32>
    %76 = arith.mulf %75, %58 : vector<32x768xf32>
    %77 = arith.fptosi %52 : vector<32x768xf32> to vector<32x768xi32>
    %c1_i32_32 = arith.constant 1 : i32
    %78 = vector.broadcast %c1_i32_32 : i32 to vector<32x768xi32>
    %79 = arith.andi %77, %78 : vector<32x768xi32>
    %c1_i32_33 = arith.constant 1 : i32
    %80 = vector.broadcast %c1_i32_33 : i32 to vector<32x768xi32>
    %81 = arith.cmpi eq, %79, %80 : vector<32x768xi32>
    %cst_34 = arith.constant 0.000000e+00 : f32
    %82 = vector.broadcast %cst_34 : f32 to vector<32x768xf32>
    %83 = arith.subf %82, %76 : vector<32x768xf32>
    %84 = arith.select %81, %83, %76 : vector<32x768xi1>, vector<32x768xf32>
    %c0_35 = arith.constant 0 : index
    %c0_36 = arith.constant 0 : index
    %85 = vector.load %arg6[%c0_35, %c0_36] : memref<32x32xf32, #tpu.memory_space<vmem>>, vector<32x32xf32>
    %c0_37 = arith.constant 0 : index
    %c0_38 = arith.constant 0 : index
    %86 = vector.load %arg7[%c0_37, %c0_38] : memref<32x1xf32, #tpu.memory_space<vmem>>, vector<32x1xf32>
    %cst_39 = arith.constant dense<0.000000e+00> : vector<32x768xf32>
    %87 = tpu.matmul %85, %84, %cst_39 {dimension_numbers = #tpu.dot_dimension_numbers<[1], [0], [0], [1], [0, 0, 1, 1], [], []>} : vector<32x32xf32>, vector<32x768xf32>, vector<32x768xf32> -> vector<32x768xf32>
    %88 = vector.broadcast %86 : vector<32x1xf32> to vector<32x768xf32>
    %89 = arith.addf %87, %88 : vector<32x768xf32>
    %cst_40 = arith.constant 0.318309873 : f32
    %90 = vector.broadcast %cst_40 : f32 to vector<32x768xf32>
    %91 = arith.mulf %89, %90 : vector<32x768xf32>
    %cst_41 = arith.constant 5.000000e-01 : f32
    %92 = vector.broadcast %cst_41 : f32 to vector<32x768xf32>
    %93 = arith.addf %91, %92 : vector<32x768xf32>
    %94 = math.floor %93 : vector<32x768xf32>
    %cst_42 = arith.constant 3.140625 : f32
    %95 = vector.broadcast %cst_42 : f32 to vector<32x768xf32>
    %96 = arith.mulf %94, %95 : vector<32x768xf32>
    %97 = arith.subf %89, %96 : vector<32x768xf32>
    %cst_43 = arith.constant 9.67653584E-4 : f32
    %98 = vector.broadcast %cst_43 : f32 to vector<32x768xf32>
    %99 = arith.mulf %94, %98 : vector<32x768xf32>
    %100 = arith.subf %97, %99 : vector<32x768xf32>
    %101 = arith.mulf %100, %100 : vector<32x768xf32>
    %cst_44 = arith.constant -2.3889859E-8 : f32
    %102 = vector.broadcast %cst_44 : f32 to vector<32x768xf32>
    %103 = arith.mulf %102, %101 : vector<32x768xf32>
    %cst_45 = arith.constant 2.75255616E-6 : f32
    %104 = vector.broadcast %cst_45 : f32 to vector<32x768xf32>
    %105 = arith.addf %103, %104 : vector<32x768xf32>
    %106 = arith.mulf %105, %101 : vector<32x768xf32>
    %cst_46 = arith.constant -1.98408743E-4 : f32
    %107 = vector.broadcast %cst_46 : f32 to vector<32x768xf32>
    %108 = arith.addf %106, %107 : vector<32x768xf32>
    %109 = arith.mulf %108, %101 : vector<32x768xf32>
    %cst_47 = arith.constant 0.00833333097 : f32
    %110 = vector.broadcast %cst_47 : f32 to vector<32x768xf32>
    %111 = arith.addf %109, %110 : vector<32x768xf32>
    %112 = arith.mulf %111, %101 : vector<32x768xf32>
    %cst_48 = arith.constant -0.166666672 : f32
    %113 = vector.broadcast %cst_48 : f32 to vector<32x768xf32>
    %114 = arith.addf %112, %113 : vector<32x768xf32>
    %115 = arith.mulf %114, %101 : vector<32x768xf32>
    %cst_49 = arith.constant 1.000000e+00 : f32
    %116 = vector.broadcast %cst_49 : f32 to vector<32x768xf32>
    %117 = arith.addf %115, %116 : vector<32x768xf32>
    %118 = arith.mulf %117, %100 : vector<32x768xf32>
    %119 = arith.fptosi %94 : vector<32x768xf32> to vector<32x768xi32>
    %c1_i32_50 = arith.constant 1 : i32
    %120 = vector.broadcast %c1_i32_50 : i32 to vector<32x768xi32>
    %121 = arith.andi %119, %120 : vector<32x768xi32>
    %c1_i32_51 = arith.constant 1 : i32
    %122 = vector.broadcast %c1_i32_51 : i32 to vector<32x768xi32>
    %123 = arith.cmpi eq, %121, %122 : vector<32x768xi32>
    %cst_52 = arith.constant 0.000000e+00 : f32
    %124 = vector.broadcast %cst_52 : f32 to vector<32x768xf32>
    %125 = arith.subf %124, %118 : vector<32x768xf32>
    %126 = arith.select %123, %125, %118 : vector<32x768xi1>, vector<32x768xf32>
    %c0_53 = arith.constant 0 : index
    %c0_54 = arith.constant 0 : index
    %127 = vector.load %arg8[%c0_53, %c0_54] : memref<1x32xf32, #tpu.memory_space<vmem>>, vector<1x32xf32>
    %c0_55 = arith.constant 0 : index
    %c0_56 = arith.constant 0 : index
    %128 = vector.load %arg9[%c0_55, %c0_56] : memref<1x1xf32, #tpu.memory_space<vmem>>, vector<1x1xf32>
    %cst_57 = arith.constant dense<0.000000e+00> : vector<1x768xf32>
    %129 = tpu.matmul %127, %126, %cst_57 {dimension_numbers = #tpu.dot_dimension_numbers<[1], [0], [0], [1], [0, 0, 1, 1], [], []>} : vector<1x32xf32>, vector<32x768xf32>, vector<1x768xf32> -> vector<1x768xf32>
    %130 = vector.broadcast %128 : vector<1x1xf32> to vector<1x768xf32>
    %131 = arith.addf %129, %130 : vector<1x768xf32>
    %cst_58 = arith.constant 0.318309873 : f32
    %132 = vector.broadcast %cst_58 : f32 to vector<1x768xf32>
    %133 = arith.mulf %131, %132 : vector<1x768xf32>
    %cst_59 = arith.constant 5.000000e-01 : f32
    %134 = vector.broadcast %cst_59 : f32 to vector<1x768xf32>
    %135 = arith.addf %133, %134 : vector<1x768xf32>
    %136 = math.floor %135 : vector<1x768xf32>
    %cst_60 = arith.constant 3.140625 : f32
    %137 = vector.broadcast %cst_60 : f32 to vector<1x768xf32>
    %138 = arith.mulf %136, %137 : vector<1x768xf32>
    %139 = arith.subf %131, %138 : vector<1x768xf32>
    %cst_61 = arith.constant 9.67653584E-4 : f32
    %140 = vector.broadcast %cst_61 : f32 to vector<1x768xf32>
    %141 = arith.mulf %136, %140 : vector<1x768xf32>
    %142 = arith.subf %139, %141 : vector<1x768xf32>
    %143 = arith.mulf %142, %142 : vector<1x768xf32>
    %cst_62 = arith.constant -2.3889859E-8 : f32
    %144 = vector.broadcast %cst_62 : f32 to vector<1x768xf32>
    %145 = arith.mulf %144, %143 : vector<1x768xf32>
    %cst_63 = arith.constant 2.75255616E-6 : f32
    %146 = vector.broadcast %cst_63 : f32 to vector<1x768xf32>
    %147 = arith.addf %145, %146 : vector<1x768xf32>
    %148 = arith.mulf %147, %143 : vector<1x768xf32>
    %cst_64 = arith.constant -1.98408743E-4 : f32
    %149 = vector.broadcast %cst_64 : f32 to vector<1x768xf32>
    %150 = arith.addf %148, %149 : vector<1x768xf32>
    %151 = arith.mulf %150, %143 : vector<1x768xf32>
    %cst_65 = arith.constant 0.00833333097 : f32
    %152 = vector.broadcast %cst_65 : f32 to vector<1x768xf32>
    %153 = arith.addf %151, %152 : vector<1x768xf32>
    %154 = arith.mulf %153, %143 : vector<1x768xf32>
    %cst_66 = arith.constant -0.166666672 : f32
    %155 = vector.broadcast %cst_66 : f32 to vector<1x768xf32>
    %156 = arith.addf %154, %155 : vector<1x768xf32>
    %157 = arith.mulf %156, %143 : vector<1x768xf32>
    %cst_67 = arith.constant 1.000000e+00 : f32
    %158 = vector.broadcast %cst_67 : f32 to vector<1x768xf32>
    %159 = arith.addf %157, %158 : vector<1x768xf32>
    %160 = arith.mulf %159, %142 : vector<1x768xf32>
    %161 = arith.fptosi %136 : vector<1x768xf32> to vector<1x768xi32>
    %c1_i32_68 = arith.constant 1 : i32
    %162 = vector.broadcast %c1_i32_68 : i32 to vector<1x768xi32>
    %163 = arith.andi %161, %162 : vector<1x768xi32>
    %c1_i32_69 = arith.constant 1 : i32
    %164 = vector.broadcast %c1_i32_69 : i32 to vector<1x768xi32>
    %165 = arith.cmpi eq, %163, %164 : vector<1x768xi32>
    %cst_70 = arith.constant 0.000000e+00 : f32
    %166 = vector.broadcast %cst_70 : f32 to vector<1x768xf32>
    %167 = arith.subf %166, %160 : vector<1x768xf32>
    %168 = arith.select %165, %167, %160 : vector<1x768xi1>, vector<1x768xf32>
    %c0_71 = arith.constant 0 : index
    %c0_72 = arith.constant 0 : index
    %169 = vector.load %arg10[%c0_71, %c0_72] : memref<1x768xf32, #tpu.memory_space<vmem>>, vector<1x768xf32>
    tpu.vector_store %arg10[%c0_71, %c0_72], %168 {strides = array<i32>} : memref<1x768xf32, #tpu.memory_space<vmem>>, vector<1x768xf32>,
    return
  }
  func.func @transform_0(%arg0: i32) -> (i32, i32) {
    %c0_i32 = arith.constant 0 : i32
    %c0_i32_0 = arith.constant 0 : i32
    return %c0_i32, %arg0 : i32, i32
  }
  func.func @transform_1(%arg0: i32) -> (i32, i32) {
    %c0_i32 = arith.constant 0 : i32
    %c0_i32_0 = arith.constant 0 : i32
    %c0_i32_1 = arith.constant 0 : i32
    return %c0_i32, %c0_i32_0 : i32, i32
  }
  func.func @transform_2(%arg0: i32) -> (i32, i32) {
    %c0_i32 = arith.constant 0 : i32
    %c0_i32_0 = arith.constant 0 : i32
    %c0_i32_1 = arith.constant 0 : i32
    return %c0_i32, %c0_i32_0 : i32, i32
  }
  func.func @transform_3(%arg0: i32) -> (i32, i32) {
    %c0_i32 = arith.constant 0 : i32
    %c0_i32_0 = arith.constant 0 : i32
    %c0_i32_1 = arith.constant 0 : i32
    return %c0_i32, %c0_i32_0 : i32, i32
  }
  func.func @transform_4(%arg0: i32) -> (i32, i32) {
    %c0_i32 = arith.constant 0 : i32
    %c0_i32_0 = arith.constant 0 : i32
    %c0_i32_1 = arith.constant 0 : i32
    return %c0_i32, %c0_i32_0 : i32, i32
  }
  func.func @transform_5(%arg0: i32) -> (i32, i32) {
    %c0_i32 = arith.constant 0 : i32
    %c0_i32_0 = arith.constant 0 : i32
    %c0_i32_1 = arith.constant 0 : i32
    return %c0_i32, %c0_i32_0 : i32, i32
  }
  func.func @transform_6(%arg0: i32) -> (i32, i32) {
    %c0_i32 = arith.constant 0 : i32
    %c0_i32_0 = arith.constant 0 : i32
    %c0_i32_1 = arith.constant 0 : i32
    return %c0_i32, %c0_i32_0 : i32, i32
  }
  func.func @transform_7(%arg0: i32) -> (i32, i32) {
    %c0_i32 = arith.constant 0 : i32
    %c0_i32_0 = arith.constant 0 : i32
    %c0_i32_1 = arith.constant 0 : i32
    return %c0_i32, %c0_i32_0 : i32, i32
  }
  func.func @transform_8(%arg0: i32) -> (i32, i32) {
    %c0_i32 = arith.constant 0 : i32
    %c0_i32_0 = arith.constant 0 : i32
    %c0_i32_1 = arith.constant 0 : i32
    return %c0_i32, %c0_i32_0 : i32, i32
  }
  func.func @transform_9(%arg0: i32) -> (i32, i32) {
    %c0_i32 = arith.constant 0 : i32
    %c0_i32_0 = arith.constant 0 : i32
    return %c0_i32, %arg0 : i32, i32
  }
}

</mosaic_0001>

<bundles_post_ra>
// kernel: tpu_custom_call.1
= control target key start
LH: loop header
LB: loop body
LE: loop exit
PB: predicated region body
PF: predicated region fallthrough
CT: control target
= control target key end

     0   :  { %s5606_s0 = inlined_call_operand.vmem [shape: f32[2,1000], index: 0, kind: input, shape index: {}]   ;;  %s5607_s1 = inlined_call_operand.vmem [shape: f32[32,2], index: 1, kind: input, shape index: {}]   ;;  %s5608_s2 = inlined_call_operand.vmem [shape: f32[32,1], index: 2, kind: input, shape index: {}]   ;;  %s5609_s3 = inlined_call_operand.vmem [shape: f32[32,32], index: 3, kind: input, shape index: {}]   ;;  %s5610_s4 = inlined_call_operand.vmem [shape: f32[32,1], index: 4, kind: input, shape index: {}]   ;;  %s5611_s5 = inlined_call_operand.vmem [shape: f32[32,32], index: 5, kind: input, shape index: {}]   ;;  %s5612_s6 = inlined_call_operand.vmem [shape: f32[32,1], index: 6, kind: input, shape index: {}]   ;;  %s5613_s7 = inlined_call_operand.vmem [shape: f32[1,32], index: 7, kind: input, shape index: {}]   ;;  %s5614_s8 = inlined_call_operand.<no memory space> [shape: f32[1,1], index: 8, kind: input, shape index: {}]   ;;  %s5615_s9 = inlined_call_operand.hbm [shape: f32[1,1000], index: 9, kind: output, shape index: {}]  }
   0x1   :  { %v14_v0 = vstv %s5614_s8 }
   0x2   :  { %15 = vst [vmem:[#allocation2] sm:$0x1] %v14_v0 }
   0x3   :  { %16 = vsyncpa [#allocation4], 0 }
   0x4   :  { %18 = vsyncpa [#allocation4 + $0x1], 0  ;;  %s3559_s11 = smov 0   ;;  %s3561_s12 = smov 0  }
   0x5   :  { %s3563_s13 = smov 0   ;;  %s3565_s14 = smov 0  }
   0x6 LB: > { %s3137_s8 = sadd.s32 4294967295, %s3502_s14   ;;  %s3138_s15 = sadd.s32 4294967294, %s3502_s14   ;;  %s3502_s14 = sphi %s3565_s14, %s5819_s14   ;;  %s3498_s13 = sphi %s3563_s13, %s5818_s13   ;;  %s3494_s12 = sphi %s3561_s12, %s5817_s12   ;;  %s3490_s11 = sphi %s3559_s11, %s5816_s11  }
   0x7   : > { %s3582_s16 = sadd.s32 1, %s3502_s14   ;;  %s225_s17 = sadd.s32 1, %s3498_s13 }
   0x8   : > { %s222_s18 = ssub.s32 %s3502_s14, %s3582_s16  ;;  %p235_p0 = scmp.ne.s32.totalorder %s3498_s13, %s3494_s12 }
   0x9   : > { %p223_p1 = scmp.eq.s32.totalorder %s222_s18, 0  ;;  %p236_p2 = scmp.eq.s32.totalorder %s3137_s8, 1 }
   0xa   : > { %p241_p3 = scmp.ne.s32.totalorder %s3494_s12, %s3490_s11  ;;  %p242_p4 = scmp.eq.s32.totalorder %s3138_s15, 1 }
   0xb   : > { %s3592_s19 = scalar_select %p223_p1, %s3498_s13, %s225_s17  }
   0xc   : > { %p3594_p5 = por %p236_p2, %p235_p0  ;;  %p3598_p6 = por %p242_p4, %p241_p3 }
   0xd   : > { %p3141_p7 = scmp.ge.s32.totalorder %s3502_s14, 1  ;;  %p301_p8 = scmp.lt.s32.totalorder %s3502_s14, 3 }
   0xf   : > { %p302_p9 = pnand %p3141_p7, %p301_p8 }
  0x11   : > { %305 = sbr.rel (%p302_p9) target bundleno = 1063 (0x427), region = 56 }
  0x16   : > { %v368_v1 = vld [vmem:[%s5608_s2 + $0x18] sm:$0xff]  ;;  %s3607_s24 = smul.u32 6, %s3137_s8  ;;  %v3504_v2 = vmov 0   ;;  %v366_v3 = vld [vmem:[%s5608_s2 + $0x8] sm:$0xff]  ;;  %v367_v4 = vld [vmem:[%s5608_s2 + $0x10] sm:$0xff]  ;;  %vm413_vm0 = vcmask 1041408  }
  0x17   : > { %3426 = vset.pattern.permute.xlu0 %v3504_v2  ;;  %3427 = vset.pattern.permute.xlu1 %v3504_v2  ;;  %v365_v5 = vld [vmem:[%s5608_s2] sm:$0xff]  ;;  %vm400_vm1 = vcmask 15360   ;;  %v1181_v13 = vld [vmem:[%s5610_s4 + $0x8] sm:$0xff]  ;;  %v1973_v18 = vld [vmem:[%s5612_s6 + $0x10] sm:$0xff]  ;;  %vm1204_vm12 = vcmask 261120   ;;  %s338_s26 = sand.u32 1, %s3494_s12  }
  0x18   : > { %386 = vperm.xlu0 %3426, %v368_v1   ;;  %p346_p10 = scmp.lt.s32.totalorder %s3607_s24, 7  ;;  %376 = vperm.xlu1 %3427, %v366_v3   ;;  %v361_v8 = vld [vmem:[%s5607_s1] sm:$0xff]  ;;  %v362_v17 = vld [vmem:[%s5607_s1 + $0x8] sm:$0xff]  ;;  %v363_v20 = vld [vmem:[%s5607_s1 + $0x10] sm:$0xff]  ;;  %s5547_s29 = scalar_lea.sflag [#allocation4], %s338_s26 }
  0x19   : > { %3428 = vset.pattern.permute.xlu2 %v3504_v2  ;;  %v1180_v14 = vld [vmem:[%s5610_s4] sm:$0xff]  ;;  %v1972_v19 = vld [vmem:[%s5612_s6 + $0x8] sm:$0xff]  ;;  %v364_v22 = vld [vmem:[%s5607_s1 + $0x18] sm:$0xff] }
  0x1a   : > { %s347_s27 = scalar_select %p346_p10, %s3607_s24, 7  ;;  %v2758_v21 = vld [vmem:[#allocation2] sm:$0x1] }
  0x1c   : > { %s3142_s28 = sshll.u32 %s347_s27, 1  ;;  %s5541_s27 = smul.u32 6, %s338_s26 }
  0x1d   : > { %s349_s10 = scalar_lea.vmem %s5606_s0, %s3142_s28 }
  0x1e   : > { %v359_v6 = vld [vmem:[%s349_s10] sm:$0xff]  ;;  %v360_v7 = vld [vmem:[%s349_s10 + $0x8] sm:$0xf]  ;;  %s340_s28 = scalar_lea.vmem [#allocation3], %s5541_s27 }
  0x1f   : > { %391 = vst [vmem:[#allocation1] ss:$4 sm:$0xff] %v359_v6 }
  0x20   : > { %381 = vperm.xlu0 %3426, %v367_v4   ;;  %371 = vperm.xlu1 %3427, %v365_v5   ;;  %393 = vst [vmem:[#allocation1 + $0x20] ss:$4 sm:$0xff] %v360_v7 }
  0x26   : > { %v394_v9 = vld.sshfl [vmem:[#allocation1] sm:$0xff pattern:$0x73625140]  ;;  %v395_v10 = vld.sshfl [vmem:[#allocation1 + $0x8] sm:$0xff pattern:$0x73625140] }
  0x27   : > { %3143 = vmatpush.msk.msra.mxu0 %vm413_vm0, %v394_v9  ;;  %3148 = vmatpush.msk.msra.mxu1 %vm413_vm0, %v395_v10  ;;  %v396_v11 = vld.sshfl [vmem:[#allocation1 + $0x10] sm:$0xff pattern:$0x73625140]  ;;  %v397_v12 = vld.sshfl [vmem:[#allocation1 + $0x18] sm:$0xff pattern:$0x73625140] }
  0x28   : > { %3153 = vmatpush.msk.msra.mxu2 %vm413_vm0, %v396_v11  ;;  %3158 = vmatpush.msk.msra.mxu3 %vm413_vm0, %v397_v12  ;;  %v398_v15 = vld.sshfl [vmem:[#allocation1 + $0x20] sm:$0xff pattern:$0x73625140]  ;;  %v399_v16 = vld.sshfl [vmem:[#allocation1 + $0x28] sm:$0xff pattern:$0x73625140] }
  0x29   : > { %3144 = vmatmul.msk.f32.vlgmr.msra.gmra.mxu0 %vm400_vm1, %v361_v8  ;;  %3149 = vmatmul.msk.f32.vlgmr.msra.gmra.mxu1 %vm400_vm1, %v361_v8 }
  0x2a   : > { %3154 = vmatmul.msk.f32.vlgmr.msra.gmra.mxu2 %vm400_vm1, %v361_v8  ;;  %3159 = vmatmul.msk.f32.vlgmr.msra.gmra.mxu3 %vm400_vm1, %v361_v8 }
  0x2b   : > { %1191 = vperm.xlu0 %3426, %v1181_v13   ;;  %1186 = vperm.xlu1 %3427, %v1180_v14  }
  0x2c   : > { %3163 = vmatpush.msk.msrb.mxu0 %vm413_vm0, %v398_v15  ;;  %3168 = vmatpush.msk.msrb.mxu1 %vm413_vm0, %v399_v16 }
  0x31   : > { %3145 = vmatmul.msk.f32.gmra.mxu0 %vm400_vm1, %v362_v17  ;;  %3150 = vmatmul.msk.f32.gmra.mxu1 %vm400_vm1, %v362_v17 }
  0x32   : > { %3155 = vmatmul.msk.f32.gmra.mxu2 %vm400_vm1, %v362_v17  ;;  %3160 = vmatmul.msk.f32.gmra.mxu3 %vm400_vm1, %v362_v17 }
  0x33   : > { %1987 = vperm.xlu0 %3426, %v1973_v18   ;;  %1982 = vperm.xlu1 %3427, %v1972_v19  }
  0x39   : > { %3146 = vmatmul.msk.f32.gmra.mxu0 %vm400_vm1, %v363_v20  ;;  %3151 = vmatmul.msk.f32.gmra.mxu1 %vm400_vm1, %v363_v20 }
  0x3a   : > { %3156 = vmatmul.msk.f32.gmra.mxu2 %vm400_vm1, %v363_v20  ;;  %3161 = vmatmul.msk.f32.gmra.mxu3 %vm400_vm1, %v363_v20 }
  0x3b   : > { %2761 = vperm.xlu0 %3426, %v2758_v21  }
  0x41   : > { %3147 = vmatmul.msk.f32.gmra.mxu0 %vm400_vm1, %v364_v22  ;;  %3152 = vmatmul.msk.f32.gmra.mxu1 %vm400_vm1, %v364_v22 }
  0x42   : > { %3157 = vmatmul.msk.f32.gmra.mxu2 %vm400_vm1, %v364_v22  ;;  %3162 = vmatmul.msk.f32.gmra.mxu3 %vm400_vm1, %v364_v22 }
  0x49   : > { %3164 = vmatmul.msk.f32.vlgmr.msrb.gmra.mxu0 %vm400_vm1, %v361_v8  ;;  %3169 = vmatmul.msk.f32.vlgmr.msrb.gmra.mxu1 %vm400_vm1, %v361_v8 }
  0x51   : > { %3165 = vmatmul.msk.f32.gmra.mxu0 %vm400_vm1, %v362_v17  ;;  %3170 = vmatmul.msk.f32.gmra.mxu1 %vm400_vm1, %v362_v17 }
  0x59   : > { %3166 = vmatmul.msk.f32.gmra.mxu0 %vm400_vm1, %v363_v20  ;;  %3171 = vmatmul.msk.f32.gmra.mxu1 %vm400_vm1, %v363_v20 }
  0x61   : > { %3167 = vmatmul.msk.f32.gmra.mxu0 %vm400_vm1, %v364_v22  ;;  %3172 = vmatmul.msk.f32.gmra.mxu1 %vm400_vm1, %v364_v22 }
  0x8a   : > { %v3677_v23 = vpop.permute.xlu1 %376  ;;  %v3683_v33 = vpop.permute.xlu0 %386 }
  0x92   : > { %v3679_v24 = vpop.permute.xlu1 %371  ;;  %v3712_v62 = vpop.permute.xlu0 %381 }
  0xa6   : > { %v443_v25 = vpop.f32.mrf.mxu0  ;;  %v472_v26 = vpop.f32.mrf.mxu1 }
  0xa7   : > { %v444_v27 = vadd.f32 %v443_v25, %v3679_v24  ;;  %v473_v28 = vadd.f32 %v472_v26, %v3679_v24 }
  0xa9   : > { %v600_v29 = vmul.f32 0.31830987, %v444_v27  ;;  %v601_v30 = vmul.f32 0.31830987, %v473_v28 }
  0xab   : > { %v624_v31 = vadd.f32 0.5, %v600_v29  ;;  %v625_v32 = vadd.f32 0.5, %v601_v30 }
  0xad   : > { %v3685_v34 = vfloor.f32 %v624_v31  ;;  %v501_v35 = vpop.f32.mrf.mxu2  ;;  %v530_v36 = vpop.f32.mrf.mxu3  ;;  %v3693_v41 = vfloor.f32 %v625_v32 }
  0xae   : > { %v3688_v37 = vadd.f32 %v501_v35, %v3679_v24  ;;  %v3691_v38 = vadd.f32 %v530_v36, %v3679_v24  ;;  %v446_v39 = vpop.f32.mrf.mxu0  ;;  %v475_v40 = vpop.f32.mrf.mxu1 }
  0xaf   : > { %v3698_v44 = vadd.f32 %v446_v39, %v3677_v23  ;;  %v3701_v45 = vadd.f32 %v475_v40, %v3677_v23  ;;  %v672_v46 = vmul.f32 3.140625, %v3685_v34  ;;  %v673_v51 = vmul.f32 3.140625, %v3693_v41 }
  0xb0   : > { %v602_v42 = vmul.f32 0.31830987, %v3688_v37  ;;  %v603_v43 = vmul.f32 0.31830987, %v3691_v38  ;;  %v720_v59 = vmul.f32 0.0009676536, %v3685_v34 }
  0xb1   : > { %v606_v49 = vmul.f32 0.31830987, %v3698_v44  ;;  %v607_v50 = vmul.f32 0.31830987, %v3701_v45  ;;  %v696_v58 = vsub.f32 %v444_v27, %v672_v46  ;;  %v697_v63 = vsub.f32 %v473_v28, %v673_v51 }
  0xb2   : > { %v626_v47 = vadd.f32 0.5, %v602_v42  ;;  %v627_v48 = vadd.f32 0.5, %v603_v43  ;;  %v721_v0 = vmul.f32 0.0009676536, %v3693_v41 }
  0xb3   : > { %v630_v54 = vadd.f32 0.5, %v606_v49  ;;  %v631_v55 = vadd.f32 0.5, %v607_v50  ;;  %v3733_v9 = vsub.f32 %v696_v58, %v720_v59 }
  0xb4   : > { %v3707_v52 = vfloor.f32 %v626_v47  ;;  %v3709_v53 = vfloor.f32 %v627_v48  ;;  %v3738_v13 = vsub.f32 %v697_v63, %v721_v0 }
  0xb5   : > { %v504_v56 = vpop.f32.mrf.mxu2  ;;  %v533_v57 = vpop.f32.mrf.mxu3  ;;  %v3729_v7 = vfloor.f32 %v630_v54  ;;  %v3731_v8 = vfloor.f32 %v631_v55  ;;  %5686 = vst [vmem:[#allocation8_spill] sm:$0xff] %v3733_v9 }
  0xb6   : > { %5684 = vst [vmem:[#allocation6_spill] sm:$0xff] %v3707_v52  ;;  %v449_v60 = vpop.f32.mrf.mxu0  ;;  %v478_v61 = vpop.f32.mrf.mxu1  ;;  %v3716_v1 = vadd.f32 %v504_v56, %v3677_v23  ;;  %v3719_v2 = vadd.f32 %v533_v57, %v3677_v23  ;;  %v674_v3 = vmul.f32 3.140625, %v3707_v52  ;;  %v675_v4 = vmul.f32 3.140625, %v3709_v53 }
  0xb7   : > { %5685 = vst [vmem:[#allocation7_spill] sm:$0xff] %v3709_v53  ;;  %v3724_v5 = vadd.f32 %v449_v60, %v3712_v62  ;;  %v3727_v6 = vadd.f32 %v478_v61, %v3712_v62  ;;  %v722_v10 = vmul.f32 0.0009676536, %v3707_v52  ;;  %v723_v14 = vmul.f32 0.0009676536, %v3709_v53 }
  0xb8   : > { %v608_v11 = vmul.f32 0.31830987, %v3716_v1  ;;  %v609_v12 = vmul.f32 0.31830987, %v3719_v2  ;;  %5687 = vst [vmem:[#allocation9_spill] sm:$0xff] %v3738_v13  ;;  %v698_v17 = vsub.f32 %v3688_v37, %v674_v3  ;;  %v699_v18 = vsub.f32 %v3691_v38, %v675_v4 }
  0xb9   : > { %v612_v15 = vmul.f32 0.31830987, %v3724_v5  ;;  %v613_v16 = vmul.f32 0.31830987, %v3727_v6  ;;  %v678_v21 = vmul.f32 3.140625, %v3729_v7  ;;  %v679_v22 = vmul.f32 3.140625, %v3731_v8 }
  0xba   : > { %v632_v19 = vadd.f32 0.5, %v608_v11  ;;  %v633_v20 = vadd.f32 0.5, %v609_v12  ;;  %v3759_v37 = vmul.f32 %v3733_v9, %v3733_v9  ;;  %v3767_v40 = vmul.f32 %v3738_v13, %v3738_v13 }
  0xbb   : > { %v636_v25 = vadd.f32 0.5, %v612_v15  ;;  %v637_v26 = vadd.f32 0.5, %v613_v16  ;;  %v726_v42 = vmul.f32 0.0009676536, %v3729_v7  ;;  %v3772_v47 = vsub.f32 %v698_v17, %v722_v10 }
  0xbc   : > { %v3747_v29 = vfloor.f32 %v632_v19  ;;  %v3749_v30 = vfloor.f32 %v633_v20  ;;  %v3774_v48 = vsub.f32 %v699_v18, %v723_v14  ;;  %v702_v49 = vsub.f32 %v3698_v44, %v678_v21 }
  0xbd   : > { %v507_v27 = vpop.f32.mrf.mxu2  ;;  %v536_v28 = vpop.f32.mrf.mxu3  ;;  %v3761_v38 = vfloor.f32 %v636_v25  ;;  %v3763_v39 = vfloor.f32 %v637_v26  ;;  %5690 = vst [vmem:[#allocation12_spill] sm:$0xff] %v3772_v47  ;;  %v727_v50 = vmul.f32 0.0009676536, %v3731_v8  ;;  %v703_v51 = vsub.f32 %v3701_v45, %v679_v22 }
  0xbe   : > { %5688 = vst [vmem:[#allocation10_spill] sm:$0xff] %v3747_v29  ;;  %v3752_v31 = vadd.f32 %v507_v27, %v3712_v62  ;;  %v3755_v32 = vadd.f32 %v536_v28, %v3712_v62  ;;  %v452_v35 = vpop.f32.mrf.mxu0  ;;  %v481_v36 = vpop.f32.mrf.mxu1  ;;  %v680_v43 = vmul.f32 3.140625, %v3747_v29  ;;  %v681_v46 = vmul.f32 3.140625, %v3749_v30 }
  0xbf   : > { %5689 = vst [vmem:[#allocation11_spill] sm:$0xff] %v3749_v30  ;;  %v684_v54 = vmul.f32 3.140625, %v3761_v38  ;;  %v728_v57 = vmul.f32 0.0009676536, %v3747_v29  ;;  %v685_v58 = vmul.f32 3.140625, %v3763_v39  ;;  %v3785_v59 = vadd.f32 %v452_v35, %v3683_v33 }
  0xc0   : > { %5691 = vst [vmem:[#allocation13_spill] sm:$0xff] %v3774_v48  ;;  %v614_v55 = vmul.f32 0.31830987, %v3752_v31  ;;  %v615_v56 = vmul.f32 0.31830987, %v3755_v32  ;;  %v3788_v60 = vadd.f32 %v481_v36, %v3683_v33  ;;  %v704_v44 = vsub.f32 %v3716_v1, %v680_v43 }
  0xc1   : > { %v705_v45 = vsub.f32 %v3719_v2, %v681_v46  ;;  %v729_v61 = vmul.f32 0.0009676536, %v3749_v30  ;;  %v3795_v0 = vmul.f32 %v3772_v47, %v3772_v47  ;;  %v618_v4 = vmul.f32 0.31830987, %v3785_v59 }
  0xc2   : > { %v638_v63 = vadd.f32 0.5, %v614_v55  ;;  %v639_v3 = vadd.f32 0.5, %v615_v56  ;;  %v619_v10 = vmul.f32 0.31830987, %v3788_v60  ;;  %v3801_v14 = vmul.f32 %v3774_v48, %v3774_v48 }
  0xc3   : > { %5692 = vst [vmem:[#allocation14_spill] sm:$0xff] %v3795_v0  ;;  %v3803_v1 = vsub.f32 %v702_v49, %v726_v42  ;;  %v3805_v2 = vsub.f32 %v703_v51, %v727_v50  ;;  %v708_v15 = vsub.f32 %v3724_v5, %v684_v54  ;;  %v709_v18 = vsub.f32 %v3727_v6, %v685_v58 }
  0xc4   : > { %5693 = vst [vmem:[#allocation15_spill] sm:$0xff] %v3801_v14  ;;  %v733_v19 = vmul.f32 0.0009676536, %v3763_v39  ;;  %v642_v20 = vadd.f32 0.5, %v618_v4  ;;  %v643_v21 = vadd.f32 0.5, %v619_v10  ;;  %v3810_v22 = vsub.f32 %v704_v44, %v728_v57 }
  0xc5   : > { %v510_v11 = vpop.f32.mrf.mxu2  ;;  %v539_v12 = vpop.f32.mrf.mxu3  ;;  %v3812_v25 = vsub.f32 %v705_v45, %v729_v61  ;;  %v732_v26 = vmul.f32 0.0009676536, %v3761_v38  ;;  %v3815_v27 = vfloor.f32 %v638_v63  ;;  %v3817_v28 = vfloor.f32 %v639_v3 }
  0xc6   : > { %v559_v16 = vpop.f32.mrf.mxu0  ;;  %v588_v17 = vpop.f32.mrf.mxu1  ;;  %5694 = vst [vmem:[#allocation16_spill] sm:$0xff] %v3810_v22  ;;  %v3819_v35 = vfloor.f32 %v642_v20  ;;  %v511_v5 = vadd.f32 %v510_v11, %v3683_v33  ;;  %v540_v6 = vadd.f32 %v539_v12, %v3683_v33  ;;  %v3825_v36 = vmul.f32 %v3803_v1, %v3803_v1 }
  0xc7   : > { %5695 = vst [vmem:[#allocation17_spill] sm:$0xff] %v3812_v25  ;;  %v3827_v42 = vsub.f32 %v708_v15, %v732_v26  ;;  %v3829_v43 = vfloor.f32 %v643_v21  ;;  %v3832_v46 = vadd.f32 %v559_v16, %v3679_v24  ;;  %v3836_v49 = vmul.f32 %v3805_v2, %v3805_v2 }
  0xc8   : > { %5696 = vst [vmem:[#allocation18_spill] sm:$0xff] %v3817_v28  ;;  %v3838_v50 = vsub.f32 %v709_v18, %v733_v19  ;;  %v690_v51 = vmul.f32 3.140625, %v3819_v35  ;;  %v3842_v54 = vadd.f32 %v588_v17, %v3679_v24  ;;  %v3846_v55 = vmul.f32 %v3810_v22, %v3810_v22 }
  0xc9   : > { %v3850_v56 = vmul.f32 %v3812_v25, %v3812_v25  ;;  %v620_v57 = vmul.f32 0.31830987, %v511_v5  ;;  %v621_v58 = vmul.f32 0.31830987, %v540_v6  ;;  %v686_v44 = vmul.f32 3.140625, %v3815_v27 }
  0xca   : > { %v687_v45 = vmul.f32 3.140625, %v3817_v28  ;;  %v714_v61 = vsub.f32 %v3785_v59, %v690_v51  ;;  %v604_v63 = vmul.f32 0.31830987, %v3832_v46  ;;  %v3858_v24 = vmul.f32 %v3827_v42, %v3827_v42 }
  0xcb   : > { %5697 = vst [vmem:[#allocation19_spill] sm:$0xff] %v3850_v56  ;;  %v691_v3 = vmul.f32 3.140625, %v3829_v43  ;;  %v644_v4 = vadd.f32 0.5, %v620_v57  ;;  %v645_v10 = vadd.f32 0.5, %v621_v58  ;;  %v3863_v15 = vmul.f32 %v3838_v50, %v3838_v50 }
  0xcc   : > { %v738_v16 = vmul.f32 0.0009676536, %v3819_v35  ;;  %v628_v17 = vadd.f32 0.5, %v604_v63  ;;  %v605_v59 = vmul.f32 0.31830987, %v3842_v54  ;;  %v710_v26 = vsub.f32 %v3752_v31, %v686_v44 }
  0xcd   : > { %v3867_v18 = vfloor.f32 %v644_v4  ;;  %v3869_v19 = vfloor.f32 %v645_v10  ;;  %v734_v51 = vmul.f32 0.0009676536, %v3815_v27  ;;  %v711_v57 = vsub.f32 %v3755_v32, %v687_v45 }
  0xce   : > { %v562_v11 = vpop.f32.mrf.mxu0  ;;  %v591_v12 = vpop.f32.mrf.mxu1  ;;  %v3880_v58 = vsub.f32 %v714_v61, %v738_v16  ;;  %v735_v63 = vmul.f32 0.0009676536, %v3817_v28  ;;  %v715_v4 = vsub.f32 %v3788_v60, %v691_v3  ;;  %v629_v31 = vadd.f32 0.5, %v605_v59 }
  0xcf   : > { %v3872_v20 = vadd.f32 %v562_v11, %v3677_v23  ;;  %v3875_v21 = vadd.f32 %v591_v12, %v3677_v23  ;;  %v692_v10 = vmul.f32 3.140625, %v3867_v18  ;;  %v693_v11 = vmul.f32 3.140625, %v3869_v19 }
  0xd0   : > { %v740_v48 = vmul.f32 0.0009676536, %v3867_v18  ;;  %v741_v23 = vmul.f32 0.0009676536, %v3869_v19  ;;  %v3888_v12 = vfloor.f32 %v628_v17  ;;  %v3892_v61 = vsub.f32 %v710_v26, %v734_v51 }
  0xd1   : > { %v716_v44 = vsub.f32 %v511_v5, %v692_v10  ;;  %v717_v47 = vsub.f32 %v540_v6, %v693_v11  ;;  %v610_v32 = vmul.f32 0.31830987, %v3872_v20  ;;  %v611_v45 = vmul.f32 0.31830987, %v3875_v21 }
  0xd2   : > { %5698 = vst [vmem:[#allocation20_spill] sm:$0xff] %v3888_v12  ;;  %v3894_v60 = vsub.f32 %v711_v57, %v735_v63  ;;  %v3898_v3 = vmul.f32 %v3880_v58, %v3880_v58  ;;  %v739_v16 = vmul.f32 0.0009676536, %v3829_v43  ;;  %v676_v11 = vmul.f32 3.140625, %v3888_v12 }
  0xd3   : > { %5699 = vst [vmem:[#allocation21_spill] sm:$0xff] %v3892_v61  ;;  %v3901_v25 = vsub.f32 %v716_v44, %v740_v48  ;;  %v3903_v17 = vsub.f32 %v717_v47, %v741_v23  ;;  %v634_v5 = vadd.f32 0.5, %v610_v32  ;;  %v635_v6 = vadd.f32 0.5, %v611_v45 }
  0xd4   : > { %5700 = vst [vmem:[#allocation22_spill] sm:$0xff] %v3894_v60  ;;  %v3906_v26 = vfloor.f32 %v629_v31  ;;  %v3914_v63 = vsub.f32 %v715_v4, %v739_v16  ;;  %v3928_v31 = vmul.f32 %v3892_v61, %v3892_v61  ;;  %v3936_v32 = vmul.f32 %v3894_v60, %v3894_v60 }
  0xd5   : > { %v3918_v47 = vmul.f32 %v3901_v25, %v3901_v25  ;;  %v3922_v48 = vmul.f32 %v3903_v17, %v3903_v17  ;;  %v3924_v23 = vfloor.f32 %v634_v5  ;;  %v3930_v44 = vfloor.f32 %v635_v6 }
  0xd6   : > { %v565_v59 = vpop.f32.mrf.mxu0  ;;  %v594_v10 = vpop.f32.mrf.mxu1  ;;  %5701 = vst [vmem:[#allocation23_spill] sm:$0xff] %v3906_v26  ;;  %v810_v5 = vmul.f32 -2.3889859e-08, %v3898_v3  ;;  %v3945_v22 = vmul.f32 %v3914_v63, %v3914_v63  ;;  %v724_v14 = vmul.f32 0.0009676536, %v3888_v12 }
  0xd7   : > { %v3909_v51 = vadd.f32 %v565_v59, %v3712_v62  ;;  %v3912_v57 = vadd.f32 %v594_v10, %v3712_v62  ;;  %5702 = vst [vmem:[#allocation24_spill] sm:$0xff] %v3924_v23  ;;  %v812_v45 = vmul.f32 -2.3889859e-08, %v3918_v47  ;;  %v813_v16 = vmul.f32 -2.3889859e-08, %v3922_v48 }
  0xd8   : > { %5703 = vst [vmem:[#allocation25_spill] sm:$0xff] %v3930_v44  ;;  %v700_v59 = vsub.f32 %v3832_v46, %v676_v11  ;;  %v677_v10 = vmul.f32 3.140625, %v3906_v26  ;;  %v682_v60 = vmul.f32 3.140625, %v3924_v23  ;;  %v683_v30 = vmul.f32 3.140625, %v3930_v44 }
  0xd9   : > { %v616_v62 = vmul.f32 0.31830987, %v3909_v51  ;;  %v617_v4 = vmul.f32 0.31830987, %v3912_v57  ;;  %v836_v61 = vadd.f32 2.7525562e-06, %v812_v45 }
  0xda   : > { %v837_v52 = vadd.f32 2.7525562e-06, %v813_v16  ;;  %v834_v45 = vadd.f32 2.7525562e-06, %v810_v5  ;;  %v3957_v16 = vsub.f32 %v700_v59, %v724_v14  ;;  %v701_v13 = vsub.f32 %v3842_v54, %v677_v10 }
  0xdb   : > { %v640_v6 = vadd.f32 0.5, %v616_v62  ;;  %v641_v53 = vadd.f32 0.5, %v617_v4  ;;  %v860_v46 = vmul.f32 %v836_v61, %v3918_v47  ;;  %v725_v62 = vmul.f32 0.0009676536, %v3906_v26 }
  0xdc   : > { %v861_v11 = vmul.f32 %v837_v52, %v3922_v48  ;;  %v730_v12 = vmul.f32 0.0009676536, %v3924_v23  ;;  %v706_v56 = vsub.f32 %v3872_v20, %v682_v60  ;;  %v707_v52 = vsub.f32 %v3875_v21, %v683_v30 }
  0xdd   : > { %v3950_v29 = vfloor.f32 %v640_v6  ;;  %v3952_v0 = vfloor.f32 %v641_v53  ;;  %v3268_v6 = vcvt.f32.s32 %v3819_v35  ;;  %v884_v9 = vadd.f32 -0.00019840874, %v860_v46 }
  0xde   : > { %v568_v4 = vpop.f32.mrf.mxu0  ;;  %v597_v28 = vpop.f32.mrf.mxu1  ;;  %v885_v53 = vadd.f32 -0.00019840874, %v861_v11  ;;  %v731_v35 = vmul.f32 0.0009676536, %v3930_v44  ;;  %v858_v10 = vmul.f32 %v834_v45, %v3898_v3  ;;  %v3972_v46 = vsub.f32 %v701_v13, %v725_v62 }
  0xdf   : > { %5704 = vst [vmem:[#allocation26_spill] sm:$0xff] %v3950_v29  ;;  %v688_v61 = vmul.f32 3.140625, %v3950_v29  ;;  %v689_v26 = vmul.f32 3.140625, %v3952_v0  ;;  %v569_v5 = vadd.f32 %v568_v4, %v3683_v33  ;;  %v598_v14 = vadd.f32 %v597_v28, %v3683_v33 }
  0xe0   : > { %5705 = vst [vmem:[#allocation27_spill] sm:$0xff] %v3952_v0  ;;  %v908_v54 = vmul.f32 %v884_v9, %v3918_v47  ;;  %v909_v59 = vmul.f32 %v885_v53, %v3922_v48  ;;  %v3974_v11 = vand.u32 1, %v3268_v6  ;;  %v3976_v21 = vsub.f32 %v706_v56, %v730_v12 }
  0xe1   : > { %5706 = vst [vmem:[#allocation28_spill] sm:$0xff] %v3972_v46  ;;  %v622_v20 = vmul.f32 0.31830987, %v569_v5  ;;  %v623_v60 = vmul.f32 0.31830987, %v598_v14  ;;  %v712_v4 = vsub.f32 %v3909_v51, %v688_v61  ;;  %v3979_v28 = vsub.f32 %v707_v52, %v731_v35 }
  0xe2   : > { %v932_v30 = vadd.f32 0.008333331, %v908_v54  ;;  %5707 = vst [vmem:[#allocation29_spill] sm:$0xff] %v3976_v21  ;;  %v882_v33 = vadd.f32 -0.00019840874, %v858_v10  ;;  %v713_v9 = vsub.f32 %v3912_v57, %v689_v26  ;;  %v3994_v26 = vmul.f32 %v3976_v21, %v3976_v21 }
  0xe3   : > { %5708 = vst [vmem:[#allocation30_spill] sm:$0xff] %v3979_v28  ;;  %v646_v53 = vadd.f32 0.5, %v622_v20  ;;  %v647_v44 = vadd.f32 0.5, %v623_v60  ;;  %v933_v23 = vadd.f32 0.008333331, %v909_v59  ;;  %vm1122_vm2 = vcmp.eq.s32.totalorder %v3974_v11, 1 }
  0xe4   : > { %v736_v13 = vmul.f32 0.0009676536, %v3950_v29  ;;  %v906_v62 = vmul.f32 %v882_v33, %v3898_v3  ;;  %v811_v45 = vmul.f32 -2.3889859e-08, %v3945_v22  ;;  %v737_v6 = vmul.f32 0.0009676536, %v3952_v0 }
  0xe5   : > { %v3986_v56 = vfloor.f32 %v646_v53  ;;  %v3988_v12 = vfloor.f32 %v647_v44  ;;  %v804_v51 = vmul.f32 -2.3889859e-08, %v3858_v24  ;;  %v956_v61 = vmul.f32 %v932_v30, %v3918_v47 }
  0xe6   : > { %v3996_v57 = vsub.f32 %v712_v4, %v736_v13  ;;  %v930_v52 = vadd.f32 0.008333331, %v906_v62  ;;  %v3998_v54 = vsub.f32 %v713_v9, %v737_v6  ;;  %v3270_v44 = vcvt.f32.s32 %v3829_v43 }
  0xe7   : > { %v694_v59 = vmul.f32 3.140625, %v3986_v56  ;;  %v695_v35 = vmul.f32 3.140625, %v3988_v12  ;;  %v957_v10 = vmul.f32 %v933_v23, %v3922_v48  ;;  %v742_v20 = vmul.f32 0.0009676536, %v3986_v56 }
  0xe8   : > { %5709 = vst [vmem:[#allocation31_spill] sm:$0xff] %v3996_v57  ;;  %v954_v60 = vmul.f32 %v930_v52, %v3898_v3  ;;  %v835_v30 = vadd.f32 2.7525562e-06, %v811_v45  ;;  %v743_v4 = vmul.f32 0.0009676536, %v3988_v12  ;;  %v4009_v62 = vmul.f32 %v3979_v28, %v3979_v28 }
  0xe9   : > { %5710 = vst [vmem:[#allocation32_spill] sm:$0xff] %v3998_v54  ;;  %v718_v33 = vsub.f32 %v569_v5, %v694_v59  ;;  %v719_v53 = vsub.f32 %v598_v14, %v695_v35  ;;  %v828_v13 = vadd.f32 2.7525562e-06, %v804_v51  ;;  %v980_v9 = vadd.f32 -0.16666667, %v956_v61 }
  0xea   : > { %v978_v6 = vadd.f32 -0.16666667, %v954_v60  ;;  %v859_v43 = vmul.f32 %v835_v30, %v3945_v22  ;;  %v4014_v23 = vmul.f32 %v3996_v57, %v3996_v57  ;;  %v981_v14 = vadd.f32 -0.16666667, %v957_v10 }
  0xeb   : > { %v4016_v21 = vsub.f32 %v718_v33, %v742_v20  ;;  %v4018_v45 = vsub.f32 %v719_v53, %v743_v4  ;;  %v852_v5 = vmul.f32 %v828_v13, %v3858_v24  ;;  %v4024_v51 = vmul.f32 %v3998_v54, %v3998_v54 }
  0xec   : > { %v1002_v61 = vmul.f32 %v978_v6, %v3898_v3  ;;  %v883_v52 = vadd.f32 -0.00019840874, %v859_v43  ;;  %v4035_v20 = vand.u32 1, %v3270_v44  ;;  %v1004_v10 = vmul.f32 %v980_v9, %v3918_v47 }
  0xed   : > { %v4029_v59 = vmul.f32 %v4016_v21, %v4016_v21  ;;  %v4033_v35 = vmul.f32 %v4018_v45, %v4018_v45  ;;  %v876_v60 = vadd.f32 -0.00019840874, %v852_v5  ;;  %v805_v53 = vmul.f32 -2.3889859e-08, %v3863_v15 }
  0xee   : > { %v1026_v30 = vadd.f32 1.0, %v1002_v61  ;;  %v907_v33 = vmul.f32 %v883_v52, %v3945_v22  ;;  %v798_v6 = vmul.f32 -2.3889859e-08, %v3825_v36  ;;  %v1005_v43 = vmul.f32 %v981_v14, %v3922_v48 }
  0xef   : > { %v814_v3 = vmul.f32 -2.3889859e-08, %v4029_v59  ;;  %v815_v4 = vmul.f32 -2.3889859e-08, %v4033_v35  ;;  %v900_v13 = vmul.f32 %v876_v60, %v3858_v24  ;;  %v829_v28 = vadd.f32 2.7525562e-06, %v805_v53 }
  0xf0   : > { %v1050_v44 = vmul.f32 %v1026_v30, %v3880_v58  ;;  %v931_v5 = vadd.f32 0.008333331, %v907_v33  ;;  %v3256_v52 = vcvt.f32.s32 %v3761_v38  ;;  %v1028_v54 = vadd.f32 1.0, %v1004_v10 }
  0xf1   : > { %v838_v47 = vadd.f32 2.7525562e-06, %v814_v3  ;;  %v839_v9 = vadd.f32 2.7525562e-06, %v815_v4  ;;  %v924_v61 = vadd.f32 0.008333331, %v900_v13  ;;  %v853_v29 = vmul.f32 %v829_v28, %v3863_v15 }
  0xf2   : > { %v1146_v57 = vsub.f32 0.0, %v1050_v44  ;;  %v955_v0 = vmul.f32 %v931_v5, %v3945_v22  ;;  %v822_v58 = vadd.f32 2.7525562e-06, %v798_v6  ;;  %v1029_v14 = vadd.f32 1.0, %v1005_v43 }
  0xf3   : > { %v862_v60 = vmul.f32 %v838_v47, %v4029_v59  ;;  %v863_v46 = vmul.f32 %v839_v9, %v4033_v35  ;;  %v948_v48 = vmul.f32 %v924_v61, %v3858_v24  ;;  %v877_v53 = vadd.f32 -0.00019840874, %v853_v29 }
  0xf4   : > { %v1170_v30 = vsel %vm1122_vm2, %v1146_v57, %v1050_v44  ;;  %v979_v33 = vadd.f32 -0.16666667, %v955_v0  ;;  %vm1123_vm3 = vcmp.eq.s32.totalorder %v4035_v20, 1  ;;  %v846_v28 = vmul.f32 %v822_v58, %v3825_v36 }
  0xf5   : > { %v886_v38 = vadd.f32 -0.00019840874, %v862_v60  ;;  %v887_v10 = vadd.f32 -0.00019840874, %v863_v46  ;;  %1229 = vmatpush.msrb.mxu2 %v1170_v30  ;;  %v972_v3 = vadd.f32 -0.16666667, %v948_v48  ;;  %v901_v5 = vmul.f32 %v877_v53, %v3863_v15 }
  0xf6   : > { %v1003_v4 = vmul.f32 %v979_v33, %v3945_v22  ;;  %v1092_v13 = vand.u32 1, %v3256_v52  ;;  %v799_v6 = vmul.f32 -2.3889859e-08, %v3836_v49  ;;  %v870_v46 = vadd.f32 -0.00019840874, %v846_v28 }
  0xf7   : > { %v910_v11 = vmul.f32 %v886_v38, %v4029_v59  ;;  %v911_v0 = vmul.f32 %v887_v10, %v4033_v35  ;;  %v996_v29 = vmul.f32 %v972_v3, %v3858_v24  ;;  %v925_v43 = vadd.f32 0.008333331, %v901_v5 }
  0xf8   : > { %v1027_v57 = vadd.f32 1.0, %v1003_v4  ;;  %v3258_v44 = vcvt.f32.s32 %v3763_v39  ;;  %v823_v47 = vadd.f32 2.7525562e-06, %v799_v6  ;;  %v894_v52 = vmul.f32 %v870_v46, %v3825_v36 }
  0xf9   : > { %v934_v9 = vadd.f32 0.008333331, %v910_v11  ;;  %v935_v61 = vadd.f32 0.008333331, %v911_v0  ;;  %v1020_v22 = vadd.f32 1.0, %v996_v29  ;;  %vm1116_vm4 = vcmp.eq.s32.totalorder %v1092_v13, 1 }
  0xfa   : > { %v1051_v60 = vmul.f32 %v1027_v57, %v3914_v63  ;;  %v949_v48 = vmul.f32 %v925_v43, %v3863_v15  ;;  %v847_v58 = vmul.f32 %v823_v47, %v3836_v49  ;;  %v918_v33 = vadd.f32 0.008333331, %v894_v52 }
  0xfb   : > { %v958_v24 = vmul.f32 %v934_v9, %v4029_v59  ;;  %v1044_v30 = vmul.f32 %v1020_v22, %v3827_v42  ;;  %v3244_v39 = vcvt.f32.s32 %v3729_v7  ;;  %v1093_v10 = vand.u32 1, %v3258_v44 }
  0xfc   : > { %v1147_v53 = vsub.f32 0.0, %v1051_v60  ;;  %v973_v38 = vadd.f32 -0.16666667, %v949_v48  ;;  %v871_v3 = vadd.f32 -0.00019840874, %v847_v58  ;;  %v959_v28 = vmul.f32 %v935_v61, %v4033_v35 }
  0xfd   : > { %v1140_v4 = vsub.f32 0.0, %v1044_v30  ;;  %v942_v63 = vmul.f32 %v918_v33, %v3825_v36  ;;  %v3246_v5 = vcvt.f32.s32 %v3731_v8  ;;  %v792_v7 = vmul.f32 -2.3889859e-08, %v3759_v37 }
  0xfe   : > { %v1171_v6 = vsel %vm1123_vm3, %v1147_v53, %v1051_v60  ;;  %v997_v11 = vmul.f32 %v973_v38, %v3863_v15  ;;  %v895_v42 = vmul.f32 %v871_v3, %v3836_v49  ;;  %v982_v0 = vadd.f32 -0.16666667, %v958_v24 }
  0xff   : > { %1258 = vmatpush.msrb.mxu3 %v1171_v6  ;;  %v1164_v29 = vsel %vm1116_vm4, %v1140_v4, %v1044_v30  ;;  %v966_v46 = vadd.f32 -0.16666667, %v942_v63  ;;  %v1086_v57 = vand.u32 1, %v3244_v39  ;;  %v1052_v43 = vmul.f32 %v1028_v54, %v3901_v25 }
 0x100   : > { %1230 = vmatpush.msrb.mxu2 %v1164_v29  ;;  %v1021_v44 = vadd.f32 1.0, %v997_v11  ;;  %v919_v8 = vadd.f32 0.008333331, %v895_v42  ;;  %v816_v47 = vadd.f32 2.7525562e-06, %v792_v7  ;;  %v1087_v15 = vand.u32 1, %v3246_v5 }
 0x101   : > { %v983_v20 = vadd.f32 -0.16666667, %v959_v28  ;;  %v990_v9 = vmul.f32 %v966_v46, %v3825_v36  ;;  %v793_v61 = vmul.f32 -2.3889859e-08, %v3767_v40  ;;  %v1053_v22 = vmul.f32 %v1029_v14, %v3903_v17 }
 0x102   : > { %v1045_v52 = vmul.f32 %v1021_v44, %v3838_v50  ;;  %v943_v13 = vmul.f32 %v919_v8, %v3836_v49  ;;  %v840_v60 = vmul.f32 %v816_v47, %v3759_v37  ;;  %vm1117_vm5 = vcmp.eq.s32.totalorder %v1093_v10, 1 }
 0x103   : > { %v1014_v25 = vadd.f32 1.0, %v990_v9  ;;  %vm1110_vm6 = vcmp.eq.s32.totalorder %v1086_v57, 1  ;;  %v817_v54 = vadd.f32 2.7525562e-06, %v793_v61  ;;  %v1006_v48 = vmul.f32 %v982_v0, %v4029_v59 }
 0x104   : > { %v1141_v58 = vsub.f32 0.0, %v1045_v52  ;;  %v967_v24 = vadd.f32 -0.16666667, %v943_v13  ;;  %v864_v36 = vadd.f32 -0.00019840874, %v840_v60  ;;  %v1007_v30 = vmul.f32 %v983_v20, %v4033_v35 }
 0x105   : > { %v1038_v33 = vmul.f32 %v1014_v25, %v3803_v1  ;;  %vm1111_vm7 = vcmp.eq.s32.totalorder %v1087_v15, 1  ;;  %v841_v50 = vmul.f32 %v817_v54, %v3767_v40  ;;  %v3272_v17 = vcvt.f32.s32 %v3867_v18 }
 0x106   : > { %v1165_v14 = vsel %vm1117_vm5, %v1141_v58, %v1045_v52  ;;  %v991_v39 = vmul.f32 %v967_v24, %v3836_v49  ;;  %v888_v53 = vmul.f32 %v864_v36, %v3759_v37  ;;  %v1148_v38 = vsub.f32 0.0, %v1052_v43 }
 0x107   : > { %1259 = vmatpush.msrb.mxu3 %v1165_v14  ;;  %v1134_v59 = vsub.f32 0.0, %v1038_v33  ;;  %v3232_v10 = vcvt.f32.s32 %v3685_v34  ;;  %v865_v3 = vadd.f32 -0.00019840874, %v841_v50  ;;  %v1100_v28 = vand.u32 1, %v3272_v17 }
 0x108   : > { %v1015_v35 = vadd.f32 1.0, %v991_v39  ;;  %v912_v4 = vadd.f32 0.008333331, %v888_v53  ;;  %v3234_v1 = vcvt.f32.s32 %v3693_v41  ;;  %v3274_v63 = vcvt.f32.s32 %v3869_v19 }
 0x109   : > { %v1158_v18 = vsel %vm1110_vm6, %v1134_v59, %v1038_v33  ;;  %v889_v5 = vmul.f32 %v865_v3, %v3767_v40  ;;  %vm1124_vm8 = vcmp.eq.s32.totalorder %v1100_v28, 1  ;;  %v1149_v49 = vsub.f32 0.0, %v1053_v22 }
 0x10a   : > { %1231 = vmatpush.msrb.mxu2 %v1158_v18  ;;  %v1039_v6 = vmul.f32 %v1015_v35, %v3805_v2  ;;  %v936_v11 = vmul.f32 %v912_v4, %v3759_v37  ;;  %v1172_v34 = vsel %vm1124_vm8, %v1148_v38, %v1052_v43  ;;  %v1101_v42 = vand.u32 1, %v3274_v63  ;;  %v5713_v38 = vld [vmem:[#allocation9_spill] sm:$0xff]  ;;  %v5714_v63 = vld [vmem:[#allocation18_spill] sm:$0xff] }
 0x10b   : > { %v1030_v7 = vadd.f32 1.0, %v1006_v48  ;;  %v1031_v0 = vadd.f32 1.0, %v1007_v30  ;;  %v913_v29 = vadd.f32 0.008333331, %v889_v5  ;;  %1287 = vmatpush.msra.mxu0 %v1172_v34  ;;  %v806_v41 = vmul.f32 -2.3889859e-08, %v3928_v31 }
 0x10c   : > { %v1135_v19 = vsub.f32 0.0, %v1039_v6  ;;  %v960_v46 = vadd.f32 -0.16666667, %v936_v11  ;;  %vm1125_vm9 = vcmp.eq.s32.totalorder %v1101_v42, 1  ;;  %v807_v57 = vmul.f32 -2.3889859e-08, %v3936_v32 }
 0x10d   : > { %v1080_v44 = vand.u32 1, %v3232_v10  ;;  %v937_v8 = vmul.f32 %v913_v29, %v3767_v40  ;;  %v1173_v47 = vsel %vm1125_vm9, %v1149_v49, %v1053_v22  ;;  %v830_v2 = vadd.f32 2.7525562e-06, %v806_v41  ;;  %v5712_v30 = vld [vmem:[#allocation8_spill] sm:$0xff]  ;;  %v5715_v5 = vld [vmem:[#allocation14_spill] sm:$0xff]  ;;  %v5717_v41 = vld [vmem:[#allocation11_spill] sm:$0xff] }
 0x10e   : > { %v1159_v20 = vsel %vm1111_vm7, %v1135_v19, %v1039_v6  ;;  %v984_v43 = vmul.f32 %v960_v46, %v3759_v37  ;;  %v1081_v9 = vand.u32 1, %v3234_v1  ;;  %1316 = vmatpush.msra.mxu1 %v1173_v47  ;;  %v831_v61 = vadd.f32 2.7525562e-06, %v807_v57  ;;  %v4127_v10 = vld [vmem:[%s5609_s3] sm:$0xff] }
 0x10f   : > { %v4106_v52 = vmul.f32 %v1030_v7, %v4016_v21  ;;  %1260 = vmatpush.msrb.mxu3 %v1159_v20  ;;  %v961_v13 = vadd.f32 -0.16666667, %v937_v8  ;;  %v854_v60 = vmul.f32 %v830_v2, %v3928_v31  ;;  %v800_v25 = vmul.f32 -2.3889859e-08, %v3846_v55  ;;  %v5711_v21 = vld [vmem:[#allocation19_spill] sm:$0xff] }
 0x110   : > { %v4111_v54 = vmul.f32 %v1031_v0, %v4018_v45  ;;  %v1008_v22 = vadd.f32 1.0, %v984_v43  ;;  %v3260_v15 = vcvt.f32.s32 %v3815_v27  ;;  %v855_v37 = vmul.f32 %v831_v61, %v3936_v32  ;;  %v5716_v0 = vld [vmem:[#allocation10_spill] sm:$0xff]  ;;  %v5718_v43 = vld [vmem:[#allocation15_spill] sm:$0xff] }
 0x111   : > { %v985_v48 = vmul.f32 %v961_v13, %v3767_v40  ;;  %v878_v58 = vadd.f32 -0.00019840874, %v854_v60  ;;  %v824_v24 = vadd.f32 2.7525562e-06, %v800_v25  ;;  %v801_v36 = vmul.f32 -2.3889859e-08, %v5711_v21 }
 0x112   : > { %v1032_v33 = vmul.f32 %v1008_v22, %v5712_v30  ;;  %vm1104_vm10 = vcmp.eq.s32.totalorder %v1080_v44, 1  ;;  %vm1105_vm11 = vcmp.eq.s32.totalorder %v1081_v9, 1  ;;  %v879_v50 = vadd.f32 -0.00019840874, %v855_v37 }
 0x113   : > { %v1009_v17 = vadd.f32 1.0, %v985_v48  ;;  %v902_v45 = vmul.f32 %v878_v58, %v3928_v31  ;;  %v848_v14 = vmul.f32 %v824_v24, %v3846_v55  ;;  %v825_v39 = vadd.f32 2.7525562e-06, %v801_v36 }
 0x114   : > { %v1128_v27 = vsub.f32 0.0, %v1032_v33  ;;  %v4120_v53 = vand.u32 1, %v3260_v15  ;;  %v903_v40 = vmul.f32 %v879_v50, %v3936_v32  ;;  %v3262_v18 = vcvt.f32.s32 %v5714_v63 }
 0x115   : > { %v1033_v59 = vmul.f32 %v1009_v17, %v5713_v38  ;;  %v926_v3 = vadd.f32 0.008333331, %v902_v45  ;;  %v872_v28 = vadd.f32 -0.00019840874, %v848_v14  ;;  %v849_v35 = vmul.f32 %v825_v39, %v5711_v21  ;;  %v5719_v17 = vld [vmem:[#allocation6_spill] sm:$0xff]  ;;  %v5720_v14 = vld [vmem:[#allocation21_spill] sm:$0xff] }
 0x116   : > { %v1152_v4 = vsel %vm1104_vm10, %v1128_v27, %v1032_v33  ;;  %v927_v1 = vadd.f32 0.008333331, %v903_v40  ;;  %v794_v49 = vmul.f32 -2.3889859e-08, %v5715_v5  ;;  %v3248_v29 = vcvt.f32.s32 %v5716_v0  ;;  %v4154_v33 = vld [vmem:[%s5609_s3 + $0x8] sm:$0xff]  ;;  %v5721_v38 = vld [vmem:[#allocation22_spill] sm:$0xff] }
 0x117   : > { %1232 = vmatpush.msrb.mxu2 %v1152_v4  ;;  %v1129_v6 = vsub.f32 0.0, %v1033_v59  ;;  %v950_v11 = vmul.f32 %v926_v3, %v3928_v31  ;;  %v896_v34 = vmul.f32 %v872_v28, %v3846_v55  ;;  %v873_v42 = vadd.f32 -0.00019840874, %v849_v35 }
 0x118   : > { %3173 = vmatmul.msk.f32.vlgmr.msrb.gmra.mxu2 %vm1204_vm12, %v4127_v10  ;;  %v951_v7 = vmul.f32 %v927_v1, %v3936_v32  ;;  %v3250_v19 = vcvt.f32.s32 %v5717_v41  ;;  %v818_v46 = vadd.f32 2.7525562e-06, %v794_v49  ;;  %vm1118_vm13 = vcmp.eq.s32.totalorder %v4120_v53, 1 }
 0x119   : > { %v1153_v57 = vsel %vm1105_vm11, %v1129_v6, %v1033_v59  ;;  %v974_v44 = vadd.f32 -0.16666667, %v950_v11  ;;  %v920_v8 = vadd.f32 0.008333331, %v896_v34  ;;  %v897_v47 = vmul.f32 %v873_v42, %v5711_v21  ;;  %v5722_v11 = vld [vmem:[#allocation16_spill] sm:$0xff] }
 0x11a   : > { %1261 = vmatpush.msrb.mxu3 %v1153_v57  ;;  %v975_v2 = vadd.f32 -0.16666667, %v951_v7  ;;  %v842_v20 = vmul.f32 %v818_v46, %v5715_v5  ;;  %v795_v61 = vmul.f32 -2.3889859e-08, %v5718_v43  ;;  %v1095_v60 = vand.u32 1, %v3262_v18  ;;  %v5723_v7 = vld [vmem:[#allocation7_spill] sm:$0xff] }
 0x11b   : > { %3177 = vmatmul.msk.f32.vlgmr.msrb.gmra.mxu3 %vm1204_vm12, %v4127_v10  ;;  %v998_v13 = vmul.f32 %v974_v44, %v3928_v31  ;;  %v944_v9 = vmul.f32 %v920_v8, %v3846_v55  ;;  %v921_v25 = vadd.f32 0.008333331, %v897_v47  ;;  %v1088_v15 = vand.u32 1, %v3248_v29  ;;  %v5724_v57 = vld [vmem:[#allocation17_spill] sm:$0xff] }
 0x11c   : > { %v999_v22 = vmul.f32 %v975_v2, %v3936_v32  ;;  %v866_v37 = vadd.f32 -0.00019840874, %v842_v20  ;;  %v819_v48 = vadd.f32 2.7525562e-06, %v795_v61  ;;  %v1089_v30 = vand.u32 1, %v3250_v19  ;;  %v4179_v44 = vld [vmem:[%s5609_s3 + $0x10] sm:$0xff] }
 0x11d   : > { %v1022_v58 = vadd.f32 1.0, %v998_v13  ;;  %v968_v24 = vadd.f32 -0.16666667, %v944_v9  ;;  %v945_v36 = vmul.f32 %v921_v25, %v5711_v21  ;;  %v3236_v45 = vcvt.f32.s32 %v5719_v17 }
 0x11e   : > { %v1023_v31 = vadd.f32 1.0, %v999_v22  ;;  %v890_v50 = vmul.f32 %v866_v37, %v5715_v5  ;;  %v843_v32 = vmul.f32 %v819_v48, %v5718_v43  ;;  %vm1119_vm14 = vcmp.eq.s32.totalorder %v1095_v60, 1 }
 0x11f   : > { %v1046_v39 = vmul.f32 %v1022_v58, %v5720_v14  ;;  %v992_v27 = vmul.f32 %v968_v24, %v3846_v55  ;;  %v969_v40 = vadd.f32 -0.16666667, %v945_v36  ;;  %vm1112_vm15 = vcmp.eq.s32.totalorder %v1088_v15, 1  ;;  %v5725_v58 = vld [vmem:[#allocation12_spill] sm:$0xff] }
 0x120   : > { %v1047_v59 = vmul.f32 %v1023_v31, %v5721_v38  ;;  %v914_v3 = vadd.f32 0.008333331, %v890_v50  ;;  %v867_v28 = vadd.f32 -0.00019840874, %v843_v32  ;;  %3174 = vmatmul.msk.f32.gmra.mxu2 %vm1204_vm12, %v4154_v33  ;;  %vm1113_vm1 = vcmp.eq.s32.totalorder %v1089_v30, 1 }
 0x121   : > { %v1142_v35 = vsub.f32 0.0, %v1046_v39  ;;  %v1016_v4 = vadd.f32 1.0, %v992_v27  ;;  %v993_v1 = vmul.f32 %v969_v40, %v5711_v21  ;;  %v1082_v49 = vand.u32 1, %v3236_v45 }
 0x122   : > { %v1143_v63 = vsub.f32 0.0, %v1047_v59  ;;  %v938_v18 = vmul.f32 %v914_v3, %v5715_v5  ;;  %v891_v55 = vmul.f32 %v867_v28, %v5718_v43  ;;  %v3238_v0 = vcvt.f32.s32 %v5723_v7 }
 0x123   : > { %v1166_v6 = vsel %vm1118_vm13, %v1142_v35, %v1046_v39  ;;  %v1040_v34 = vmul.f32 %v1016_v4, %v5722_v11  ;;  %v1017_v42 = vadd.f32 1.0, %v993_v1  ;;  %3178 = vmatmul.msk.f32.gmra.mxu3 %vm1204_vm12, %v4154_v33  ;;  %v3276_v19 = vcvt.f32.s32 %v3986_v56  ;;  %v4209_v39 = vld [vmem:[%s5609_s3 + $0x18] sm:$0xff]  ;;  %v5727_v4 = vld [vmem:[#allocation28_spill] sm:$0xff] }
 0x124   : > { %1288 = vmatpush.msra.mxu0 %v1166_v6  ;;  %v1167_v21 = vsel %vm1119_vm14, %v1143_v63, %v1047_v59  ;;  %v962_v29 = vadd.f32 -0.16666667, %v938_v18  ;;  %v915_v41 = vadd.f32 0.008333331, %v891_v55  ;;  %v1150_v8 = vsub.f32 0.0, %v4106_v52  ;;  %v5726_v59 = vld [vmem:[#allocation13_spill] sm:$0xff] }
 0x125   : > { %1317 = vmatpush.msra.mxu1 %v1167_v21  ;;  %v1136_v46 = vsub.f32 0.0, %v1040_v34  ;;  %v1041_v53 = vmul.f32 %v1017_v42, %v5724_v57  ;;  %v3278_v47 = vcvt.f32.s32 %v3988_v12  ;;  %v1102_v61 = vand.u32 1, %v3276_v19  ;;  %v5728_v19 = vld [vmem:[#allocation26_spill] sm:$0xff] }
 0x126   : > { %v986_v2 = vmul.f32 %v962_v29, %v5715_v5  ;;  %v939_v20 = vmul.f32 %v915_v41, %v5718_v43  ;;  %v1151_v56 = vsub.f32 0.0, %v4111_v54  ;;  %v808_v25 = vmul.f32 -2.3889859e-08, %v4014_v23 }
 0x127   : > { %v1160_v13 = vsel %vm1112_vm15, %v1136_v46, %v1040_v34  ;;  %v1137_v60 = vsub.f32 0.0, %v1041_v53  ;;  %v1103_v9 = vand.u32 1, %v3278_v47  ;;  %vm1126_vm2 = vcmp.eq.s32.totalorder %v1102_v61, 1  ;;  %v5729_v47 = vld [vmem:[#allocation27_spill] sm:$0xff] }
 0x128   : > { %1289 = vmatpush.msra.mxu0 %v1160_v13  ;;  %v1010_v22 = vadd.f32 1.0, %v986_v2  ;;  %v963_v37 = vadd.f32 -0.16666667, %v939_v20  ;;  %3175 = vmatmul.msk.f32.gmra.mxu2 %vm1204_vm12, %v4179_v44  ;;  %v809_v12 = vmul.f32 -2.3889859e-08, %v4024_v51  ;;  %v1174_v48 = vsel %vm1126_vm2, %v1150_v8, %v4106_v52 }
 0x129   : > { %v1161_v5 = vsel %vm1113_vm1, %v1137_v60, %v1041_v53  ;;  %vm1127_vm3 = vcmp.eq.s32.totalorder %v1103_v9, 1  ;;  %v832_v15 = vadd.f32 2.7525562e-06, %v808_v25  ;;  %1345 = vmatpush.msra.mxu2 %v1174_v48  ;;  %v4198_v17 = vmul.f32 %v3957_v16, %v3957_v16  ;;  %v1183_v48 = vld [vmem:[%s5610_s4 + $0x18] sm:$0xff] }
 0x12a   : > { %1318 = vmatpush.msra.mxu1 %v1161_v5  ;;  %v1034_v24 = vmul.f32 %v1010_v22, %v5725_v58  ;;  %v987_v36 = vmul.f32 %v963_v37, %v5718_v43  ;;  %v1175_v31 = vsel %vm1127_vm3, %v1151_v56, %v4111_v54  ;;  %v833_v50 = vadd.f32 2.7525562e-06, %v809_v12  ;;  %1201 = vperm.xlu2 %3428, %v1183_v48  }
 0x12b   : > { %vm1106_vm4 = vcmp.eq.s32.totalorder %v1082_v49, 1  ;;  %3179 = vmatmul.msk.f32.gmra.mxu3 %vm1204_vm12, %v4179_v44  ;;  %v856_v52 = vmul.f32 %v832_v15, %v4014_v23  ;;  %v802_v30 = vmul.f32 -2.3889859e-08, %v3994_v26  ;;  %v803_v54 = vmul.f32 -2.3889859e-08, %v4009_v62 }
 0x12c   : > { %v1130_v45 = vsub.f32 0.0, %v1034_v24  ;;  %v1011_v32 = vadd.f32 1.0, %v987_v36  ;;  %1374 = vmatpush.msra.mxu3 %v1175_v31  ;;  %v857_v43 = vmul.f32 %v833_v50, %v4024_v51  ;;  %v1083_v14 = vand.u32 1, %v3238_v0  ;;  %v5730_v50 = vld [vmem:[#allocation24_spill] sm:$0xff] }
 0x12d   : > { %v880_v27 = vadd.f32 -0.00019840874, %v856_v52  ;;  %v826_v40 = vadd.f32 2.7525562e-06, %v802_v30  ;;  %v827_v35 = vadd.f32 2.7525562e-06, %v803_v54  ;;  %v4214_v1 = vmul.f32 %v5727_v4, %v5727_v4 }
 0x12e   : > { %v1154_v38 = vsel %vm1106_vm4, %v1130_v45, %v1034_v24  ;;  %v1035_v3 = vmul.f32 %v1011_v32, %v5726_v59  ;;  %v881_v28 = vadd.f32 -0.00019840874, %v857_v43  ;;  %v796_v11 = vmul.f32 -2.3889859e-08, %v4198_v17  ;;  %v5731_v43 = vld [vmem:[#allocation25_spill] sm:$0xff]  ;;  %v5733_v59 = vld [vmem:[#allocation32_spill] sm:$0xff] }
 0x12f   : > { %1290 = vmatpush.msra.mxu0 %v1154_v38  ;;  %v904_v63 = vmul.f32 %v880_v27, %v4014_v23  ;;  %v850_v18 = vmul.f32 %v826_v40, %v3994_v26  ;;  %v851_v6 = vmul.f32 %v827_v35, %v4009_v62  ;;  %vm1107_vm5 = vcmp.eq.s32.totalorder %v1083_v14, 1  ;;  %v5732_v27 = vld [vmem:[#allocation31_spill] sm:$0xff] }
 0x130   : > { %v1131_v49 = vsub.f32 0.0, %v1035_v3  ;;  %3181 = vmatmul.msk.f32.vlgmr.msra.gmra.mxu0 %vm1204_vm12, %v4127_v10  ;;  %3176 = vmatmul.msk.f32.gmra.mxu2 %vm1204_vm12, %v4209_v39  ;;  %v905_v55 = vmul.f32 %v881_v28, %v4024_v51  ;;  %v820_v29 = vadd.f32 2.7525562e-06, %v796_v11  ;;  %v3264_v46 = vcvt.f32.s32 %v5728_v19 }
 0x131   : > { %v928_v34 = vadd.f32 0.008333331, %v904_v63  ;;  %v874_v42 = vadd.f32 -0.00019840874, %v850_v18  ;;  %v875_v21 = vadd.f32 -0.00019840874, %v851_v6  ;;  %v3266_v2 = vcvt.f32.s32 %v5729_v47 }
 0x132   : > { %v1155_v7 = vsel %vm1107_vm5, %v1131_v49, %v1035_v3  ;;  %v929_v0 = vadd.f32 0.008333331, %v905_v55  ;;  %v797_v53 = vmul.f32 -2.3889859e-08, %v4214_v1  ;;  %v844_v61 = vmul.f32 %v820_v29, %v4198_v17 }
 0x133   : > { %1319 = vmatpush.msra.mxu1 %v1155_v7  ;;  %3180 = vmatmul.msk.f32.gmra.mxu3 %vm1204_vm12, %v4209_v39  ;;  %v952_v41 = vmul.f32 %v928_v34, %v4014_v23  ;;  %v898_v57 = vmul.f32 %v874_v42, %v3994_v26  ;;  %v899_v20 = vmul.f32 %v875_v21, %v4009_v62  ;;  %v1096_v37 = vand.u32 1, %v3264_v46  ;;  %v5734_v7 = vld [vmem:[#allocation29_spill] sm:$0xff]  ;;  %v5735_v21 = vld [vmem:[#allocation20_spill] sm:$0xff]  ;;  %v5736_v46 = vld [vmem:[#allocation30_spill] sm:$0xff] }
 0x134   : > { %3185 = vmatmul.msk.f32.vlgmr.msra.gmra.mxu1 %vm1204_vm12, %v4127_v10  ;;  %v953_v8 = vmul.f32 %v929_v0, %v4024_v51  ;;  %v868_v25 = vadd.f32 -0.00019840874, %v844_v61  ;;  %v821_v5 = vadd.f32 2.7525562e-06, %v797_v53  ;;  %v1097_v58 = vand.u32 1, %v3266_v2 }
 0x135   : > { %v976_v56 = vadd.f32 -0.16666667, %v952_v41  ;;  %v922_v13 = vadd.f32 0.008333331, %v898_v57  ;;  %v923_v9 = vadd.f32 0.008333331, %v899_v20  ;;  %v3252_v52 = vcvt.f32.s32 %v5730_v50 }
 0x136   : > { %v977_v60 = vadd.f32 -0.16666667, %v953_v8  ;;  %v892_v36 = vmul.f32 %v868_v25, %v4198_v17  ;;  %v845_v30 = vmul.f32 %v821_v5, %v4214_v1  ;;  %v3254_v54 = vcvt.f32.s32 %v5731_v43  ;;  %v1974_v5 = vld [vmem:[%s5612_s6 + $0x18] sm:$0xff] }
 0x137   : > { %v1000_v22 = vmul.f32 %v976_v56, %v4014_v23  ;;  %v946_v12 = vmul.f32 %v922_v13, %v3994_v26  ;;  %v947_v24 = vmul.f32 %v923_v9, %v4009_v62  ;;  %vm1120_vm6 = vcmp.eq.s32.totalorder %v1096_v37, 1 }
 0x138   : > { %3182 = vmatmul.msk.f32.gmra.mxu0 %vm1204_vm12, %v4154_v33  ;;  %v1001_v15 = vmul.f32 %v977_v60, %v4024_v51  ;;  %v916_v14 = vadd.f32 0.008333331, %v892_v36  ;;  %v869_v38 = vadd.f32 -0.00019840874, %v845_v30  ;;  %vm1121_vm7 = vcmp.eq.s32.totalorder %v1097_v58, 1  ;;  %v4302_v36 = vpop.permute.xlu1 %1186 }
 0x139   : > { %v1024_v23 = vadd.f32 1.0, %v1000_v22  ;;  %v970_v31 = vadd.f32 -0.16666667, %v946_v12  ;;  %v971_v32 = vadd.f32 -0.16666667, %v947_v24  ;;  %v1090_v49 = vand.u32 1, %v3252_v52 }
 0x13a   : > { %v1025_v45 = vadd.f32 1.0, %v1001_v15  ;;  %v940_v35 = vmul.f32 %v916_v14, %v4198_v17  ;;  %v893_v55 = vmul.f32 %v869_v38, %v4214_v1  ;;  %v1091_v34 = vand.u32 1, %v3254_v54  ;;  %v1971_v24 = vld [vmem:[%s5612_s6] sm:$0xff] }
 0x13b   : > { %v1048_v40 = vmul.f32 %v1024_v23, %v5732_v27  ;;  %v994_v51 = vmul.f32 %v970_v31, %v3994_v26  ;;  %v995_v28 = vmul.f32 %v971_v32, %v4009_v62  ;;  %v3240_v29 = vcvt.f32.s32 %v5735_v21  ;;  %v1182_v62 = vld [vmem:[%s5610_s4 + $0x10] sm:$0xff] }
 0x13c   : > { %3186 = vmatmul.msk.f32.gmra.mxu1 %vm1204_vm12, %v4154_v33  ;;  %v1049_v3 = vmul.f32 %v1025_v45, %v5733_v59  ;;  %v964_v26 = vadd.f32 -0.16666667, %v940_v35  ;;  %v917_v41 = vadd.f32 0.008333331, %v893_v55  ;;  %1196 = vperm.xlu2 %3428, %v1182_v62   ;;  %vm1114_vm8 = vcmp.eq.s32.totalorder %v1090_v49, 1 }
 0x13d   : > { %v1144_v63 = vsub.f32 0.0, %v1048_v40  ;;  %v1018_v18 = vadd.f32 1.0, %v994_v51  ;;  %v1019_v11 = vadd.f32 1.0, %v995_v28  ;;  %vm1115_vm9 = vcmp.eq.s32.totalorder %v1091_v34, 1 }
 0x13e   : > { %v1145_v6 = vsub.f32 0.0, %v1049_v3  ;;  %v988_v53 = vmul.f32 %v964_v26, %v4198_v17  ;;  %v941_v47 = vmul.f32 %v917_v41, %v4214_v1  ;;  %v1084_v56 = vand.u32 1, %v3240_v29  ;;  %v5737_v17 = vld [vmem:[#allocation23_spill] sm:$0xff] }
 0x13f   : > { %v1168_v42 = vsel %vm1120_vm6, %v1144_v63, %v1048_v40  ;;  %v1042_v0 = vmul.f32 %v1018_v18, %v5734_v7  ;;  %v1043_v57 = vmul.f32 %v1019_v11, %v5736_v46  ;;  %v3242_v25 = vcvt.f32.s32 %v5737_v17 }
 0x140   : > { %3183 = vmatmul.msk.f32.gmra.mxu0 %vm1204_vm12, %v4179_v44  ;;  %1346 = vmatpush.msra.mxu2 %v1168_v42  ;;  %v1169_v19 = vsel %vm1121_vm7, %v1145_v6, %v1049_v3  ;;  %v1012_v20 = vadd.f32 1.0, %v988_v53  ;;  %v965_v13 = vadd.f32 -0.16666667, %v941_v47  ;;  %vm1108_vm10 = vcmp.eq.s32.totalorder %v1084_v56, 1 }
 0x141   : > { %1375 = vmatpush.msra.mxu3 %v1169_v19  ;;  %v1138_v8 = vsub.f32 0.0, %v1042_v0  ;;  %v1139_v2 = vsub.f32 0.0, %v1043_v57  ;;  %v1085_v15 = vand.u32 1, %v3242_v25 }
 0x142   : > { %v1036_v9 = vmul.f32 %v1012_v20, %v3957_v16  ;;  %v989_v22 = vmul.f32 %v965_v13, %v4214_v1 }
 0x143   : > { %v1162_v61 = vsel %vm1114_vm8, %v1138_v8, %v1042_v0  ;;  %v1163_v60 = vsel %vm1115_vm9, %v1139_v2, %v1043_v57  ;;  %vm1109_vm11 = vcmp.eq.s32.totalorder %v1085_v15, 1 }
 0x144   : > { %3187 = vmatmul.msk.f32.gmra.mxu1 %vm1204_vm12, %v4179_v44  ;;  %1347 = vmatpush.msra.mxu2 %v1162_v61  ;;  %v1132_v37 = vsub.f32 0.0, %v1036_v9  ;;  %v1013_v12 = vadd.f32 1.0, %v989_v22 }
 0x145   : > { %1376 = vmatpush.msra.mxu3 %v1163_v60  ;;  %1992 = vperm.xlu2 %3428, %v1974_v5  }
 0x146   : > { %v1156_v48 = vsel %vm1108_vm10, %v1132_v37, %v1036_v9  ;;  %v1037_v16 = vmul.f32 %v1013_v12, %v5727_v4 }
 0x147   : > { %1348 = vmatpush.msra.mxu2 %v1156_v48 }
 0x148   : > { %3184 = vmatmul.msk.f32.gmra.mxu0 %vm1204_vm12, %v4209_v39  ;;  %3189 = vmatmul.msk.f32.vlgmr.msra.gmra.mxu2 %vm1204_vm12, %v4127_v10  ;;  %v1133_v1 = vsub.f32 0.0, %v1037_v16 }
 0x14a   : > { %v1157_v58 = vsel %vm1109_vm11, %v1133_v1, %v1037_v16 }
 0x14b   : > { %1377 = vmatpush.msra.mxu3 %v1157_v58 }
 0x14c   : > { %3188 = vmatmul.msk.f32.gmra.mxu1 %vm1204_vm12, %v4209_v39  ;;  %3193 = vmatmul.msk.f32.vlgmr.msra.gmra.mxu3 %vm1204_vm12, %v4127_v10 }
 0x14d   : > { %1977 = vperm.xlu2 %3428, %v1971_v24  }
 0x150   : > { %3190 = vmatmul.msk.f32.gmra.mxu2 %vm1204_vm12, %v4154_v33 }
 0x154   : > { %3194 = vmatmul.msk.f32.gmra.mxu3 %vm1204_vm12, %v4154_v33  ;;  %v4305_v33 = vpop.permute.xlu0 %1191 }
 0x158   : > { %3191 = vmatmul.msk.f32.gmra.mxu2 %vm1204_vm12, %v4179_v44 }
 0x15c   : > { %3195 = vmatmul.msk.f32.gmra.mxu3 %vm1204_vm12, %v4179_v44 }
 0x160   : > { %3192 = vmatmul.msk.f32.gmra.mxu2 %vm1204_vm12, %v4209_v39 }
 0x164   : > { %3196 = vmatmul.msk.f32.gmra.mxu3 %vm1204_vm12, %v4209_v39 }
 0x184   : > { %v4307_v50 = vpop.permute.xlu2 %1201 }
 0x196   : > { %v4314_v3 = vpop.permute.xlu2 %1196 }
 0x19b   : > { %v1234_v10 = vpop.f32.mrf.mxu2 }
 0x19c   : > { %v1235_v23 = vadd.f32 %v1234_v10, %v4302_v36 }
 0x19e   : > { %v1263_v4 = vpop.f32.mrf.mxu3  ;;  %v1391_v45 = vmul.f32 0.31830987, %v1235_v23 }
 0x19f   : > { %v1264_v52 = vadd.f32 %v1263_v4, %v4302_v36 }
 0x1a0   : > { %v1415_v54 = vadd.f32 0.5, %v1391_v45 }
 0x1a1   : > { %v1392_v39 = vmul.f32 0.31830987, %v1264_v52 }
 0x1a2   : > { %v4312_v59 = vfloor.f32 %v1415_v54 }
 0x1a3   : > { %v1237_v31 = vpop.f32.mrf.mxu2  ;;  %v1416_v51 = vadd.f32 0.5, %v1392_v39 }
 0x1a4   : > { %v1238_v44 = vadd.f32 %v1237_v31, %v4305_v33  ;;  %5738 = vst [vmem:[#allocation19_spill] sm:$0xff] %v4312_v59  ;;  %v1463_v11 = vmul.f32 3.140625, %v4312_v59  ;;  %v1511_v8 = vmul.f32 0.0009676536, %v4312_v59 }
 0x1a5   : > { %v4319_v49 = vfloor.f32 %v1416_v51 }
 0x1a6   : > { %v1266_v30 = vpop.f32.mrf.mxu3  ;;  %v1397_v43 = vmul.f32 0.31830987, %v1238_v44  ;;  %v1487_v19 = vsub.f32 %v1235_v23, %v1463_v11 }
 0x1a7   : > { %v1267_v32 = vadd.f32 %v1266_v30, %v4305_v33  ;;  %5739 = vst [vmem:[#allocation8_spill] sm:$0xff] %v4319_v49  ;;  %v1464_v29 = vmul.f32 3.140625, %v4319_v49  ;;  %v1512_v25 = vmul.f32 0.0009676536, %v4319_v49 }
 0x1a8   : > { %v1421_v38 = vadd.f32 0.5, %v1397_v43  ;;  %v4343_v17 = vsub.f32 %v1487_v19, %v1511_v8 }
 0x1a9   : > { %v1398_v27 = vmul.f32 0.31830987, %v1267_v32  ;;  %v1488_v13 = vsub.f32 %v1264_v52, %v1464_v29 }
 0x1aa   : > { %v4324_v6 = vfloor.f32 %v1421_v38  ;;  %5740 = vst [vmem:[#allocation9_spill] sm:$0xff] %v4343_v17  ;;  %v4367_v45 = vmul.f32 %v4343_v17, %v4343_v17 }
 0x1ab   : > { %v1240_v14 = vpop.f32.mrf.mxu2  ;;  %v1422_v35 = vadd.f32 0.5, %v1398_v27  ;;  %v4354_v24 = vsub.f32 %v1488_v13, %v1512_v25 }
 0x1ac   : > { %v4317_v63 = vadd.f32 %v1240_v14, %v4314_v3  ;;  %v1469_v62 = vmul.f32 3.140625, %v4324_v6  ;;  %v1517_v37 = vmul.f32 0.0009676536, %v4324_v6 }
 0x1ad   : > { %v1292_v40 = vpop.f32.mrf.mxu0  ;;  %v4327_v26 = vfloor.f32 %v1422_v35  ;;  %5741 = vst [vmem:[#allocation18_spill] sm:$0xff] %v4354_v24  ;;  %v4381_v38 = vmul.f32 %v4354_v24, %v4354_v24 }
 0x1ae   : > { %v1269_v28 = vpop.f32.mrf.mxu3  ;;  %v4322_v55 = vadd.f32 %v1292_v40, %v4302_v36  ;;  %v1403_v42 = vmul.f32 0.31830987, %v4317_v63  ;;  %v1493_v9 = vsub.f32 %v1238_v44, %v1469_v62 }
 0x1af   : > { %v4331_v0 = vadd.f32 %v1269_v28, %v4314_v3  ;;  %v1470_v57 = vmul.f32 3.140625, %v4327_v26  ;;  %v1518_v23 = vmul.f32 0.0009676536, %v4327_v26 }
 0x1b0   : > { %v1393_v41 = vmul.f32 0.31830987, %v4322_v55  ;;  %v1427_v53 = vadd.f32 0.5, %v1403_v42  ;;  %v4358_v4 = vsub.f32 %v1493_v9, %v1517_v37 }
 0x1b1   : > { %v1321_v18 = vpop.f32.mrf.mxu1  ;;  %v1404_v20 = vmul.f32 0.31830987, %v4331_v0  ;;  %v1494_v12 = vsub.f32 %v1267_v32, %v1470_v57 }
 0x1b2   : > { %v4340_v47 = vadd.f32 %v1321_v18, %v4302_v36  ;;  %v1417_v60 = vadd.f32 0.5, %v1393_v41  ;;  %v4349_v5 = vfloor.f32 %v1427_v53  ;;  %v4386_v35 = vmul.f32 %v4358_v4, %v4358_v4 }
 0x1b3   : > { %v1243_v34 = vpop.f32.mrf.mxu2  ;;  %v1428_v16 = vadd.f32 0.5, %v1404_v20  ;;  %v4369_v32 = vsub.f32 %v1494_v12, %v1518_v23 }
 0x1b4   : > { %v1244_v21 = vadd.f32 %v1243_v34, %v4307_v50  ;;  %v1394_v15 = vmul.f32 0.31830987, %v4340_v47  ;;  %v4356_v10 = vfloor.f32 %v1417_v60  ;;  %v1475_v43 = vmul.f32 3.140625, %v4349_v5 }
 0x1b5   : > { %v1295_v7 = vpop.f32.mrf.mxu0  ;;  %v4375_v14 = vfloor.f32 %v1428_v16  ;;  %v1523_v34 = vmul.f32 0.0009676536, %v4349_v5  ;;  %v4402_v29 = vmul.f32 %v4369_v32, %v4369_v32 }
 0x1b6   : > { %v1409_v46 = vmul.f32 0.31830987, %v1244_v21  ;;  %v1272_v56 = vpop.f32.mrf.mxu3  ;;  %5742 = vst [vmem:[#allocation14_spill] sm:$0xff] %v4356_v10  ;;  %v4362_v31 = vadd.f32 %v1295_v7, %v4305_v33  ;;  %v1418_v54 = vadd.f32 0.5, %v1394_v15  ;;  %v1465_v28 = vmul.f32 3.140625, %v4356_v10 }
 0x1b7   : > { %v1273_v48 = vadd.f32 %v1272_v56, %v4307_v50  ;;  %v1499_v62 = vsub.f32 %v4317_v63, %v1475_v43  ;;  %v1524_v12 = vmul.f32 0.0009676536, %v4375_v14 }
 0x1b8   : > { %v1433_v61 = vadd.f32 0.5, %v1409_v46  ;;  %v1399_v11 = vmul.f32 0.31830987, %v4362_v31  ;;  %v4406_v19 = vfloor.f32 %v1418_v54  ;;  %v1476_v46 = vmul.f32 3.140625, %v4375_v14 }
 0x1b9   : > { %v1324_v2 = vpop.f32.mrf.mxu1  ;;  %v1410_v30 = vmul.f32 0.31830987, %v1273_v48  ;;  %v4418_v37 = vsub.f32 %v1499_v62, %v1523_v34 }
 0x1ba   : > { %v4346_v22 = vfloor.f32 %v1433_v61  ;;  %v4372_v39 = vadd.f32 %v1324_v2, %v4305_v33  ;;  %5743 = vst [vmem:[#allocation10_spill] sm:$0xff] %v4406_v19  ;;  %v1489_v2 = vsub.f32 %v4322_v55, %v1465_v28  ;;  %v1423_v13 = vadd.f32 0.5, %v1399_v11 }
 0x1bb   : > { %v1434_v51 = vadd.f32 0.5, %v1410_v30  ;;  %v1466_v55 = vmul.f32 3.140625, %v4406_v19  ;;  %v1500_v16 = vsub.f32 %v4331_v0, %v1476_v46  ;;  %v4441_v11 = vmul.f32 %v4418_v37, %v4418_v37 }
 0x1bc   : > { %v1481_v58 = vmul.f32 3.140625, %v4346_v22  ;;  %v1529_v44 = vmul.f32 0.0009676536, %v4346_v22  ;;  %v1400_v41 = vmul.f32 0.31830987, %v4372_v39  ;;  %v4429_v43 = vfloor.f32 %v1423_v13 }
 0x1bd   : > { %v1298_v1 = vpop.f32.mrf.mxu0  ;;  %v4397_v7 = vfloor.f32 %v1434_v51  ;;  %v1514_v51 = vmul.f32 0.0009676536, %v4406_v19 }
 0x1be   : > { %v1505_v52 = vsub.f32 %v1244_v21, %v1481_v58  ;;  %v4389_v18 = vadd.f32 %v1298_v1, %v4314_v3  ;;  %v1513_v21 = vmul.f32 0.0009676536, %v4356_v10  ;;  %v1424_v25 = vadd.f32 0.5, %v1400_v41 }
 0x1bf   : > { %v1482_v53 = vmul.f32 3.140625, %v4397_v7  ;;  %v1530_v9 = vmul.f32 0.0009676536, %v4397_v7  ;;  %v4446_v41 = vsub.f32 %v1500_v16, %v1524_v12  ;;  %v1519_v16 = vmul.f32 0.0009676536, %v4429_v43 }
 0x1c0   : > { %v4377_v40 = vsub.f32 %v1505_v52, %v1529_v44  ;;  %v1405_v20 = vmul.f32 0.31830987, %v4389_v18  ;;  %v4426_v23 = vsub.f32 %v1489_v2, %v1513_v21  ;;  %v4437_v28 = vfloor.f32 %v1424_v25 }
 0x1c1   : > { %v1327_v27 = vpop.f32.mrf.mxu1  ;;  %v1506_v60 = vsub.f32 %v1273_v48, %v1482_v53  ;;  %v1490_v21 = vsub.f32 %v4340_v47, %v1466_v55 }
 0x1c2   : > { %v4395_v42 = vmul.f32 %v4377_v40, %v4377_v40  ;;  %v4414_v61 = vadd.f32 %v1327_v27, %v4314_v3  ;;  %5744 = vst [vmem:[#allocation11_spill] sm:$0xff] %v4426_v23  ;;  %v1429_v52 = vadd.f32 0.5, %v1405_v20  ;;  %v1471_v20 = vmul.f32 3.140625, %v4429_v43 }
 0x1c3   : > { %v4424_v58 = vsub.f32 %v1506_v60, %v1530_v9  ;;  %v1472_v9 = vmul.f32 3.140625, %v4437_v28  ;;  %v4463_v55 = vsub.f32 %v1490_v21, %v1514_v51 }
 0x1c4   : > { %v1601_v57 = vmul.f32 -2.3889859e-08, %v4395_v42  ;;  %v1406_v48 = vmul.f32 0.31830987, %v4414_v61  ;;  %v4453_v53 = vfloor.f32 %v1429_v52 }
 0x1c5   : > { %v1301_v8 = vpop.f32.mrf.mxu0  ;;  %v4433_v27 = vmul.f32 %v4424_v58, %v4424_v58  ;;  %5745 = vst [vmem:[#allocation15_spill] sm:$0xff] %v4463_v55 }
 0x1c6   : > { %v1302_v56 = vadd.f32 %v1301_v8, %v4307_v50  ;;  %v1625_v63 = vadd.f32 2.7525562e-06, %v1601_v57  ;;  %v4451_v57 = vmul.f32 %v4426_v23, %v4426_v23  ;;  %v1430_v8 = vadd.f32 0.5, %v1406_v48 }
 0x1c7   : > { %v1602_v62 = vmul.f32 -2.3889859e-08, %v4433_v27  ;;  %v1477_v48 = vmul.f32 3.140625, %v4453_v53 }
 0x1c8   : > { %v1411_v15 = vmul.f32 0.31830987, %v1302_v56  ;;  %v1649_v1 = vmul.f32 %v1625_v63, %v4395_v42 }
 0x1c9   : > { %v1330_v30 = vpop.f32.mrf.mxu1  ;;  %v1626_v63 = vadd.f32 2.7525562e-06, %v1602_v62 }
 0x1ca   : > { %v1435_v44 = vadd.f32 0.5, %v1411_v15  ;;  %v1673_v54 = vadd.f32 -0.00019840874, %v1649_v1  ;;  %v1331_v0 = vadd.f32 %v1330_v30, %v4307_v50 }
 0x1cb   : > { %v1350_v60 = vpop.f32.mrf.mxu2  ;;  %v1650_v1 = vmul.f32 %v1626_v63, %v4433_v27  ;;  %v1496_v63 = vsub.f32 %v4372_v39, %v1472_v9 }
 0x1cc   : > { %v4443_v34 = vfloor.f32 %v1435_v44  ;;  %v1412_v46 = vmul.f32 0.31830987, %v1331_v0  ;;  %v1697_v13 = vmul.f32 %v1673_v54, %v4395_v42  ;;  %v4461_v15 = vadd.f32 %v1350_v60, %v4302_v36 }
 0x1cd   : > { %v4470_v44 = vfloor.f32 %v1430_v8 }
 0x1ce   : > { %v1483_v2 = vmul.f32 3.140625, %v4443_v34  ;;  %v1436_v47 = vadd.f32 0.5, %v1412_v46  ;;  %v1531_v12 = vmul.f32 0.0009676536, %v4443_v34  ;;  %v1721_v62 = vadd.f32 0.008333331, %v1697_v13 }
 0x1cf   : > { %v1379_v54 = vpop.f32.mrf.mxu3  ;;  %v1674_v46 = vadd.f32 -0.00019840874, %v1650_v1  ;;  %v1501_v1 = vsub.f32 %v4389_v18, %v1477_v48 }
 0x1d0   : > { %v1507_v25 = vsub.f32 %v1302_v56, %v1483_v2  ;;  %v4467_v52 = vfloor.f32 %v1436_v47  ;;  %v1395_v56 = vmul.f32 0.31830987, %v4461_v15  ;;  %v4477_v21 = vadd.f32 %v1379_v54, %v4302_v36 }
 0x1d1   : > { %v1495_v2 = vsub.f32 %v4362_v31, %v1471_v20  ;;  %v1698_v60 = vmul.f32 %v1674_v46, %v4433_v27  ;;  %v1525_v36 = vmul.f32 0.0009676536, %v4453_v53  ;;  %v1478_v31 = vmul.f32 3.140625, %v4470_v44 }
 0x1d2   : > { %v4472_v30 = vsub.f32 %v1507_v25, %v1531_v12  ;;  %v1484_v51 = vmul.f32 3.140625, %v4467_v52  ;;  %v1419_v47 = vadd.f32 0.5, %v1395_v56  ;;  %v1532_v13 = vmul.f32 0.0009676536, %v4467_v52 }
 0x1d3   : > { %v1396_v12 = vmul.f32 0.31830987, %v4477_v21  ;;  %v1745_v20 = vmul.f32 %v1721_v62, %v4395_v42  ;;  %v1722_v9 = vadd.f32 0.008333331, %v1698_v60  ;;  %v1353_v46 = vpop.f32.mrf.mxu2  ;;  %v4501_v48 = vsub.f32 %v1495_v2, %v1519_v16 }
 0x1d4   : > { %v4483_v8 = vmul.f32 %v4472_v30, %v4472_v30  ;;  %v1508_v25 = vsub.f32 %v1331_v0, %v1484_v51  ;;  %v1520_v0 = vmul.f32 0.0009676536, %v4437_v28  ;;  %v4496_v23 = vfloor.f32 %v1419_v47 }
 0x1d5   : > { %v1420_v56 = vadd.f32 0.5, %v1396_v12  ;;  %v4499_v18 = vadd.f32 %v1353_v46, %v4305_v33  ;;  %5747 = vst [vmem:[#allocation21_spill] sm:$0xff] %v4501_v48  ;;  %v1746_v24 = vmul.f32 %v1722_v9, %v4433_v27  ;;  %v1502_v16 = vsub.f32 %v4414_v61, %v1478_v31 }
 0x1d6   : > { %v1603_v39 = vmul.f32 -2.3889859e-08, %v4483_v8  ;;  %v4493_v54 = vsub.f32 %v1508_v25, %v1532_v13  ;;  %5746 = vst [vmem:[#allocation6_spill] sm:$0xff] %v4496_v23  ;;  %v4510_v25 = vsub.f32 %v1496_v63, %v1520_v0  ;;  %v4512_v13 = vsub.f32 %v1501_v1, %v1525_v36 }
 0x1d7   : > { %v4508_v60 = vfloor.f32 %v1420_v56  ;;  %v1401_v12 = vmul.f32 0.31830987, %v4499_v18  ;;  %v1526_v2 = vmul.f32 0.0009676536, %v4470_v44  ;;  %v1769_v9 = vadd.f32 -0.16666667, %v1745_v20 }
 0x1d8   : > { %v1627_v51 = vadd.f32 2.7525562e-06, %v1603_v39  ;;  %v4506_v62 = vmul.f32 %v4493_v54, %v4493_v54  ;;  %5749 = vst [vmem:[#allocation16_spill] sm:$0xff] %v4510_v25  ;;  %v1382_v39 = vpop.f32.mrf.mxu3  ;;  %v4521_v56 = vmul.f32 %v4446_v41, %v4446_v41  ;;  %v1467_v1 = vmul.f32 3.140625, %v4496_v23 }
 0x1d9   : > { %5748 = vst [vmem:[#allocation22_spill] sm:$0xff] %v4508_v60  ;;  %v4525_v36 = vadd.f32 %v1382_v39, %v4305_v33  ;;  %v1770_v0 = vadd.f32 -0.16666667, %v1746_v24  ;;  %v1468_v19 = vmul.f32 3.140625, %v4508_v60  ;;  %v1425_v61 = vadd.f32 0.5, %v1401_v12 }
 0x1da   : > { %v1651_v47 = vmul.f32 %v1627_v51, %v4483_v8  ;;  %v1604_v46 = vmul.f32 -2.3889859e-08, %v4506_v62  ;;  %v4530_v31 = vmul.f32 %v4463_v55, %v4463_v55  ;;  %v4534_v20 = vmul.f32 %v4501_v48, %v4501_v48 }
 0x1db   : > { %v4543_v24 = vmul.f32 %v4512_v13, %v4512_v13  ;;  %v4545_v39 = vsub.f32 %v1502_v16, %v1526_v2  ;;  %v1793_v12 = vmul.f32 %v1769_v9, %v4395_v42  ;;  %v1356_v55 = vpop.f32.mrf.mxu2  ;;  %v1491_v10 = vsub.f32 %v4461_v15, %v1467_v1 }
 0x1dc   : > { %v1675_v63 = vadd.f32 -0.00019840874, %v1651_v47  ;;  %v1628_v51 = vadd.f32 2.7525562e-06, %v1604_v46  ;;  %5750 = vst [vmem:[#allocation7_spill] sm:$0xff] %v4530_v31  ;;  %v4538_v47 = vmul.f32 %v4510_v25, %v4510_v25  ;;  %v3304_v25 = vcvt.f32.s32 %v4349_v5 }
 0x1dd   : > { %v1402_v49 = vmul.f32 0.31830987, %v4525_v36  ;;  %v1492_v31 = vsub.f32 %v4477_v21, %v1468_v19  ;;  %v4554_v48 = vfloor.f32 %v1425_v61  ;;  %v1515_v42 = vmul.f32 0.0009676536, %v4496_v23 }
 0x1de   : > { %v1699_v33 = vmul.f32 %v1675_v63, %v4483_v8  ;;  %v1652_v46 = vmul.f32 %v1628_v51, %v4506_v62  ;;  %v1794_v63 = vmul.f32 %v1770_v0, %v4433_v27  ;;  %v3316_v9 = vcvt.f32.s32 %v4346_v22 }
 0x1df   : > { %5751 = vst [vmem:[#allocation17_spill] sm:$0xff] %v4554_v48  ;;  %v3306_v15 = vcvt.f32.s32 %v4375_v14  ;;  %v4562_v1 = vmul.f32 %v4545_v39, %v4545_v39  ;;  %v1817_v5 = vadd.f32 1.0, %v1793_v12  ;;  %v1516_v19 = vmul.f32 0.0009676536, %v4508_v60 }
 0x1e0   : > { %v1723_v17 = vadd.f32 0.008333331, %v1699_v33  ;;  %v1676_v59 = vadd.f32 -0.00019840874, %v1652_v46  ;;  %v1385_v2 = vpop.f32.mrf.mxu3  ;;  %v4566_v0 = vsub.f32 %v1491_v10, %v1515_v42  ;;  %v4568_v51 = vand.u32 1, %v3304_v25 }
 0x1e1   : > { %v1818_v61 = vadd.f32 1.0, %v1794_v63  ;;  %v4570_v22 = vsub.f32 %v1492_v31, %v1516_v19  ;;  %v4573_v14 = vmul.f32 3.140625, %v4554_v48  ;;  %v4577_v12 = vadd.f32 %v1356_v55, %v4314_v3 }
 0x1e2   : > { %v1747_v16 = vmul.f32 %v1723_v17, %v4483_v8  ;;  %v1700_v27 = vmul.f32 %v1676_v59, %v4506_v62  ;;  %5752 = vst [vmem:[#allocation12_spill] sm:$0xff] %v4566_v0  ;;  %v1426_v17 = vadd.f32 0.5, %v1402_v49  ;;  %v1889_v59 = vand.u32 1, %v3316_v9 }
 0x1e3   : > { %5753 = vst [vmem:[#allocation13_spill] sm:$0xff] %v4570_v22  ;;  %v4579_v60 = vand.u32 1, %v3306_v15  ;;  %v1841_v10 = vmul.f32 %v1817_v5, %v4377_v40  ;;  %v1359_v25 = vpop.f32.mrf.mxu2  ;;  %v3318_v63 = vcvt.f32.s32 %v4397_v7  ;;  %v3320_v31 = vcvt.f32.s32 %v4443_v34 }
 0x1e4   : > { %v1771_v21 = vadd.f32 -0.16666667, %v1747_v16  ;;  %v1724_v33 = vadd.f32 0.008333331, %v1700_v27  ;;  %v4587_v16 = vmul.f32 %v4566_v0, %v4566_v0  ;;  %v4590_v55 = vfloor.f32 %v1426_v17 }
 0x1e5   : > { %v1360_v42 = vadd.f32 %v1359_v25, %v4307_v50  ;;  %v1842_v9 = vmul.f32 %v1818_v61, %v4424_v58  ;;  %v4596_v15 = vmul.f32 %v4570_v22, %v4570_v22  ;;  %v1497_v7 = vsub.f32 %v4499_v18, %v4573_v14 }
 0x1e6   : > { %v1795_v46 = vmul.f32 %v1771_v21, %v4483_v8  ;;  %v1748_v49 = vmul.f32 %v1724_v33, %v4506_v62  ;;  %v1521_v8 = vmul.f32 0.0009676536, %v4554_v48  ;;  %v1407_v5 = vmul.f32 0.31830987, %v4577_v12 }
 0x1e7   : > { %5754 = vst [vmem:[#allocation28_spill] sm:$0xff] %v4596_v15  ;;  %v1413_v27 = vmul.f32 0.31830987, %v1360_v42  ;;  %vm1913_vm13 = vcmp.eq.s32.totalorder %v1889_v59, 1  ;;  %v1890_v21 = vand.u32 1, %v3318_v63  ;;  %v1891_v17 = vand.u32 1, %v3320_v31 }
 0x1e8   : > { %v1772_v40 = vadd.f32 -0.16666667, %v1748_v49  ;;  %v1819_v34 = vadd.f32 1.0, %v1795_v46  ;;  %v3322_v33 = vcvt.f32.s32 %v4467_v52  ;;  %v4604_v58 = vmul.f32 3.140625, %v4590_v55  ;;  %v1388_v49 = vpop.f32.mrf.mxu3 }
 0x1e9   : > { %v1437_v61 = vadd.f32 0.5, %v1413_v27  ;;  %v1595_v25 = vmul.f32 -2.3889859e-08, %v4441_v11  ;;  %v1596_v18 = vmul.f32 -2.3889859e-08, %v4521_v56  ;;  %v4609_v46 = vadd.f32 %v1385_v2, %v4314_v3 }
 0x1ea   : > { %v1796_v19 = vmul.f32 %v1772_v40, %v4506_v62  ;;  %v1389_v22 = vadd.f32 %v1388_v49, %v4307_v50  ;;  %v1892_v62 = vand.u32 1, %v3322_v33  ;;  %v1843_v63 = vmul.f32 %v1819_v34, %v4472_v30 }
 0x1eb   : > { %v4613_v31 = vfloor.f32 %v1437_v61  ;;  %v1619_v52 = vadd.f32 2.7525562e-06, %v1595_v25  ;;  %v1620_v40 = vadd.f32 2.7525562e-06, %v1596_v18  ;;  %vm1914_vm14 = vcmp.eq.s32.totalorder %v1890_v21, 1 }
 0x1ec   : > { %v1820_v14 = vadd.f32 1.0, %v1796_v19  ;;  %v1414_v0 = vmul.f32 0.31830987, %v1389_v22  ;;  %vm1915_vm15 = vcmp.eq.s32.totalorder %v1891_v17, 1  ;;  %vm1916_vm1 = vcmp.eq.s32.totalorder %v1892_v62, 1 }
 0x1ed   : > { %v1485_v48 = vmul.f32 3.140625, %v4613_v31  ;;  %v1643_v3 = vmul.f32 %v1619_v52, %v4441_v11  ;;  %v1644_v2 = vmul.f32 %v1620_v40, %v4521_v56  ;;  %v1533_v50 = vmul.f32 0.0009676536, %v4613_v31 }
 0x1ee   : > { %v1844_v27 = vmul.f32 %v1820_v14, %v4493_v54  ;;  %v1438_v19 = vadd.f32 0.5, %v1414_v0  ;;  %v1937_v30 = vsub.f32 0.0, %v1841_v10  ;;  %v1938_v34 = vsub.f32 0.0, %v1842_v9 }
 0x1ef   : > { %v1509_v33 = vsub.f32 %v1360_v42, %v1485_v48  ;;  %v1939_v61 = vsub.f32 0.0, %v1843_v63  ;;  %v1667_v25 = vadd.f32 -0.00019840874, %v1643_v3  ;;  %v1668_v23 = vadd.f32 -0.00019840874, %v1644_v2 }
 0x1f0   : > { %v1940_v49 = vsub.f32 0.0, %v1844_v27  ;;  %v4620_v54 = vfloor.f32 %v1438_v19  ;;  %v1961_v18 = vsel %vm1913_vm13, %v1937_v30, %v1841_v10  ;;  %v1962_v14 = vsel %vm1914_vm14, %v1938_v34, %v1842_v9 }
 0x1f1   : > { %v1431_v15 = vadd.f32 0.5, %v1407_v5  ;;  %v4624_v52 = vsub.f32 %v1509_v33, %v1533_v50  ;;  %2019 = vmatpush.msrb.mxu0 %v1961_v18  ;;  %2048 = vmatpush.msrb.mxu1 %v1962_v14  ;;  %v1963_v0 = vsel %vm1915_vm15, %v1939_v61, %v1843_v63  ;;  %v4628_v48 = vsub.f32 %v1497_v7, %v1521_v8 }
 0x1f2   : > { %v1964_v40 = vsel %vm1916_vm1, %v1940_v49, %v1844_v27  ;;  %v1486_v42 = vmul.f32 3.140625, %v4620_v54  ;;  %2077 = vmatpush.msrb.mxu2 %v1963_v0  ;;  %v1691_v59 = vmul.f32 %v1667_v25, %v4441_v11  ;;  %v1692_v10 = vmul.f32 %v1668_v23, %v4521_v56 }
 0x1f3   : > { %2106 = vmatpush.msrb.mxu3 %v1964_v40  ;;  %v1408_v9 = vmul.f32 0.31830987, %v4609_v46  ;;  %v4636_v5 = vmul.f32 %v4624_v52, %v4624_v52  ;;  %v1597_v21 = vmul.f32 -2.3889859e-08, %v4543_v24  ;;  %v1598_v17 = vmul.f32 -2.3889859e-08, %v4562_v1 }
 0x1f4   : > { %v1510_v8 = vsub.f32 %v1389_v22, %v1486_v42  ;;  %v1534_v7 = vmul.f32 0.0009676536, %v4620_v54  ;;  %v1715_v62 = vadd.f32 0.008333331, %v1691_v59  ;;  %v1716_v63 = vadd.f32 0.008333331, %v1692_v10 }
 0x1f5   : > { %v1498_v27 = vsub.f32 %v4525_v36, %v4604_v58  ;;  %v4643_v3 = vfloor.f32 %v1431_v15  ;;  %v1605_v23 = vmul.f32 -2.3889859e-08, %v4636_v5  ;;  %v1621_v2 = vadd.f32 2.7525562e-06, %v1597_v21 }
 0x1f6   : > { %v4646_v50 = vsub.f32 %v1510_v8, %v1534_v7  ;;  %v1739_v19 = vmul.f32 %v1715_v62, %v4441_v11  ;;  %v1740_v30 = vmul.f32 %v1716_v63, %v4521_v56  ;;  %v1622_v34 = vadd.f32 2.7525562e-06, %v1598_v17 }
 0x1f7   : > { %v4652_v22 = vmul.f32 %v4628_v48, %v4628_v48  ;;  %v1522_v33 = vmul.f32 0.0009676536, %v4590_v55  ;;  %v1432_v61 = vadd.f32 0.5, %v1408_v9  ;;  %v1645_v36 = vmul.f32 %v1621_v2, %v4543_v24 }
 0x1f8   : > { %v4658_v15 = vmul.f32 %v4646_v50, %v4646_v50  ;;  %v1763_v58 = vadd.f32 -0.16666667, %v1739_v19  ;;  %v1764_v49 = vadd.f32 -0.16666667, %v1740_v30  ;;  %v1646_v25 = vmul.f32 %v1622_v34, %v4562_v1 }
 0x1f9   : > { %v4661_v18 = vsub.f32 %v1498_v27, %v1522_v33  ;;  %v4664_v14 = vmul.f32 3.140625, %v4643_v3  ;;  %vm1907_vm2 = vcmp.eq.s32.totalorder %v4568_v51, 1  ;;  %v1669_v0 = vadd.f32 -0.00019840874, %v1645_v36 }
 0x1fa   : > { %v1589_v40 = vmul.f32 -2.3889859e-08, %v4386_v35  ;;  %v1629_v42 = vadd.f32 2.7525562e-06, %v1605_v23  ;;  %v1787_v59 = vmul.f32 %v1763_v58, %v4441_v11  ;;  %v1788_v10 = vmul.f32 %v1764_v49, %v4521_v56 }
 0x1fb   : > { %v1670_v9 = vadd.f32 -0.00019840874, %v1646_v25  ;;  %v4671_v21 = vmul.f32 0.0009676536, %v4643_v3  ;;  %v4673_v17 = vfloor.f32 %v1432_v61  ;;  %v1693_v8 = vmul.f32 %v1669_v0, %v4543_v24 }
 0x1fc   : > { %v1613_v7 = vadd.f32 2.7525562e-06, %v1589_v40  ;;  %v1606_v62 = vmul.f32 -2.3889859e-08, %v4658_v15  ;;  %v1811_v63 = vadd.f32 1.0, %v1787_v59  ;;  %v1812_v27 = vadd.f32 1.0, %v1788_v10 }
 0x1fd   : > { %v1694_v2 = vmul.f32 %v1670_v9, %v4562_v1  ;;  %v1503_v11 = vsub.f32 %v4577_v12, %v4664_v14  ;;  %vm1908_vm3 = vcmp.eq.s32.totalorder %v4579_v60, 1  ;;  %v1717_v56 = vadd.f32 0.008333331, %v1693_v8 }
 0x1fe   : > { %v1637_v23 = vmul.f32 %v1613_v7, %v4386_v35  ;;  %v1653_v19 = vmul.f32 %v1629_v42, %v4636_v5  ;;  %v1835_v30 = vmul.f32 %v1811_v63, %v4418_v37  ;;  %v1836_v34 = vmul.f32 %v1812_v27, %v4446_v41 }
 0x1ff   : > { %v1718_v33 = vadd.f32 0.008333331, %v1694_v2  ;;  %v1741_v61 = vmul.f32 %v1717_v56, %v4543_v24  ;;  %v3308_v36 = vcvt.f32.s32 %v4453_v53  ;;  %v1590_v49 = vmul.f32 -2.3889859e-08, %v4402_v29 }
 0x200   : > { %v1661_v58 = vadd.f32 -0.00019840874, %v1637_v23  ;;  %v1630_v12 = vadd.f32 2.7525562e-06, %v1606_v62  ;;  %v1931_v25 = vsub.f32 0.0, %v1835_v30  ;;  %v1932_v14 = vsub.f32 0.0, %v1836_v34 }
 0x201   : > { %v1742_v0 = vmul.f32 %v1718_v33, %v4562_v1  ;;  %v1765_v40 = vadd.f32 -0.16666667, %v1741_v61  ;;  %v3310_v42 = vcvt.f32.s32 %v4470_v44  ;;  %v1614_v59 = vadd.f32 2.7525562e-06, %v1590_v49 }
 0x202   : > { %v1685_v37 = vmul.f32 %v1661_v58, %v4386_v35  ;;  %v1677_v41 = vadd.f32 -0.00019840874, %v1653_v19  ;;  %v1955_v10 = vsel %vm1907_vm2, %v1931_v25, %v1835_v30  ;;  %v1956_v53 = vsel %vm1908_vm3, %v1932_v14, %v1836_v34 }
 0x203   : > { %v1766_v9 = vadd.f32 -0.16666667, %v1742_v0  ;;  %v4696_v8 = vmul.f32 3.140625, %v4673_v17  ;;  %2020 = vmatpush.msrb.mxu0 %v1955_v10  ;;  %2049 = vmatpush.msrb.mxu1 %v1956_v53  ;;  %v1789_v7 = vmul.f32 %v1765_v40, %v4543_v24  ;;  %v1638_v44 = vmul.f32 %v1614_v59, %v4402_v29 }
 0x204   : > { %v1709_v62 = vadd.f32 0.008333331, %v1685_v37  ;;  %v1654_v63 = vmul.f32 %v1630_v12, %v4658_v15  ;;  %v1885_v27 = vand.u32 1, %v3308_v36  ;;  %v1591_v2 = vmul.f32 -2.3889859e-08, %v4534_v20 }
 0x205   : > { %v1790_v51 = vmul.f32 %v1766_v9, %v4562_v1  ;;  %v1813_v60 = vadd.f32 1.0, %v1789_v7  ;;  %v1886_v56 = vand.u32 1, %v3310_v42  ;;  %v1662_v19 = vadd.f32 -0.00019840874, %v1638_v44 }
 0x206   : > { %v1733_v23 = vmul.f32 %v1709_v62, %v4386_v35  ;;  %v1701_v30 = vmul.f32 %v1677_v41, %v4636_v5  ;;  %v3292_v24 = vcvt.f32.s32 %v4324_v6  ;;  %v1615_v33 = vadd.f32 2.7525562e-06, %v1591_v2 }
 0x207   : > { %v1814_v34 = vadd.f32 1.0, %v1790_v51  ;;  %v4707_v61 = vmul.f32 0.0009676536, %v4673_v17  ;;  %v1837_v36 = vmul.f32 %v1813_v60, %v4512_v13  ;;  %v1686_v1 = vmul.f32 %v1662_v19, %v4402_v29 }
 0x208   : > { %v1757_v58 = vadd.f32 -0.16666667, %v1733_v23  ;;  %v1678_v49 = vadd.f32 -0.00019840874, %v1654_v63  ;;  %vm1909_vm4 = vcmp.eq.s32.totalorder %v1885_v27, 1  ;;  %v1639_v25 = vmul.f32 %v1615_v33, %v4534_v20 }
 0x209   : > { %v1838_v12 = vmul.f32 %v1814_v34, %v4545_v39  ;;  %v1933_v14 = vsub.f32 0.0, %v1837_v36  ;;  %vm1910_vm5 = vcmp.eq.s32.totalorder %v1886_v56, 1  ;;  %v1710_v6 = vadd.f32 0.008333331, %v1686_v1 }
 0x20a   : > { %v1781_v0 = vmul.f32 %v1757_v58, %v4386_v35  ;;  %v1725_v40 = vadd.f32 0.008333331, %v1701_v30  ;;  %v1877_v37 = vand.u32 1, %v3292_v24  ;;  %v1663_v59 = vadd.f32 -0.00019840874, %v1639_v25 }
 0x20b   : > { %v1934_v42 = vsub.f32 0.0, %v1838_v12  ;;  %v1957_v41 = vsel %vm1909_vm4, %v1933_v14, %v1837_v36  ;;  %v1734_v10 = vmul.f32 %v1710_v6, %v4402_v29  ;;  %v1592_v53 = vmul.f32 -2.3889859e-08, %v4538_v47 }
 0x20c   : > { %v1805_v13 = vadd.f32 1.0, %v1781_v0  ;;  %v4717_v9 = vsub.f32 %v1503_v11, %v4671_v21  ;;  %v1702_v39 = vmul.f32 %v1678_v49, %v4658_v15  ;;  %2078 = vmatpush.msrb.mxu2 %v1957_v41  ;;  %v1687_v35 = vmul.f32 %v1663_v59, %v4534_v20 }
 0x20d   : > { %v1958_v7 = vsel %vm1910_vm5, %v1934_v42, %v1838_v12  ;;  %v1758_v44 = vadd.f32 -0.16666667, %v1734_v10  ;;  %v3294_v63 = vcvt.f32.s32 %v4327_v26  ;;  %v1616_v27 = vadd.f32 2.7525562e-06, %v1592_v53 }
 0x20e   : > { %2107 = vmatpush.msrb.mxu3 %v1958_v7  ;;  %v1829_v62 = vmul.f32 %v1805_v13, %v4358_v4  ;;  %v1504_v51 = vsub.f32 %v4609_v46, %v4696_v8  ;;  %vm1901_vm6 = vcmp.eq.s32.totalorder %v1877_v37, 1  ;;  %v1711_v2 = vadd.f32 0.008333331, %v1687_v35  ;;  %v5755_v35 = vld [vmem:[#allocation21_spill] sm:$0xff] }
 0x20f   : > { %v1583_v21 = vmul.f32 -2.3889859e-08, %v4367_v45  ;;  %v1749_v11 = vmul.f32 %v1725_v40, %v4636_v5  ;;  %v1782_v56 = vmul.f32 %v1758_v44, %v4402_v29  ;;  %v1640_v23 = vmul.f32 %v1616_v27, %v4538_v47 }
 0x210   : > { %v1925_v60 = vsub.f32 0.0, %v1829_v62  ;;  %v1726_v19 = vadd.f32 0.008333331, %v1702_v39  ;;  %v1735_v4 = vmul.f32 %v1711_v2, %v4534_v20  ;;  %v1584_v26 = vmul.f32 -2.3889859e-08, %v4381_v38 }
 0x211   : > { %v1607_v30 = vadd.f32 2.7525562e-06, %v1583_v21  ;;  %v1806_v24 = vadd.f32 1.0, %v1782_v56  ;;  %v1878_v46 = vand.u32 1, %v3294_v63  ;;  %v1664_v8 = vadd.f32 -0.00019840874, %v1640_v23 }
 0x212   : > { %v1949_v34 = vsel %vm1901_vm6, %v1925_v60, %v1829_v62  ;;  %v1759_v33 = vadd.f32 -0.16666667, %v1735_v4  ;;  %v3296_v36 = vcvt.f32.s32 %v4429_v43  ;;  %v1608_v1 = vadd.f32 2.7525562e-06, %v1584_v26 }
 0x213   : > { %2021 = vmatpush.msrb.mxu0 %v1949_v34  ;;  %v1631_v58 = vmul.f32 %v1607_v30, %v4367_v45  ;;  %v1773_v29 = vadd.f32 -0.16666667, %v1749_v11  ;;  %v1830_v49 = vmul.f32 %v1806_v24, %v4369_v32  ;;  %v1688_v12 = vmul.f32 %v1664_v8, %v4538_v47  ;;  %v5756_v11 = vld [vmem:[#allocation7_spill] sm:$0xff] }
 0x214   : > { %v1585_v25 = vmul.f32 -2.3889859e-08, %v4451_v57  ;;  %v1750_v14 = vmul.f32 %v1726_v19, %v4658_v15  ;;  %v1783_v0 = vmul.f32 %v1759_v33, %v4534_v20  ;;  %v1632_v40 = vmul.f32 %v1608_v1, %v4381_v38 }
 0x215   : > { %v1655_v6 = vadd.f32 -0.00019840874, %v1631_v58  ;;  %vm1902_vm7 = vcmp.eq.s32.totalorder %v1878_v46, 1  ;;  %v1926_v42 = vsub.f32 0.0, %v1830_v49  ;;  %v1712_v43 = vadd.f32 0.008333331, %v1688_v12 }
 0x216   : > { %v1609_v37 = vadd.f32 2.7525562e-06, %v1585_v25  ;;  %v1807_v59 = vadd.f32 1.0, %v1783_v0  ;;  %v1879_v41 = vand.u32 1, %v3296_v36  ;;  %v1656_v32 = vadd.f32 -0.00019840874, %v1632_v40 }
 0x217   : > { %v1679_v13 = vmul.f32 %v1655_v6, %v4367_v45  ;;  %v1950_v10 = vsel %vm1902_vm7, %v1926_v42, %v1830_v49  ;;  %v1736_v53 = vmul.f32 %v1712_v43, %v4538_v47  ;;  %v3298_v39 = vcvt.f32.s32 %v4437_v28  ;;  %v5757_v46 = vld [vmem:[#allocation19_spill] sm:$0xff]  ;;  %v5758_v25 = vld [vmem:[#allocation16_spill] sm:$0xff] }
 0x218   : > { %v1633_v7 = vmul.f32 %v1609_v37, %v4451_v57  ;;  %v1774_v20 = vadd.f32 -0.16666667, %v1750_v14  ;;  %2050 = vmatpush.msrb.mxu1 %v1950_v10  ;;  %v1831_v62 = vmul.f32 %v1807_v59, %v5755_v35  ;;  %v1680_v63 = vmul.f32 %v1656_v32, %v4381_v38  ;;  %v5759_v0 = vld [vmem:[#allocation8_spill] sm:$0xff] }
 0x219   : > { %v1703_v44 = vadd.f32 0.008333331, %v1679_v13  ;;  %v1797_v27 = vmul.f32 %v1773_v29, %v4636_v5  ;;  %v1760_v2 = vadd.f32 -0.16666667, %v1736_v53  ;;  %v1586_v60 = vmul.f32 -2.3889859e-08, %v5756_v11 }
 0x21a   : > { %v1657_v21 = vadd.f32 -0.00019840874, %v1633_v7  ;;  %vm1903_vm8 = vcmp.eq.s32.totalorder %v1879_v41, 1  ;;  %v1927_v56 = vsub.f32 0.0, %v1831_v62  ;;  %v1704_v28 = vadd.f32 0.008333331, %v1680_v63 }
 0x21b   : > { %v1727_v23 = vmul.f32 %v1703_v44, %v4367_v45  ;;  %v1784_v19 = vmul.f32 %v1760_v2, %v4538_v47  ;;  %v1880_v4 = vand.u32 1, %v3298_v39  ;;  %v1610_v26 = vadd.f32 2.7525562e-06, %v1586_v60  ;;  %v5760_v41 = vld [vmem:[#allocation14_spill] sm:$0xff] }
 0x21c   : > { %v1681_v30 = vmul.f32 %v1657_v21, %v4451_v57  ;;  %v1951_v34 = vsel %vm1903_vm8, %v1927_v56, %v1831_v62  ;;  %v3280_v8 = vcvt.f32.s32 %v5757_v46  ;;  %v1728_v5 = vmul.f32 %v1704_v28, %v4381_v38  ;;  %v5762_v53 = vld [vmem:[#allocation10_spill] sm:$0xff]  ;;  %v4773_v28 = vld [vmem:[%s5611_s5] sm:$0xff] }
 0x21d   : > { %v1751_v24 = vadd.f32 -0.16666667, %v1727_v23  ;;  %v4753_v33 = vsub.f32 %v1504_v51, %v4707_v61  ;;  %2079 = vmatpush.msrb.mxu2 %v1951_v34  ;;  %v1808_v36 = vadd.f32 1.0, %v1784_v19  ;;  %v1634_v1 = vmul.f32 %v1610_v26, %v5756_v11  ;;  %v5764_v26 = vld [vmem:[#allocation11_spill] sm:$0xff]  ;;  %v5765_v46 = vld [vmem:[#allocation28_spill] sm:$0xff] }
 0x21e   : > { %v1705_v58 = vadd.f32 0.008333331, %v1681_v30  ;;  %v1821_v29 = vadd.f32 1.0, %v1797_v27  ;;  %v1798_v47 = vmul.f32 %v1774_v20, %v4658_v15  ;;  %v1752_v12 = vadd.f32 -0.16666667, %v1728_v5  ;;  %v5763_v27 = vld [vmem:[#allocation18_spill] sm:$0xff] }
 0x21f   : > { %v1775_v49 = vmul.f32 %v1751_v24, %v4367_v45  ;;  %v1832_v14 = vmul.f32 %v1808_v36, %v5758_v25  ;;  %v3282_v6 = vcvt.f32.s32 %v5759_v0  ;;  %v1658_v42 = vadd.f32 -0.00019840874, %v1634_v1  ;;  %v5761_v45 = vld [vmem:[#allocation9_spill] sm:$0xff] }
 0x220   : > { %v1729_v40 = vmul.f32 %v1705_v58, %v4451_v57  ;;  %vm1904_vm9 = vcmp.eq.s32.totalorder %v1880_v4, 1  ;;  %v1871_v51 = vand.u32 1, %v3280_v8  ;;  %v1776_v43 = vmul.f32 %v1752_v12, %v4381_v38 }
 0x221   : > { %v1799_v61 = vadd.f32 1.0, %v1775_v49  ;;  %v1928_v37 = vsub.f32 0.0, %v1832_v14  ;;  %v3284_v13 = vcvt.f32.s32 %v5760_v41  ;;  %v1682_v15 = vmul.f32 %v1658_v42, %v5756_v11 }
 0x222   : > { %v1753_v59 = vadd.f32 -0.16666667, %v1729_v40  ;;  %v1800_v10 = vadd.f32 1.0, %v1776_v43  ;;  %v3286_v39 = vcvt.f32.s32 %v5762_v53  ;;  %v1587_v7 = vmul.f32 -2.3889859e-08, %v4587_v16 }
 0x223   : > { %v1823_v32 = vmul.f32 %v1799_v61, %v5761_v45  ;;  %v1952_v20 = vsel %vm1904_vm9, %v1928_v37, %v1832_v14  ;;  %v1872_v35 = vand.u32 1, %v3282_v6  ;;  %v1706_v44 = vadd.f32 0.008333331, %v1682_v15  ;;  %v4808_v37 = vld [vmem:[%s5611_s5 + $0x8] sm:$0xff] }
 0x224   : > { %v1777_v62 = vmul.f32 %v1753_v59, %v4451_v57  ;;  %v1822_v63 = vadd.f32 1.0, %v1798_v47  ;;  %2108 = vmatpush.msrb.mxu3 %v1952_v20  ;;  %v1824_v2 = vmul.f32 %v1800_v10, %v5763_v27  ;;  %v1611_v21 = vadd.f32 2.7525562e-06, %v1587_v7 }
 0x225   : > { %v1919_v38 = vsub.f32 0.0, %v1823_v32  ;;  %vm1895_vm10 = vcmp.eq.s32.totalorder %v1871_v51, 1  ;;  %v1873_v56 = vand.u32 1, %v3284_v13  ;;  %v1730_v23 = vmul.f32 %v1706_v44, %v5756_v11  ;;  %v5766_v51 = vld [vmem:[#allocation15_spill] sm:$0xff] }
 0x226   : > { %v1801_v60 = vadd.f32 1.0, %v1777_v62  ;;  %v1920_v4 = vsub.f32 0.0, %v1824_v2  ;;  %v1874_v57 = vand.u32 1, %v3286_v39  ;;  %v1635_v30 = vmul.f32 %v1611_v21, %v4587_v16 }
 0x227   : > { %v1943_v19 = vsel %vm1895_vm10, %v1919_v38, %v1823_v32  ;;  %vm1896_vm11 = vcmp.eq.s32.totalorder %v1872_v35, 1  ;;  %v1754_v24 = vadd.f32 -0.16666667, %v1730_v23  ;;  %v1588_v8 = vmul.f32 -2.3889859e-08, %v5765_v46 }
 0x228   : > { %2022 = vmatpush.msrb.mxu0 %v1943_v19  ;;  %v1825_v34 = vmul.f32 %v1801_v60, %v5764_v26  ;;  %v4780_v5 = vmul.f32 %v4661_v18, %v4661_v18  ;;  %v4784_v36 = vmul.f32 %v4717_v9, %v4717_v9  ;;  %v1845_v58 = vmul.f32 %v1821_v29, %v4624_v52 }
 0x229   : > { %v1944_v1 = vsel %vm1896_vm11, %v1920_v4, %v1824_v2  ;;  %3197 = vmatmul.msk.f32.vlgmr.msrb.gmra.mxu0 %vm1204_vm12, %v4773_v28  ;;  %v4791_v47 = vmul.f32 %v4753_v33, %v4753_v33  ;;  %v1846_v49 = vmul.f32 %v1822_v63, %v4646_v50  ;;  %v1778_v25 = vmul.f32 %v1754_v24, %v5756_v11 }
 0x22a   : > { %2051 = vmatpush.msrb.mxu1 %v1944_v1  ;;  %v1921_v12 = vsub.f32 0.0, %v1825_v34  ;;  %vm1897_vm13 = vcmp.eq.s32.totalorder %v1873_v56, 1  ;;  %vm1898_vm14 = vcmp.eq.s32.totalorder %v1874_v57, 1  ;;  %v1593_v52 = vmul.f32 -2.3889859e-08, %v4652_v22  ;;  %v4832_v57 = vld [vmem:[%s5611_s5 + $0x10] sm:$0xff] }
 0x22b   : > { %3201 = vmatmul.msk.f32.vlgmr.msrb.gmra.mxu1 %vm1204_vm12, %v4773_v28  ;;  %v1659_v29 = vadd.f32 -0.00019840874, %v1635_v30  ;;  %v1802_v0 = vadd.f32 1.0, %v1778_v25  ;;  %v3324_v6 = vcvt.f32.s32 %v4613_v31  ;;  %v1612_v40 = vadd.f32 2.7525562e-06, %v1588_v8 }
 0x22c   : > { %v1945_v14 = vsel %vm1897_vm13, %v1921_v12, %v1825_v34  ;;  %v1941_v42 = vsub.f32 0.0, %v1845_v58  ;;  %v3326_v50 = vcvt.f32.s32 %v4620_v54  ;;  %v1599_v61 = vmul.f32 -2.3889859e-08, %v4784_v36 }
 0x22d   : > { %2080 = vmatpush.msrb.mxu2 %v1945_v14  ;;  %v1594_v11 = vmul.f32 -2.3889859e-08, %v4780_v5  ;;  %v1826_v43 = vmul.f32 %v1802_v0, %v5766_v51  ;;  %v1893_v31 = vand.u32 1, %v3324_v6  ;;  %v1942_v59 = vsub.f32 0.0, %v1846_v49 }
 0x22e   : > { %3205 = vmatmul.msk.f32.vlgmr.msrb.gmra.mxu2 %vm1204_vm12, %v4773_v28  ;;  %v1600_v41 = vmul.f32 -2.3889859e-08, %v4791_v47  ;;  %v1894_v13 = vand.u32 1, %v3326_v50  ;;  %v1623_v54 = vadd.f32 2.7525562e-06, %v1599_v61  ;;  %v1683_v45 = vmul.f32 %v1659_v29, %v4587_v16  ;;  %v5767_v50 = vld [vmem:[#allocation6_spill] sm:$0xff] }
 0x22f   : > { %v1617_v15 = vadd.f32 2.7525562e-06, %v1593_v52  ;;  %v1922_v32 = vsub.f32 0.0, %v1826_v43  ;;  %vm1917_vm15 = vcmp.eq.s32.totalorder %v1893_v31, 1  ;;  %v1636_v53 = vmul.f32 %v1612_v40, %v5765_v46 }
 0x230   : > { %v1624_v10 = vadd.f32 2.7525562e-06, %v1600_v41  ;;  %v1965_v39 = vsel %vm1917_vm15, %v1941_v42, %v1845_v58  ;;  %vm1918_vm1 = vcmp.eq.s32.totalorder %v1894_v13, 1  ;;  %v1647_v7 = vmul.f32 %v1623_v54, %v4784_v36  ;;  %v1970_v54 = vld [vmem:[%s5611_s5 + $0x18] sm:$0xff] }
 0x231   : > { %3198 = vmatmul.msk.f32.gmra.mxu0 %vm1204_vm12, %v4808_v37  ;;  %v1641_v20 = vmul.f32 %v1617_v15, %v4652_v22  ;;  %v1946_v35 = vsel %vm1898_vm14, %v1922_v32, %v1826_v43  ;;  %v1966_v62 = vsel %vm1918_vm1, %v1942_v59, %v1846_v49  ;;  %v1618_v63 = vadd.f32 2.7525562e-06, %v1594_v11  ;;  %v5768_v15 = vld [vmem:[#allocation17_spill] sm:$0xff] }
 0x232   : > { %2135 = vmatpush.msra.mxu0 %v1965_v39  ;;  %v1648_v44 = vmul.f32 %v1624_v10, %v4791_v47  ;;  %2109 = vmatpush.msrb.mxu3 %v1946_v35  ;;  %v1671_v38 = vadd.f32 -0.00019840874, %v1647_v7  ;;  %v1707_v2 = vadd.f32 0.008333331, %v1683_v45  ;;  %v1660_v56 = vadd.f32 -0.00019840874, %v1636_v53 }
 0x233   : > { %3202 = vmatmul.msk.f32.gmra.mxu1 %vm1204_vm12, %v4808_v37  ;;  %v1665_v27 = vadd.f32 -0.00019840874, %v1641_v20  ;;  %3209 = vmatmul.msk.f32.vlgmr.msrb.gmra.mxu3 %vm1204_vm12, %v4773_v28  ;;  %v1642_v60 = vmul.f32 %v1618_v63, %v4780_v5  ;;  %v3288_v61 = vcvt.f32.s32 %v5767_v50  ;;  %v3312_v11 = vcvt.f32.s32 %v4643_v3 }
 0x234   : > { %2164 = vmatpush.msra.mxu1 %v1966_v62  ;;  %v1672_v21 = vadd.f32 -0.00019840874, %v1648_v44  ;;  %v1695_v23 = vmul.f32 %v1671_v38, %v4784_v36  ;;  %v1731_v4 = vmul.f32 %v1707_v2, %v4587_v16  ;;  %v1684_v34 = vmul.f32 %v1660_v56, %v5765_v46  ;;  %v5770_v38 = vld [vmem:[#allocation12_spill] sm:$0xff] }
 0x235   : > { %v1689_v19 = vmul.f32 %v1665_v27, %v4652_v22  ;;  %v1666_v26 = vadd.f32 -0.00019840874, %v1642_v60  ;;  %v3314_v59 = vcvt.f32.s32 %v4673_v17  ;;  %v3300_v45 = vcvt.f32.s32 %v5768_v15 }
 0x236   : > { %3206 = vmatmul.msk.f32.gmra.mxu2 %vm1204_vm12, %v4808_v37  ;;  %v1696_v30 = vmul.f32 %v1672_v21, %v4791_v47  ;;  %v1719_v24 = vadd.f32 0.008333331, %v1695_v23  ;;  %v1755_v58 = vadd.f32 -0.16666667, %v1731_v4  ;;  %v1708_v12 = vadd.f32 0.008333331, %v1684_v34 }
 0x237   : > { %v1713_v8 = vadd.f32 0.008333331, %v1689_v19  ;;  %v1690_v49 = vmul.f32 %v1666_v26, %v4780_v5  ;;  %v3302_v17 = vcvt.f32.s32 %v4590_v55  ;;  %v1887_v7 = vand.u32 1, %v3312_v11  ;;  %v5771_v21 = vld [vmem:[#allocation13_spill] sm:$0xff] }
 0x238   : > { %v1720_v1 = vadd.f32 0.008333331, %v1696_v30  ;;  %v1743_v25 = vmul.f32 %v1719_v24, %v4784_v36  ;;  %v1779_v29 = vmul.f32 %v1755_v58, %v4587_v16  ;;  %v1732_v6 = vmul.f32 %v1708_v12, %v5765_v46 }
 0x239   : > { %3199 = vmatmul.msk.f32.gmra.mxu0 %vm1204_vm12, %v4832_v57  ;;  %v1737_v52 = vmul.f32 %v1713_v8, %v4652_v22  ;;  %v1714_v0 = vadd.f32 0.008333331, %v1690_v49  ;;  %v1888_v44 = vand.u32 1, %v3314_v59  ;;  %v1881_v2 = vand.u32 1, %v3300_v45  ;;  %v4891_v49 = vpop.permute.xlu2 %1992 }
 0x23a   : > { %v1744_v14 = vmul.f32 %v1720_v1, %v4791_v47  ;;  %v1767_v40 = vadd.f32 -0.16666667, %v1743_v25  ;;  %v1756_v43 = vadd.f32 -0.16666667, %v1732_v6  ;;  %v1803_v13 = vadd.f32 1.0, %v1779_v29 }
 0x23b   : > { %3203 = vmatmul.msk.f32.gmra.mxu1 %vm1204_vm12, %v4832_v57  ;;  %v1761_v42 = vadd.f32 -0.16666667, %v1737_v52  ;;  %3210 = vmatmul.msk.f32.gmra.mxu3 %vm1204_vm12, %v4808_v37  ;;  %v1738_v16 = vmul.f32 %v1714_v0, %v4780_v5  ;;  %v1882_v23 = vand.u32 1, %v3302_v17  ;;  %vm1911_vm2 = vcmp.eq.s32.totalorder %v1887_v7, 1  ;;  %v4897_v0 = vpop.permute.xlu1 %1982 }
 0x23c   : > { %v1768_v51 = vadd.f32 -0.16666667, %v1744_v14  ;;  %v1791_v31 = vmul.f32 %v1767_v40, %v4784_v36  ;;  %v1780_v10 = vmul.f32 %v1756_v43, %v5765_v46  ;;  %v1827_v46 = vmul.f32 %v1803_v13, %v5770_v38 }
 0x23d   : > { %v1785_v41 = vmul.f32 %v1761_v42, %v4652_v22  ;;  %v1762_v32 = vadd.f32 -0.16666667, %v1738_v16  ;;  %v5769_v22 = vld [vmem:[#allocation22_spill] sm:$0xff]  ;;  %v1875_v19 = vand.u32 1, %v3288_v61  ;;  %vm1912_vm3 = vcmp.eq.s32.totalorder %v1888_v44, 1 }
 0x23e   : > { %3207 = vmatmul.msk.f32.gmra.mxu2 %vm1204_vm12, %v4832_v57  ;;  %v1792_v3 = vmul.f32 %v1768_v51, %v4791_v47  ;;  %v1815_v36 = vadd.f32 1.0, %v1791_v31  ;;  %v3290_v39 = vcvt.f32.s32 %v5769_v22  ;;  %v1804_v62 = vadd.f32 1.0, %v1780_v10 }
 0x23f   : > { %v1809_v53 = vadd.f32 1.0, %v1785_v41  ;;  %v1786_v35 = vmul.f32 %v1762_v32, %v4780_v5  ;;  %vm1905_vm4 = vcmp.eq.s32.totalorder %v1881_v2, 1  ;;  %vm1906_vm5 = vcmp.eq.s32.totalorder %v1882_v23, 1 }
 0x240   : > { %v1816_v20 = vadd.f32 1.0, %v1792_v3  ;;  %v1839_v47 = vmul.f32 %v1815_v36, %v4717_v9  ;;  %v1828_v60 = vmul.f32 %v1804_v62, %v5771_v21  ;;  %v1876_v30 = vand.u32 1, %v3290_v39 }
 0x241   : > { %3200 = vmatmul.msk.f32.gmra.mxu0 %vm1204_vm12, %v1970_v54  ;;  %v1833_v63 = vmul.f32 %v1809_v53, %v4628_v48  ;;  %v1810_v55 = vadd.f32 1.0, %v1786_v35  ;;  %vm1899_vm6 = vcmp.eq.s32.totalorder %v1875_v19, 1  ;;  %v4893_v12 = vpop.permute.xlu2 %1977 }
 0x242   : > { %v1840_v27 = vmul.f32 %v1816_v20, %v4753_v33  ;;  %v1935_v56 = vsub.f32 0.0, %v1839_v47  ;;  %v1923_v33 = vsub.f32 0.0, %v1827_v46  ;;  %v1924_v24 = vsub.f32 0.0, %v1828_v60 }
 0x243   : > { %3204 = vmatmul.msk.f32.gmra.mxu1 %vm1204_vm12, %v1970_v54  ;;  %v1929_v5 = vsub.f32 0.0, %v1833_v63  ;;  %3211 = vmatmul.msk.f32.gmra.mxu3 %vm1204_vm12, %v4832_v57  ;;  %v1834_v48 = vmul.f32 %v1810_v55, %v4661_v18  ;;  %vm1900_vm7 = vcmp.eq.s32.totalorder %v1876_v30, 1 }
 0x244   : > { %v1936_v9 = vsub.f32 0.0, %v1840_v27  ;;  %v1959_v4 = vsel %vm1911_vm2, %v1935_v56, %v1839_v47  ;;  %v1947_v18 = vsel %vm1899_vm6, %v1923_v33, %v1827_v46  ;;  %v1948_v1 = vsel %vm1900_vm7, %v1924_v24, %v1828_v60 }
 0x245   : > { %2136 = vmatpush.msra.mxu0 %v1959_v4  ;;  %v1930_v34 = vsub.f32 0.0, %v1834_v48  ;;  %v1953_v8 = vsel %vm1905_vm4, %v1929_v5, %v1833_v63 }
 0x246   : > { %3208 = vmatmul.msk.f32.gmra.mxu2 %vm1204_vm12, %v1970_v54  ;;  %v1960_v26 = vsel %vm1912_vm3, %v1936_v9, %v1840_v27 }
 0x247   : > { %2165 = vmatpush.msra.mxu1 %v1960_v26  ;;  %2137 = vmatpush.msra.mxu0 %v1953_v8  ;;  %v1954_v58 = vsel %vm1906_vm5, %v1930_v34, %v1834_v48 }
 0x249   : > { %2166 = vmatpush.msra.mxu1 %v1954_v58  ;;  %2138 = vmatpush.msra.mxu0 %v1947_v18 }
 0x24a   : > { %3213 = vmatmul.msk.f32.vlgmr.msra.gmra.mxu0 %vm1204_vm12, %v4773_v28 }
 0x24b   : > { %2167 = vmatpush.msra.mxu1 %v1948_v1  ;;  %3212 = vmatmul.msk.f32.gmra.mxu3 %vm1204_vm12, %v1970_v54 }
 0x24c   : > { %3217 = vmatmul.msk.f32.vlgmr.msra.gmra.mxu1 %vm1204_vm12, %v4773_v28 }
 0x252   : > { %3214 = vmatmul.msk.f32.gmra.mxu0 %vm1204_vm12, %v4808_v37 }
 0x254   : > { %3218 = vmatmul.msk.f32.gmra.mxu1 %vm1204_vm12, %v4808_v37 }
 0x25a   : > { %3215 = vmatmul.msk.f32.gmra.mxu0 %vm1204_vm12, %v4832_v57 }
 0x25c   : > { %3219 = vmatmul.msk.f32.gmra.mxu1 %vm1204_vm12, %v4832_v57 }
 0x262   : > { %3216 = vmatmul.msk.f32.gmra.mxu0 %vm1204_vm12, %v1970_v54 }
 0x264   : > { %3220 = vmatmul.msk.f32.gmra.mxu1 %vm1204_vm12, %v1970_v54  ;;  %v4915_v54 = vpop.permute.xlu0 %1987 }
 0x2a6   : > { %v2024_v28 = vpop.f32.mrf.mxu0 }
 0x2a7   : > { %v2025_v25 = vadd.f32 %v2024_v28, %v4893_v12 }
 0x2a8   : > { %v2053_v52 = vpop.f32.mrf.mxu1 }
 0x2a9   : > { %v2054_v37 = vadd.f32 %v2053_v52, %v4893_v12  ;;  %v2181_v29 = vmul.f32 0.31830987, %v2025_v25 }
 0x2ab   : > { %v2182_v14 = vmul.f32 0.31830987, %v2054_v37  ;;  %v2205_v57 = vadd.f32 0.5, %v2181_v29 }
 0x2ad   : > { %v2206_v40 = vadd.f32 0.5, %v2182_v14  ;;  %v4909_v43 = vfloor.f32 %v2205_v57 }
 0x2ae   : > { %v2027_v6 = vpop.f32.mrf.mxu0 }
 0x2af   : > { %v4900_v42 = vadd.f32 %v2027_v6, %v4897_v0  ;;  %v4911_v31 = vfloor.f32 %v2206_v40  ;;  %v2253_v15 = vmul.f32 3.140625, %v4909_v43  ;;  %v2301_v62 = vmul.f32 0.0009676536, %v4909_v43 }
 0x2b0   : > { %v2056_v50 = vpop.f32.mrf.mxu1 }
 0x2b1   : > { %v2082_v61 = vpop.f32.mrf.mxu2  ;;  %v2187_v11 = vmul.f32 0.31830987, %v4900_v42  ;;  %v4907_v16 = vadd.f32 %v2056_v50, %v4897_v0  ;;  %v2254_v45 = vmul.f32 3.140625, %v4911_v31  ;;  %v2277_v44 = vsub.f32 %v2025_v25, %v2253_v15 }
 0x2b2   : > { %v4904_v51 = vadd.f32 %v2082_v61, %v4893_v12  ;;  %v2302_v60 = vmul.f32 0.0009676536, %v4911_v31 }
 0x2b3   : > { %v2211_v41 = vadd.f32 0.5, %v2187_v11  ;;  %v2188_v13 = vmul.f32 0.31830987, %v4907_v16  ;;  %v2278_v63 = vsub.f32 %v2054_v37, %v2254_v45  ;;  %v4948_v4 = vsub.f32 %v2277_v44, %v2301_v62 }
 0x2b4   : > { %v2183_v59 = vmul.f32 0.31830987, %v4904_v51 }
 0x2b5   : > { %v4925_v17 = vfloor.f32 %v2211_v41  ;;  %v2212_v39 = vadd.f32 0.5, %v2188_v13  ;;  %v4950_v33 = vsub.f32 %v2278_v63, %v2302_v60  ;;  %v4971_v57 = vmul.f32 %v4948_v4, %v4948_v4 }
 0x2b6   : > { %v2030_v3 = vpop.f32.mrf.mxu0  ;;  %v2111_v32 = vpop.f32.mrf.mxu3  ;;  %v2207_v36 = vadd.f32 0.5, %v2183_v59 }
 0x2b7   : > { %v4920_v10 = vadd.f32 %v2030_v3, %v4915_v54  ;;  %v4923_v53 = vadd.f32 %v2111_v32, %v4893_v12  ;;  %v2259_v55 = vmul.f32 3.140625, %v4925_v17  ;;  %v4941_v56 = vfloor.f32 %v2212_v39  ;;  %5774 = vst [vmem:[#allocation24_spill] sm:$0xff] %v4950_v33 }
 0x2b8   : > { %v2059_v22 = vpop.f32.mrf.mxu1  ;;  %v4936_v27 = vfloor.f32 %v2207_v36  ;;  %v2307_v58 = vmul.f32 0.0009676536, %v4925_v17  ;;  %v4975_v40 = vmul.f32 %v4950_v33, %v4950_v33 }
 0x2b9   : > { %v2085_v7 = vpop.f32.mrf.mxu2  ;;  %v2193_v20 = vmul.f32 0.31830987, %v4920_v10  ;;  %v4929_v35 = vadd.f32 %v2059_v22, %v4915_v54  ;;  %v2184_v47 = vmul.f32 0.31830987, %v4923_v53  ;;  %v2283_v8 = vsub.f32 %v4900_v42, %v2259_v55 }
 0x2ba   : > { %v4934_v38 = vadd.f32 %v2085_v7, %v4897_v0  ;;  %5772 = vst [vmem:[#allocation26_spill] sm:$0xff] %v4936_v27  ;;  %v2255_v24 = vmul.f32 3.140625, %v4936_v27  ;;  %v2260_v1 = vmul.f32 3.140625, %v4941_v56  ;;  %v2303_v61 = vmul.f32 0.0009676536, %v4936_v27 }
 0x2bb   : > { %v2217_v46 = vadd.f32 0.5, %v2193_v20  ;;  %v2208_v2 = vadd.f32 0.5, %v2184_v47  ;;  %v2194_v21 = vmul.f32 0.31830987, %v4929_v35  ;;  %v4980_v11 = vsub.f32 %v2283_v8, %v2307_v58 }
 0x2bc   : > { %v2189_v5 = vmul.f32 0.31830987, %v4934_v38  ;;  %v2279_v50 = vsub.f32 %v4904_v51, %v2255_v24  ;;  %v2284_v41 = vsub.f32 %v4907_v16, %v2260_v1  ;;  %v2308_v39 = vmul.f32 0.0009676536, %v4941_v56 }
 0x2bd   : > { %v4944_v23 = vfloor.f32 %v2217_v46  ;;  %v4946_v9 = vfloor.f32 %v2208_v2  ;;  %v2218_v48 = vadd.f32 0.5, %v2194_v21 }
 0x2be   : > { %v2033_v19 = vpop.f32.mrf.mxu0  ;;  %v2213_v30 = vadd.f32 0.5, %v2189_v5  ;;  %v2114_v26 = vpop.f32.mrf.mxu3  ;;  %v4999_v63 = vsub.f32 %v2279_v50, %v2303_v61  ;;  %v5001_v46 = vsub.f32 %v2284_v41, %v2308_v39 }
 0x2bf   : > { %5773 = vst [vmem:[#allocation27_spill] sm:$0xff] %v4946_v9  ;;  %v2034_v34 = vadd.f32 %v2033_v19, %v4891_v49  ;;  %v2256_v18 = vmul.f32 3.140625, %v4946_v9  ;;  %v4959_v28 = vadd.f32 %v2114_v26, %v4897_v0  ;;  %v2265_v25 = vmul.f32 3.140625, %v4944_v23 }
 0x2c0   : > { %v4962_v37 = vfloor.f32 %v2213_v30  ;;  %v4964_v29 = vfloor.f32 %v2218_v48  ;;  %v2062_v45 = vpop.f32.mrf.mxu1  ;;  %v2313_v7 = vmul.f32 0.0009676536, %v4944_v23  ;;  %5777 = vst [vmem:[#allocation32_spill] sm:$0xff] %v4999_v63 }
 0x2c1   : > { %v2088_v52 = vpop.f32.mrf.mxu2  ;;  %v2199_v6 = vmul.f32 0.31830987, %v2034_v34  ;;  %v2190_v42 = vmul.f32 0.31830987, %v4959_v28  ;;  %v2289_v3 = vsub.f32 %v4920_v10, %v2265_v25  ;;  %v2280_v32 = vsub.f32 %v4923_v53, %v2256_v18 }
 0x2c2   : > { %5775 = vst [vmem:[#allocation25_spill] sm:$0xff] %v4962_v37  ;;  %v4967_v14 = vadd.f32 %v2088_v52, %v4915_v54  ;;  %v2261_v36 = vmul.f32 3.140625, %v4962_v37  ;;  %v2266_v22 = vmul.f32 3.140625, %v4964_v29  ;;  %v2063_v51 = vadd.f32 %v2062_v45, %v4891_v49 }
 0x2c3   : > { %v2214_v13 = vadd.f32 0.5, %v2190_v42  ;;  %v2223_v15 = vadd.f32 0.5, %v2199_v6  ;;  %v2304_v10 = vmul.f32 0.0009676536, %v4946_v9  ;;  %v2309_v2 = vmul.f32 0.0009676536, %v4962_v37 }
 0x2c4   : > { %v2195_v59 = vmul.f32 0.31830987, %v4967_v14  ;;  %v2200_v44 = vmul.f32 0.31830987, %v2063_v51  ;;  %v2285_v60 = vsub.f32 %v4934_v38, %v2261_v36  ;;  %v5008_v5 = vsub.f32 %v2289_v3, %v2313_v7 }
 0x2c5   : > { %v4991_v16 = vfloor.f32 %v2223_v15  ;;  %v4994_v47 = vfloor.f32 %v2214_v13  ;;  %v5005_v21 = vsub.f32 %v2280_v32, %v2304_v10  ;;  %v2290_v48 = vsub.f32 %v4929_v35, %v2266_v22 }
 0x2c6   : > { %v2219_v20 = vadd.f32 0.5, %v2195_v59  ;;  %v2117_v62 = vpop.f32.mrf.mxu3  ;;  %v2224_v24 = vadd.f32 0.5, %v2200_v44  ;;  %v2314_v18 = vmul.f32 0.0009676536, %v4964_v29  ;;  %v5020_v38 = vmul.f32 %v4999_v63, %v4999_v63 }
 0x2c7   : > { %5776 = vst [vmem:[#allocation31_spill] sm:$0xff] %v4994_v47  ;;  %v4997_v53 = vadd.f32 %v2117_v62, %v4915_v54  ;;  %v2271_v55 = vmul.f32 3.140625, %v4991_v16  ;;  %v2319_v26 = vmul.f32 0.0009676536, %v4991_v16  ;;  %v2262_v58 = vmul.f32 3.140625, %v4994_v47 }
 0x2c8   : > { %5778 = vst [vmem:[#allocation29_spill] sm:$0xff] %v5005_v21  ;;  %v5011_v19 = vfloor.f32 %v2219_v20  ;;  %v5024_v35 = vmul.f32 %v4980_v11, %v4980_v11  ;;  %v5028_v52 = vfloor.f32 %v2224_v24  ;;  %v5032_v6 = vmul.f32 %v5001_v46, %v5001_v46 }
 0x2c9   : > { %v2295_v30 = vsub.f32 %v2034_v34, %v2271_v55  ;;  %v2091_v8 = vpop.f32.mrf.mxu2  ;;  %v2196_v1 = vmul.f32 0.31830987, %v4997_v53  ;;  %5779 = vst [vmem:[#allocation20_spill] sm:$0xff] %v5020_v38  ;;  %v5034_v42 = vsub.f32 %v2285_v60, %v2309_v2  ;;  %v5036_v50 = vsub.f32 %v2290_v48, %v2314_v18 }
 0x2ca   : > { %v2092_v25 = vadd.f32 %v2091_v8, %v4891_v49  ;;  %v5040_v59 = vmul.f32 %v5008_v5, %v5008_v5  ;;  %v2267_v41 = vmul.f32 3.140625, %v5011_v19  ;;  %v2272_v3 = vmul.f32 3.140625, %v5028_v52 }
 0x2cb   : > { %v5026_v34 = vsub.f32 %v2295_v30, %v2319_v26  ;;  %5780 = vst [vmem:[#allocation30_spill] sm:$0xff] %v5034_v42  ;;  %v5050_v15 = vmul.f32 %v5005_v21, %v5005_v21  ;;  %v2286_v45 = vsub.f32 %v4959_v28, %v2262_v58  ;;  %v2220_v32 = vadd.f32 0.5, %v2196_v1 }
 0x2cc   : > { %v2201_v61 = vmul.f32 0.31830987, %v2092_v25  ;;  %v2296_v7 = vsub.f32 %v2063_v51, %v2272_v3  ;;  %v2320_v20 = vmul.f32 0.0009676536, %v5028_v52  ;;  %v5058_v10 = vmul.f32 %v5034_v42, %v5034_v42 }
 0x2cd   : > { %v5045_v13 = vmul.f32 %v5026_v34, %v5026_v34  ;;  %5781 = vst [vmem:[#allocation23_spill] sm:$0xff] %v5050_v15  ;;  %v2310_v44 = vmul.f32 0.0009676536, %v4994_v47  ;;  %v5063_v2 = vmul.f32 %v5036_v50, %v5036_v50  ;;  %v2291_v55 = vsub.f32 %v4967_v14, %v2267_v41  ;;  %v2169_v41 = vpop.f32.mrf.mxu1 }
 0x2ce   : > { %v2225_v36 = vadd.f32 0.5, %v2201_v61  ;;  %v2120_v22 = vpop.f32.mrf.mxu3  ;;  %v5068_v51 = vsub.f32 %v2296_v7, %v2320_v20  ;;  %v2315_v26 = vmul.f32 0.0009676536, %v5011_v19  ;;  %v3340_v8 = vcvt.f32.s32 %v4925_v17  ;;  %v2140_v61 = vpop.f32.mrf.mxu0 }
 0x2cf   : > { %v2391_v39 = vmul.f32 -2.3889859e-08, %v5045_v13  ;;  %v2121_v62 = vadd.f32 %v2120_v22, %v4891_v49  ;;  %v5070_v30 = vsub.f32 %v2286_v45, %v2310_v44  ;;  %v5075_v58 = vfloor.f32 %v2220_v32 }
 0x2d0   : > { %v5065_v28 = vfloor.f32 %v2225_v36  ;;  %v5080_v1 = vmul.f32 %v5068_v51, %v5068_v51  ;;  %v5084_v36 = vadd.f32 %v2140_v61, %v4893_v12  ;;  %v5087_v22 = vadd.f32 %v2169_v41, %v4893_v12 }
 0x2d1   : > { %v2415_v60 = vadd.f32 2.7525562e-06, %v2391_v39  ;;  %v2202_v48 = vmul.f32 0.31830987, %v2121_v62  ;;  %5782 = vst [vmem:[#allocation21_spill] sm:$0xff] %v5070_v30  ;;  %v5089_v17 = vsub.f32 %v2291_v55, %v2315_v26  ;;  %v3352_v61 = vcvt.f32.s32 %v4944_v23 }
 0x2d2   : > { %v2273_v24 = vmul.f32 3.140625, %v5065_v28  ;;  %5783 = vst [vmem:[#allocation7_spill] sm:$0xff] %v5075_v58  ;;  %v2321_v45 = vmul.f32 0.0009676536, %v5065_v28  ;;  %v2392_v39 = vmul.f32 -2.3889859e-08, %v5080_v1  ;;  %v3354_v63 = vcvt.f32.s32 %v4964_v29 }
 0x2d3   : > { %v2439_v18 = vmul.f32 %v2415_v60, %v5045_v13  ;;  %v2226_v14 = vadd.f32 0.5, %v2202_v48  ;;  %5784 = vst [vmem:[#allocation19_spill] sm:$0xff] %v5089_v17  ;;  %v2185_v44 = vmul.f32 0.31830987, %v5084_v36  ;;  %v5098_v60 = vand.u32 1, %v3340_v8 }
 0x2d4   : > { %v2297_v3 = vsub.f32 %v2092_v25, %v2273_v24  ;;  %v2186_v25 = vmul.f32 0.31830987, %v5087_v22  ;;  %v2268_v48 = vmul.f32 3.140625, %v5075_v58  ;;  %v2416_v24 = vadd.f32 2.7525562e-06, %v2392_v39 }
 0x2d5   : > { %v2463_v32 = vadd.f32 -0.00019840874, %v2439_v18  ;;  %v5092_v7 = vfloor.f32 %v2226_v14  ;;  %v2209_v14 = vadd.f32 0.5, %v2185_v44  ;;  %v5116_v39 = vmul.f32 %v5089_v17, %v5089_v17 }
 0x2d6   : > { %v5094_v20 = vsub.f32 %v2297_v3, %v2321_v45  ;;  %v2440_v8 = vmul.f32 %v2416_v24, %v5080_v1  ;;  %v2210_v45 = vadd.f32 0.5, %v2186_v25  ;;  %v2316_v44 = vmul.f32 0.0009676536, %v5075_v58  ;;  %v2172_v25 = vpop.f32.mrf.mxu1 }
 0x2d7   : > { %v2487_v12 = vmul.f32 %v2463_v32, %v5045_v13  ;;  %v2274_v55 = vmul.f32 3.140625, %v5092_v7  ;;  %v2322_v18 = vmul.f32 0.0009676536, %v5092_v7  ;;  %v5112_v32 = vmul.f32 %v5070_v30, %v5070_v30 }
 0x2d8   : > { %v5105_v26 = vmul.f32 %v5094_v20, %v5094_v20  ;;  %v2464_v23 = vadd.f32 -0.00019840874, %v2440_v8  ;;  %v5123_v24 = vfloor.f32 %v2209_v14  ;;  %v5128_v42 = vmul.f32 -2.3889859e-08, %v5024_v35 }
 0x2d9   : > { %v2511_v41 = vadd.f32 0.008333331, %v2487_v12  ;;  %v2298_v3 = vsub.f32 %v2121_v62, %v2274_v55  ;;  %v2143_v62 = vpop.f32.mrf.mxu0  ;;  %v2292_v55 = vsub.f32 %v4997_v53, %v2268_v48  ;;  %v5137_v14 = vand.u32 1, %v3352_v61 }
 0x2da   : > { %v2393_v21 = vmul.f32 -2.3889859e-08, %v5105_v26  ;;  %5785 = vst [vmem:[#allocation16_spill] sm:$0xff] %v5123_v24  ;;  %v2488_v27 = vmul.f32 %v2464_v23, %v5080_v1  ;;  %v2144_v53 = vadd.f32 %v2143_v62, %v4897_v0  ;;  %v3364_v48 = vcvt.f32.s32 %v4991_v16 }
 0x2db   : > { %v5121_v12 = vsub.f32 %v2298_v3, %v2322_v18  ;;  %v2535_v9 = vmul.f32 %v2511_v41, %v5045_v13  ;;  %v5135_v18 = vfloor.f32 %v2210_v45  ;;  %v2257_v23 = vmul.f32 3.140625, %v5123_v24 }
 0x2dc   : > { %v2417_v30 = vadd.f32 2.7525562e-06, %v2393_v21  ;;  %v5142_v21 = vand.u32 1, %v3354_v63  ;;  %v2512_v41 = vadd.f32 0.008333331, %v2488_v27  ;;  %v5147_v17 = vadd.f32 %v2172_v25, %v4897_v0 }
 0x2dd   : > { %v5133_v29 = vmul.f32 %v5121_v12, %v5121_v12  ;;  %5786 = vst [vmem:[#allocation8_spill] sm:$0xff] %v5135_v18  ;;  %v5149_v45 = vsub.f32 %v2292_v55, %v2316_v44  ;;  %v2559_v61 = vadd.f32 -0.16666667, %v2535_v9  ;;  %v2191_v15 = vmul.f32 0.31830987, %v2144_v53 }
 0x2de   : > { %v2441_v8 = vmul.f32 %v2417_v30, %v5105_v26  ;;  %v2536_v30 = vmul.f32 %v2512_v41, %v5080_v1  ;;  %v2258_v16 = vmul.f32 3.140625, %v5135_v18  ;;  %v2192_v63 = vmul.f32 0.31830987, %v5147_v17  ;;  %v2175_v41 = vpop.f32.mrf.mxu1 }
 0x2df   : > { %v2394_v3 = vmul.f32 -2.3889859e-08, %v5133_v29  ;;  %v2215_v37 = vadd.f32 0.5, %v2191_v15  ;;  %v5155_v38 = vand.u32 1, %v3364_v48  ;;  %v3366_v0 = vcvt.f32.s32 %v5028_v52 }
 0x2e0   : > { %v2465_v47 = vadd.f32 -0.00019840874, %v2441_v8  ;;  %v2560_v25 = vadd.f32 -0.16666667, %v2536_v30  ;;  %v2281_v9 = vsub.f32 %v5084_v36, %v2257_v23  ;;  %v2216_v55 = vadd.f32 0.5, %v2192_v63 }
 0x2e1   : > { %v2418_v62 = vadd.f32 2.7525562e-06, %v2394_v3  ;;  %v2146_v8 = vpop.f32.mrf.mxu0  ;;  %v2583_v3 = vmul.f32 %v2559_v61, %v5045_v13  ;;  %v5161_v33 = vfloor.f32 %v2215_v37  ;;  %v2305_v48 = vmul.f32 0.0009676536, %v5123_v24 }
 0x2e2   : > { %v2489_v27 = vmul.f32 %v2465_v47, %v5105_v26  ;;  %v5164_v47 = vadd.f32 %v2146_v8, %v4915_v54  ;;  %v2282_v52 = vsub.f32 %v5087_v22, %v2258_v16  ;;  %v5168_v30 = vfloor.f32 %v2216_v55 }
 0x2e3   : > { %v2442_v44 = vmul.f32 %v2418_v62, %v5133_v29  ;;  %5787 = vst [vmem:[#allocation14_spill] sm:$0xff] %v5161_v33  ;;  %v2584_v36 = vmul.f32 %v2560_v25, %v5080_v1  ;;  %v2263_v62 = vmul.f32 3.140625, %v5161_v33  ;;  %v2306_v61 = vmul.f32 0.0009676536, %v5135_v18 }
 0x2e4   : > { %v2513_v58 = vadd.f32 0.008333331, %v2489_v27  ;;  %5788 = vst [vmem:[#allocation9_spill] sm:$0xff] %v5168_v30  ;;  %v2197_v13 = vmul.f32 0.31830987, %v5164_v47  ;;  %v2264_v63 = vmul.f32 3.140625, %v5168_v30  ;;  %v5178_v27 = vadd.f32 %v2175_v41, %v4915_v54 }
 0x2e5   : > { %v2466_v15 = vadd.f32 -0.00019840874, %v2442_v44  ;;  %v2607_v22 = vadd.f32 1.0, %v2583_v3  ;;  %v5180_v44 = vsub.f32 %v2281_v9, %v2305_v48  ;;  %v2287_v1 = vsub.f32 %v2144_v53, %v2263_v62 }
 0x2e6   : > { %v2537_v23 = vmul.f32 %v2513_v58, %v5105_v26  ;;  %v5184_v58 = vmul.f32 %v5149_v45, %v5149_v45  ;;  %v2221_v55 = vadd.f32 0.5, %v2197_v13  ;;  %v2385_v8 = vmul.f32 -2.3889859e-08, %v5040_v59 }
 0x2e7   : > { %v2490_v37 = vmul.f32 %v2466_v15, %v5133_v29  ;;  %5789 = vst [vmem:[#allocation10_spill] sm:$0xff] %v5180_v44  ;;  %v2608_v15 = vadd.f32 1.0, %v2584_v36  ;;  %v5187_v18 = vsub.f32 %v2282_v52, %v2306_v61  ;;  %v2311_v24 = vmul.f32 0.0009676536, %v5161_v33 }
 0x2e8   : > { %v2561_v16 = vadd.f32 -0.16666667, %v2537_v23  ;;  %v2680_v54 = vand.u32 1, %v3366_v0  ;;  %v2288_v9 = vsub.f32 %v5147_v17, %v2264_v63  ;;  %v2198_v53 = vmul.f32 0.31830987, %v5178_v27 }
 0x2e9   : > { %v2514_v25 = vadd.f32 0.008333331, %v2490_v37  ;;  %v2149_v3 = vpop.f32.mrf.mxu0  ;;  %vm2703_vm8 = vcmp.eq.s32.totalorder %v5155_v38, 1  ;;  %v2409_v48 = vadd.f32 2.7525562e-06, %v2385_v8  ;;  %v2631_v23 = vmul.f32 %v2607_v22, %v5026_v34  ;;  %v2178_v37 = vpop.f32.mrf.mxu1 }
 0x2ea   : > { %v2585_v41 = vmul.f32 %v2561_v16, %v5105_v26  ;;  %v5197_v36 = vmul.f32 %v5180_v44, %v5180_v44  ;;  %v5199_v52 = vsub.f32 %v2287_v1, %v2311_v24  ;;  %v2386_v0 = vmul.f32 -2.3889859e-08, %v5063_v2 }
 0x2eb   : > { %v2538_v26 = vmul.f32 %v2514_v25, %v5133_v29  ;;  %v2312_v17 = vmul.f32 0.0009676536, %v5168_v30  ;;  %v5204_v62 = vfloor.f32 %v2221_v55  ;;  %v2150_v13 = vadd.f32 %v2149_v3, %v4891_v49 }
 0x2ec   : > { %5790 = vst [vmem:[#allocation18_spill] sm:$0xff] %v5199_v52  ;;  %v2632_v61 = vmul.f32 %v2608_v15, %v5068_v51  ;;  %v2179_v34 = vadd.f32 %v2178_v37, %v4891_v49  ;;  %vm2704_vm9 = vcmp.eq.s32.totalorder %v2680_v54, 1  ;;  %v2433_v63 = vmul.f32 %v2409_v48, %v5040_v59 }
 0x2ed   : > { %v2609_v24 = vadd.f32 1.0, %v2585_v41  ;;  %v5210_v22 = vsub.f32 %v2288_v9, %v2312_v17  ;;  %v2222_v16 = vadd.f32 0.5, %v2198_v53  ;;  %v2203_v1 = vmul.f32 0.31830987, %v2150_v13 }
 0x2ee   : > { %v5214_v25 = vmul.f32 %v5199_v52, %v5199_v52  ;;  %v2204_v55 = vmul.f32 0.31830987, %v2179_v34  ;;  %v2457_v8 = vadd.f32 -0.00019840874, %v2433_v63  ;;  %v2410_v3 = vadd.f32 2.7525562e-06, %v2386_v0 }
 0x2ef   : > { %5791 = vst [vmem:[#allocation11_spill] sm:$0xff] %v5210_v22  ;;  %v2562_v44 = vadd.f32 -0.16666667, %v2538_v26  ;;  %v5217_v51 = vmul.f32 3.140625, %v5204_v62  ;;  %v5220_v49 = vmul.f32 0.0009676536, %v5204_v62  ;;  %v5225_v17 = vmul.f32 %v5210_v22, %v5210_v22 }
 0x2f0   : > { %v2227_v15 = vadd.f32 0.5, %v2203_v1  ;;  %v2228_v41 = vadd.f32 0.5, %v2204_v55  ;;  %v2727_v9 = vsub.f32 0.0, %v2631_v23  ;;  %v2728_v48 = vsub.f32 0.0, %v2632_v61 }
 0x2f1   : > { %v2403_v53 = vadd.f32 2.7525562e-06, %v5128_v42  ;;  %v5227_v37 = vfloor.f32 %v2222_v16  ;;  %v2481_v26 = vmul.f32 %v2457_v8, %v5040_v59  ;;  %v2434_v52 = vmul.f32 %v2410_v3, %v5063_v2 }
 0x2f2   : > { %v5229_v0 = vfloor.f32 %v2227_v15  ;;  %v5232_v63 = vfloor.f32 %v2228_v41  ;;  %v2751_v1 = vsel %vm2703_vm8, %v2727_v9, %v2631_v23  ;;  %v2752_v55 = vsel %vm2704_vm9, %v2728_v48, %v2632_v61 }
 0x2f3   : > { %v5239_v42 = vmul.f32 %v2609_v24, %v5094_v20  ;;  %2780 = vmatpush.msra.mxu2 %v2751_v1  ;;  %2800 = vmatpush.msra.mxu3 %v2752_v55  ;;  %v2505_v8 = vadd.f32 0.008333331, %v2481_v26  ;;  %v2586_v41 = vmul.f32 %v2562_v44, %v5133_v29  ;;  %v2458_v23 = vadd.f32 -0.00019840874, %v2434_v52 }
 0x2f4   : > { %v2275_v15 = vmul.f32 3.140625, %v5229_v0  ;;  %v2276_v38 = vmul.f32 3.140625, %v5232_v63  ;;  %v2427_v54 = vmul.f32 %v2403_v53, %v5024_v35  ;;  %v2323_v3 = vmul.f32 0.0009676536, %v5229_v0 }
 0x2f5   : > { %v2529_v20 = vmul.f32 %v2505_v8, %v5040_v59  ;;  %v2380_v24 = vmul.f32 -2.3889859e-08, %v5032_v6  ;;  %v2324_v48 = vmul.f32 0.0009676536, %v5232_v63  ;;  %v2482_v1 = vmul.f32 %v2458_v23, %v5063_v2 }
 0x2f6   : > { %v2299_v61 = vsub.f32 %v2150_v13, %v2275_v15  ;;  %v2300_v9 = vsub.f32 %v2179_v34, %v2276_v38  ;;  %v2451_v26 = vadd.f32 -0.00019840874, %v2427_v54  ;;  %v2373_v52 = vmul.f32 -2.3889859e-08, %v4971_v57 }
 0x2f7   : > { %v2553_v29 = vadd.f32 -0.16666667, %v2529_v20  ;;  %v2404_v44 = vadd.f32 2.7525562e-06, %v2380_v24  ;;  %v5256_v13 = vmul.f32 3.140625, %v5227_v37  ;;  %vm2697_vm10 = vcmp.eq.s32.totalorder %v5137_v14, 1 }
 0x2f8   : > { %v5252_v55 = vsub.f32 %v2299_v61, %v2323_v3  ;;  %v5258_v53 = vsub.f32 %v2300_v9, %v2324_v48  ;;  %v2506_v15 = vadd.f32 0.008333331, %v2482_v1  ;;  %v2475_v34 = vmul.f32 %v2451_v26, %v5024_v35 }
 0x2f9   : > { %v2577_v38 = vmul.f32 %v2553_v29, %v5040_v59  ;;  %v2428_v23 = vmul.f32 %v2404_v44, %v5032_v6  ;;  %v2397_v54 = vadd.f32 2.7525562e-06, %v2373_v52  ;;  %v5269_v61 = vmul.f32 0.0009676536, %v5227_v37 }
 0x2fa   : > { %v5264_v8 = vmul.f32 %v5252_v55, %v5252_v55  ;;  %v5273_v3 = vmul.f32 %v5258_v53, %v5258_v53  ;;  %v2530_v20 = vmul.f32 %v2506_v15, %v5063_v2  ;;  %v2499_v24 = vadd.f32 0.008333331, %v2475_v34 }
 0x2fb   : > { %v2601_v48 = vadd.f32 1.0, %v2577_v38  ;;  %v2452_v1 = vadd.f32 -0.00019840874, %v2428_v23  ;;  %v2421_v26 = vmul.f32 %v2397_v54, %v4971_v57  ;;  %v5278_v59 = vadd.f32 1.0, %v2586_v41 }
 0x2fc   : > { %v2395_v9 = vmul.f32 -2.3889859e-08, %v5264_v8  ;;  %v2396_v29 = vmul.f32 -2.3889859e-08, %v5273_v3  ;;  %v2554_v44 = vadd.f32 -0.16666667, %v2530_v20  ;;  %v2523_v52 = vmul.f32 %v2499_v24, %v5024_v35 }
 0x2fd   : > { %v2625_v22 = vmul.f32 %v2601_v48, %v5008_v5  ;;  %vm2698_vm11 = vcmp.eq.s32.totalorder %v5142_v21, 1  ;;  %v2476_v15 = vmul.f32 %v2452_v1, %v5032_v6  ;;  %v2445_v34 = vadd.f32 -0.00019840874, %v2421_v26 }
 0x2fe   : > { %v2419_v16 = vadd.f32 2.7525562e-06, %v2395_v9  ;;  %v2294_v38 = vsub.f32 %v5178_v27, %v5256_v13  ;;  %v2420_v23 = vadd.f32 2.7525562e-06, %v2396_v29  ;;  %v2578_v41 = vmul.f32 %v2554_v44, %v5063_v2 }
 0x2ff   : > { %v2547_v54 = vadd.f32 -0.16666667, %v2523_v52  ;;  %v2721_v20 = vsub.f32 0.0, %v2625_v22  ;;  %v2500_v33 = vadd.f32 0.008333331, %v2476_v15  ;;  %v2469_v24 = vmul.f32 %v2445_v34, %v4971_v57 }
 0x300   : > { %v2443_v30 = vmul.f32 %v2419_v16, %v5264_v8  ;;  %v2444_v5 = vmul.f32 %v2420_v23, %v5273_v3  ;;  %v2602_v9 = vadd.f32 1.0, %v2578_v41  ;;  %vm2691_vm13 = vcmp.eq.s32.totalorder %v5098_v60, 1 }
 0x301   : > { %v2571_v48 = vmul.f32 %v2547_v54, %v5024_v35  ;;  %v2745_v27 = vsel %vm2697_vm10, %v2721_v20, %v2625_v22  ;;  %v2524_v2 = vmul.f32 %v2500_v33, %v5032_v6  ;;  %v2493_v13 = vadd.f32 0.008333331, %v2469_v24 }
 0x302   : > { %v2467_v1 = vadd.f32 -0.00019840874, %v2443_v30  ;;  %v2468_v26 = vadd.f32 -0.00019840874, %v2444_v5  ;;  %2781 = vmatpush.msra.mxu2 %v2745_v27  ;;  %v2626_v16 = vmul.f32 %v2602_v9, %v5036_v50  ;;  %v2374_v44 = vmul.f32 -2.3889859e-08, %v4975_v40 }
 0x303   : > { %v2595_v29 = vadd.f32 1.0, %v2571_v48  ;;  %v2548_v15 = vadd.f32 -0.16666667, %v2524_v2  ;;  %v3342_v35 = vcvt.f32.s32 %v4941_v56  ;;  %v2517_v30 = vmul.f32 %v2493_v13, %v4971_v57 }
 0x304   : > { %v2491_v52 = vmul.f32 %v2467_v1, %v5264_v8  ;;  %v2492_v14 = vmul.f32 %v2468_v26, %v5273_v3  ;;  %v2722_v22 = vsub.f32 0.0, %v2626_v16  ;;  %v2398_v34 = vadd.f32 2.7525562e-06, %v2374_v44 }
 0x305   : > { %v2619_v33 = vmul.f32 %v2595_v29, %v4980_v11  ;;  %v2572_v41 = vmul.f32 %v2548_v15, %v5032_v6  ;;  %v2541_v50 = vadd.f32 -0.16666667, %v2517_v30  ;;  %v3328_v54 = vcvt.f32.s32 %v4909_v43 }
 0x306   : > { %v2515_v23 = vadd.f32 0.008333331, %v2491_v52  ;;  %v2516_v20 = vadd.f32 0.008333331, %v2492_v14  ;;  %v2746_v24 = vsel %vm2698_vm11, %v2722_v22, %v2626_v16  ;;  %v2422_v56 = vmul.f32 %v2398_v34, %v4975_v40 }
 0x307   : > { %v2715_v5 = vsub.f32 0.0, %v2619_v33  ;;  %2801 = vmatpush.msra.mxu3 %v2746_v24  ;;  %v2596_v48 = vadd.f32 1.0, %v2572_v41  ;;  %v2668_v1 = vand.u32 1, %v3342_v35  ;;  %v2565_v11 = vmul.f32 %v2541_v50, %v4971_v57 }
 0x308   : > { %v2539_v9 = vmul.f32 %v2515_v23, %v5264_v8  ;;  %v2540_v27 = vmul.f32 %v2516_v20, %v5273_v3  ;;  %v2446_v43 = vadd.f32 -0.00019840874, %v2422_v56  ;;  %v3368_v2 = vcvt.f32.s32 %v5065_v28 }
 0x309   : > { %v2739_v6 = vsel %vm2691_vm13, %v2715_v5, %v2619_v33  ;;  %v5792_v21 = vsub.f32 %v5164_v47, %v5217_v51  ;;  %v2620_v16 = vmul.f32 %v2596_v48, %v5001_v46  ;;  %v2589_v29 = vadd.f32 1.0, %v2565_v11  ;;  %v5336_v33 = vld [vmem:[%s5613_s7] sm:$0x1] }
 0x30a   : > { %v2563_v26 = vadd.f32 -0.16666667, %v2539_v9  ;;  %2782 = vmatpush.msra.mxu2 %v2739_v6  ;;  %v2661_v57 = vand.u32 1, %v3328_v54  ;;  %v2470_v44 = vmul.f32 %v2446_v43, %v4975_v40  ;;  %v3330_v60 = vcvt.f32.s32 %v4911_v31 }
 0x30b   : > { %v5318_v13 = vsub.f32 %v5792_v21, %v5220_v49  ;;  %v2681_v52 = vand.u32 1, %v3368_v2  ;;  %v2564_v15 = vadd.f32 -0.16666667, %v2540_v27  ;;  %v2716_v35 = vsub.f32 0.0, %v2620_v16 }
 0x30c   : > { %v2613_v28 = vmul.f32 %v2589_v29, %v4948_v4  ;;  %v2729_v30 = vsub.f32 0.0, %v5239_v42  ;;  %v2634_v47 = vmul.f32 %v5278_v59, %v5121_v12  ;;  %v5328_v51 = vsub.f32 %v2294_v38, %v5269_v61 }
 0x30d   : > { %vm2692_vm14 = vcmp.eq.s32.totalorder %v2668_v1, 1  ;;  %v2494_v46 = vadd.f32 0.008333331, %v2470_v44  ;;  %v2587_v49 = vmul.f32 %v2563_v26, %v5264_v8  ;;  %v3370_v31 = vcvt.f32.s32 %v5092_v7  ;;  %v5793_v26 = vld [vmem:[#allocation24_spill] sm:$0xff] }
 0x30e   : > { %v2740_v14 = vsel %vm2692_vm14, %v2716_v35, %v2620_v16  ;;  %v2709_v22 = vsub.f32 0.0, %v2613_v28  ;;  %vm2685_vm15 = vcmp.eq.s32.totalorder %v2661_v57, 1  ;;  %vm2705_vm1 = vcmp.eq.s32.totalorder %v2681_v52, 1  ;;  %v5794_v52 = vld [vmem:[#allocation7_spill] sm:$0xff] }
 0x30f   : > { %2802 = vmatpush.msra.mxu3 %v2740_v14  ;;  %v2518_v4 = vmul.f32 %v2494_v46, %v4975_v40  ;;  %v2387_v12 = vmul.f32 -2.3889859e-08, %v5116_v39  ;;  %v2588_v61 = vmul.f32 %v2564_v15, %v5273_v3  ;;  %v2662_v8 = vand.u32 1, %v3330_v60 }
 0x310   : > { %v2733_v59 = vsel %vm2685_vm15, %v2709_v22, %v2613_v28  ;;  %v2753_v38 = vsel %vm2705_vm1, %v2729_v30, %v5239_v42  ;;  %v5343_v7 = vmul.f32 %v5318_v13, %v5318_v13  ;;  %v2388_v41 = vmul.f32 -2.3889859e-08, %v5184_v58  ;;  %v5795_v28 = vld [vmem:[#allocation20_spill] sm:$0xff] }
 0x311   : > { %2783 = vmatpush.msra.mxu2 %v2733_v59  ;;  %v2542_v34 = vadd.f32 -0.16666667, %v2518_v4  ;;  %v2411_v23 = vadd.f32 2.7525562e-06, %v2387_v12  ;;  %v5348_v50 = vmul.f32 %v5328_v51, %v5328_v51  ;;  %v2611_v54 = vadd.f32 1.0, %v2587_v49 }
 0x312   : > { %3221 = vmatmul.msk.f32.vlgmr.msra.gmra.mxu2 %vm1204_vm12, %v5336_v33  ;;  %v2682_v3 = vand.u32 1, %v3370_v31  ;;  %v2381_v42 = vmul.f32 -2.3889859e-08, %v5058_v10  ;;  %v2412_v5 = vadd.f32 2.7525562e-06, %v2388_v41  ;;  %v2612_v9 = vadd.f32 1.0, %v2588_v61 }
 0x313   : > { %v2566_v20 = vmul.f32 %v2542_v34, %v4975_v40  ;;  %2820 = vmatpush.msrb.mxu2 %v2753_v38  ;;  %v2435_v24 = vmul.f32 %v2411_v23, %v5116_v39  ;;  %v2382_v56 = vmul.f32 -2.3889859e-08, %v5112_v32  ;;  %vm2686_vm2 = vcmp.eq.s32.totalorder %v2662_v8, 1  ;;  %v5796_v34 = vld [vmem:[#allocation25_spill] sm:$0xff] }
 0x314   : > { %v2730_v48 = vsub.f32 0.0, %v2634_v47  ;;  %v2405_v1 = vadd.f32 2.7525562e-06, %v2381_v42  ;;  %v2436_v6 = vmul.f32 %v2412_v5, %v5184_v58  ;;  %v5358_v2 = vmul.f32 %v2611_v54, %v5252_v55  ;;  %v5797_v54 = vld [vmem:[#allocation23_spill] sm:$0xff] }
 0x315   : > { %v2590_v11 = vadd.f32 1.0, %v2566_v20  ;;  %v2459_v27 = vadd.f32 -0.00019840874, %v2435_v24  ;;  %v2406_v43 = vadd.f32 2.7525562e-06, %v2382_v56  ;;  %vm2706_vm3 = vcmp.eq.s32.totalorder %v2682_v3, 1 }
 0x316   : > { %v3356_v40 = vcvt.f32.s32 %v5011_v19  ;;  %v2429_v21 = vmul.f32 %v2405_v1, %v5058_v10  ;;  %v2460_v57 = vadd.f32 -0.00019840874, %v2436_v6  ;;  %v2754_v60 = vsel %vm2706_vm3, %v2730_v48, %v2634_v47  ;;  %v5798_v5 = vld [vmem:[#allocation31_spill] sm:$0xff] }
 0x317   : > { %v2614_v16 = vmul.f32 %v2590_v11, %v5793_v26  ;;  %v2483_v29 = vmul.f32 %v2459_v27, %v5116_v39  ;;  %v2430_v44 = vmul.f32 %v2406_v43, %v5112_v32  ;;  %v3358_v15 = vcvt.f32.s32 %v5794_v52  ;;  %v5799_v52 = vld [vmem:[#allocation19_spill] sm:$0xff] }
 0x318   : > { %v2453_v35 = vadd.f32 -0.00019840874, %v2429_v21  ;;  %v2375_v30 = vmul.f32 -2.3889859e-08, %v5795_v28  ;;  %v2484_v49 = vmul.f32 %v2460_v57, %v5184_v58  ;;  %v5369_v14 = vmul.f32 %v2612_v9, %v5258_v53 }
 0x319   : > { %v2710_v55 = vsub.f32 0.0, %v2614_v16  ;;  %v2507_v46 = vadd.f32 0.008333331, %v2483_v29  ;;  %v2454_v19 = vadd.f32 -0.00019840874, %v2430_v44  ;;  %v2675_v22 = vand.u32 1, %v3356_v40 }
 0x31a   : > { %v2477_v31 = vmul.f32 %v2453_v35, %v5058_v10  ;;  %v2399_v4 = vadd.f32 2.7525562e-06, %v2375_v30  ;;  %v2508_v61 = vadd.f32 0.008333331, %v2484_v49  ;;  %v3344_v23 = vcvt.f32.s32 %v5796_v34 }
 0x31b   : > { %v2734_v12 = vsel %vm2686_vm2, %v2710_v55, %v2614_v16  ;;  %v2531_v47 = vmul.f32 %v2507_v46, %v5116_v39  ;;  %v2478_v59 = vmul.f32 %v2454_v19, %v5112_v32  ;;  %v2376_v53 = vmul.f32 -2.3889859e-08, %v5797_v54  ;;  %v5800_v55 = vld [vmem:[#allocation26_spill] sm:$0xff] }
 0x31c   : > { %2803 = vmatpush.msra.mxu3 %v2734_v12  ;;  %v2501_v38 = vadd.f32 0.008333331, %v2477_v31  ;;  %v2423_v41 = vmul.f32 %v2399_v4, %v5795_v28  ;;  %v2532_v8 = vmul.f32 %v2508_v61, %v5184_v58  ;;  %v2676_v42 = vand.u32 1, %v3358_v15 }
 0x31d   : > { %3222 = vmatmul.msk.f32.vlgmr.msra.gmra.mxu3 %vm1204_vm12, %v5336_v33  ;;  %v2555_v3 = vadd.f32 -0.16666667, %v2531_v47  ;;  %v2502_v20 = vadd.f32 0.008333331, %v2478_v59  ;;  %v3346_v56 = vcvt.f32.s32 %v5798_v5  ;;  %v2400_v48 = vadd.f32 2.7525562e-06, %v2376_v53 }
 0x31e   : > { %2840 = vmatpush.msrb.mxu3 %v2754_v60  ;;  %v2525_v24 = vmul.f32 %v2501_v38, %v5058_v10  ;;  %v2447_v9 = vadd.f32 -0.00019840874, %v2423_v41  ;;  %vm2699_vm4 = vcmp.eq.s32.totalorder %v2675_v22, 1  ;;  %v2556_v11 = vadd.f32 -0.16666667, %v2532_v8  ;;  %v5801_v47 = vld [vmem:[#allocation30_spill] sm:$0xff] }
 0x31f   : > { %v2579_v1 = vmul.f32 %v2555_v3, %v5116_v39  ;;  %v2526_v27 = vmul.f32 %v2502_v20, %v5112_v32  ;;  %v2669_v43 = vand.u32 1, %v3344_v23  ;;  %v2424_v21 = vmul.f32 %v2400_v48, %v5797_v54  ;;  %v5802_v23 = vld [vmem:[#allocation21_spill] sm:$0xff]  ;;  %v5803_v20 = vld [vmem:[#allocation27_spill] sm:$0xff] }
 0x320   : > { %v2549_v6 = vadd.f32 -0.16666667, %v2525_v24  ;;  %v2471_v40 = vmul.f32 %v2447_v9, %v5795_v28  ;;  %v2580_v16 = vmul.f32 %v2556_v11, %v5184_v58  ;;  %vm2700_vm5 = vcmp.eq.s32.totalorder %v2676_v42, 1 }
 0x321   : > { %v2603_v26 = vadd.f32 1.0, %v2579_v1  ;;  %v2550_v29 = vadd.f32 -0.16666667, %v2526_v27  ;;  %v2670_v44 = vand.u32 1, %v3346_v56  ;;  %v2448_v39 = vadd.f32 -0.00019840874, %v2424_v21 }
 0x322   : > { %v2573_v57 = vmul.f32 %v2549_v6, %v5058_v10  ;;  %v2495_v60 = vadd.f32 0.008333331, %v2471_v40  ;;  %v2604_v35 = vadd.f32 1.0, %v2580_v16  ;;  %v3332_v46 = vcvt.f32.s32 %v5800_v55  ;;  %v5804_v40 = vld [vmem:[#allocation32_spill] sm:$0xff] }
 0x323   : > { %v2627_v15 = vmul.f32 %v2603_v26, %v5799_v52  ;;  %v2574_v30 = vmul.f32 %v2550_v29, %v5112_v32  ;;  %vm2693_vm6 = vcmp.eq.s32.totalorder %v2669_v43, 1  ;;  %v2472_v58 = vmul.f32 %v2448_v39, %v5797_v54 }
 0x324   : > { %v2597_v49 = vadd.f32 1.0, %v2573_v57  ;;  %v2519_v19 = vmul.f32 %v2495_v60, %v5795_v28  ;;  %v2628_v4 = vmul.f32 %v2604_v35, %v5149_v45  ;;  %v3372_v12 = vcvt.f32.s32 %v5229_v0 }
 0x325   : > { %v2723_v31 = vsub.f32 0.0, %v2627_v15  ;;  %v2598_v10 = vadd.f32 1.0, %v2574_v30  ;;  %vm2694_vm7 = vcmp.eq.s32.totalorder %v2670_v44, 1  ;;  %v2496_v38 = vadd.f32 0.008333331, %v2472_v58 }
 0x326   : > { %v2621_v61 = vmul.f32 %v2597_v49, %v5801_v47  ;;  %v2543_v59 = vadd.f32 -0.16666667, %v2519_v19  ;;  %v2724_v34 = vsub.f32 0.0, %v2628_v4  ;;  %v2663_v53 = vand.u32 1, %v3332_v46 }
 0x327   : > { %v2747_v32 = vsel %vm2699_vm4, %v2723_v31, %v2627_v15  ;;  %v2622_v41 = vmul.f32 %v2598_v10, %v5802_v23  ;;  %v2520_v45 = vmul.f32 %v2496_v38, %v5797_v54  ;;  %v3334_v24 = vcvt.f32.s32 %v5803_v20 }
 0x328   : > { %2821 = vmatpush.msrb.mxu2 %v2747_v32  ;;  %v2717_v3 = vsub.f32 0.0, %v2621_v61  ;;  %v2567_v8 = vmul.f32 %v2543_v59, %v5795_v28  ;;  %v2748_v0 = vsel %vm2700_vm5, %v2724_v34, %v2628_v4  ;;  %v2683_v56 = vand.u32 1, %v3372_v12 }
 0x329   : > { %v2718_v5 = vsub.f32 0.0, %v2622_v41  ;;  %v2389_v9 = vmul.f32 -2.3889859e-08, %v5343_v7  ;;  %2841 = vmatpush.msrb.mxu3 %v2748_v0  ;;  %v2544_v1 = vadd.f32 -0.16666667, %v2520_v45  ;;  %v2731_v11 = vsub.f32 0.0, %v5358_v2 }
 0x32a   : > { %v2741_v22 = vsel %vm2693_vm6, %v2717_v3, %v2621_v61  ;;  %v2591_v48 = vadd.f32 1.0, %v2567_v8  ;;  %v3374_v27 = vcvt.f32.s32 %v5232_v63  ;;  %v2390_v42 = vmul.f32 -2.3889859e-08, %v5348_v50 }
 0x32b   : > { %2822 = vmatpush.msrb.mxu2 %v2741_v22  ;;  %v2742_v28 = vsel %vm2694_vm7, %v2718_v5, %v2622_v41  ;;  %v2413_v6 = vadd.f32 2.7525562e-06, %v2389_v9  ;;  %vm2687_vm8 = vcmp.eq.s32.totalorder %v2663_v53, 1  ;;  %v2568_v26 = vmul.f32 %v2544_v1, %v5797_v54  ;;  %v5805_v54 = vld [vmem:[#allocation29_spill] sm:$0xff] }
 0x32c   : > { %2842 = vmatpush.msrb.mxu3 %v2742_v28  ;;  %v2615_v21 = vmul.f32 %v2591_v48, %v5804_v40  ;;  %v2383_v43 = vmul.f32 -2.3889859e-08, %v5214_v25  ;;  %v2664_v16 = vand.u32 1, %v3334_v24  ;;  %vm2707_vm9 = vcmp.eq.s32.totalorder %v2683_v56, 1 }
 0x32d   : > { %v2437_v29 = vmul.f32 %v2413_v6, %v5343_v7  ;;  %v2414_v57 = vadd.f32 2.7525562e-06, %v2390_v42  ;;  %v2592_v60 = vadd.f32 1.0, %v2568_v26  ;;  %v2755_v63 = vsel %vm2707_vm9, %v2731_v11, %v5358_v2  ;;  %v5806_v6 = vld [vmem:[#allocation14_spill] sm:$0xff] }
 0x32e   : > { %v2711_v44 = vsub.f32 0.0, %v2615_v21  ;;  %v2407_v39 = vadd.f32 2.7525562e-06, %v2383_v43  ;;  %v2684_v52 = vand.u32 1, %v3374_v27  ;;  %v2732_v15 = vsub.f32 0.0, %v5369_v14 }
 0x32f   : > { %v2461_v35 = vadd.f32 -0.00019840874, %v2437_v29  ;;  %v2438_v30 = vmul.f32 %v2414_v57, %v5348_v50  ;;  %v2616_v46 = vmul.f32 %v2592_v60, %v5805_v54  ;;  %v2384_v19 = vmul.f32 -2.3889859e-08, %v5225_v17 }
 0x330   : > { %v2735_v55 = vsel %vm2687_vm8, %v2711_v44, %v2615_v21  ;;  %v2431_v49 = vmul.f32 %v2407_v39, %v5214_v25  ;;  %v5421_v58 = vmul.f32 %v5187_v18, %v5187_v18  ;;  %vm2688_vm10 = vcmp.eq.s32.totalorder %v2664_v16, 1 }
 0x331   : > { %2823 = vmatpush.msrb.mxu2 %v2735_v55  ;;  %v2485_v2 = vmul.f32 %v2461_v35, %v5343_v7  ;;  %v2462_v31 = vadd.f32 -0.00019840874, %v2438_v30  ;;  %v2712_v4 = vsub.f32 0.0, %v2616_v46  ;;  %v2408_v12 = vadd.f32 2.7525562e-06, %v2384_v19  ;;  %v5807_v35 = vld [vmem:[#allocation9_spill] sm:$0xff] }
 0x332   : > { %3223 = vmatmul.msk.f32.vlgmr.msrb.gmra.mxu2 %vm1204_vm12, %v5336_v33  ;;  %v2455_v10 = vadd.f32 -0.00019840874, %v2431_v49  ;;  %vm2708_vm11 = vcmp.eq.s32.totalorder %v2684_v52, 1  ;;  %v2377_v59 = vmul.f32 -2.3889859e-08, %v5197_v36  ;;  %v3360_v5 = vcvt.f32.s32 %v5204_v62 }
 0x333   : > { %2860 = vmatpush.msra.mxu2 %v2755_v63  ;;  %v2509_v47 = vadd.f32 0.008333331, %v2485_v2  ;;  %v2486_v61 = vmul.f32 %v2462_v31, %v5348_v50  ;;  %v2736_v38 = vsel %vm2688_vm10, %v2712_v4, %v2616_v46  ;;  %v2756_v32 = vsel %vm2708_vm11, %v2732_v15, %v5369_v14 }
 0x334   : > { %v2479_v34 = vmul.f32 %v2455_v10, %v5214_v25  ;;  %v2432_v23 = vmul.f32 %v2408_v12, %v5225_v17  ;;  %2843 = vmatpush.msrb.mxu3 %v2736_v38  ;;  %v2401_v3 = vadd.f32 2.7525562e-06, %v2377_v59  ;;  %v2378_v0 = vmul.f32 -2.3889859e-08, %v5421_v58 }
 0x335   : > { %v2533_v41 = vmul.f32 %v2509_v47, %v5343_v7  ;;  %v2510_v53 = vadd.f32 0.008333331, %v2486_v61  ;;  %3224 = vmatmul.msk.f32.vlgmr.msrb.gmra.mxu3 %vm1204_vm12, %v5336_v33  ;;  %v3362_v56 = vcvt.f32.s32 %v5227_v37  ;;  %v3348_v42 = vcvt.f32.s32 %v5806_v6  ;;  %v5809_v47 = vld [vmem:[#allocation16_spill] sm:$0xff] }
 0x336   : > { %v2503_v8 = vadd.f32 0.008333331, %v2479_v34  ;;  %v2456_v45 = vadd.f32 -0.00019840874, %v2432_v23  ;;  %2880 = vmatpush.msra.mxu3 %v2756_v32  ;;  %v2425_v14 = vmul.f32 %v2401_v3, %v5197_v36  ;;  %v2402_v28 = vadd.f32 2.7525562e-06, %v2378_v0 }
 0x337   : > { %v2557_v20 = vadd.f32 -0.16666667, %v2533_v41  ;;  %v2534_v24 = vmul.f32 %v2510_v53, %v5348_v50  ;;  %v2677_v43 = vand.u32 1, %v3360_v5  ;;  %v2678_v16 = vand.u32 1, %v3362_v56  ;;  %v5810_v23 = vld [vmem:[#allocation11_spill] sm:$0xff] }
 0x338   : > { %v2527_v9 = vmul.f32 %v2503_v8, %v5214_v25  ;;  %v2480_v22 = vmul.f32 %v2456_v45, %v5225_v17  ;;  %v2449_v11 = vadd.f32 -0.00019840874, %v2425_v14  ;;  %v2426_v37 = vmul.f32 %v2402_v28, %v5421_v58  ;;  %v5811_v45 = vld [vmem:[#allocation8_spill] sm:$0xff] }
 0x339   : > { %v2581_v48 = vmul.f32 %v2557_v20, %v5343_v7  ;;  %v2558_v1 = vadd.f32 -0.16666667, %v2534_v24  ;;  %v2671_v52 = vand.u32 1, %v3348_v42  ;;  %vm2701_vm13 = vcmp.eq.s32.totalorder %v2677_v43, 1  ;;  %v5812_v24 = vld [vmem:[#allocation10_spill] sm:$0xff] }
 0x33a   : > { %v2551_v27 = vadd.f32 -0.16666667, %v2527_v9  ;;  %v2504_v40 = vadd.f32 0.008333331, %v2480_v22  ;;  %v2473_v62 = vmul.f32 %v2449_v11, %v5197_v36  ;;  %v2450_v63 = vadd.f32 -0.00019840874, %v2426_v37 }
 0x33b   : > { %v2605_v21 = vadd.f32 1.0, %v2581_v48  ;;  %v2582_v26 = vmul.f32 %v2558_v1, %v5348_v50  ;;  %v3350_v50 = vcvt.f32.s32 %v5807_v35  ;;  %vm2702_vm14 = vcmp.eq.s32.totalorder %v2678_v16, 1 }
 0x33c   : > { %v2575_v29 = vmul.f32 %v2551_v27, %v5214_v25  ;;  %v2528_v7 = vmul.f32 %v2504_v40, %v5225_v17  ;;  %v2497_v60 = vadd.f32 0.008333331, %v2473_v62  ;;  %v2474_v46 = vmul.f32 %v2450_v63, %v5421_v58  ;;  %v5808_v25 = vld [vmem:[#allocation18_spill] sm:$0xff] }
 0x33d   : > { %v2629_v57 = vmul.f32 %v2605_v21, %v5318_v13  ;;  %v2606_v44 = vadd.f32 1.0, %v2582_v26  ;;  %vm2695_vm15 = vcmp.eq.s32.totalorder %v2671_v52, 1  ;;  %v2672_v59 = vand.u32 1, %v3350_v50 }
 0x33e   : > { %v2599_v39 = vadd.f32 1.0, %v2575_v29  ;;  %v2552_v15 = vadd.f32 -0.16666667, %v2528_v7  ;;  %v2521_v54 = vmul.f32 %v2497_v60, %v5197_v36  ;;  %v2498_v4 = vadd.f32 0.008333331, %v2474_v46 }
 0x33f   : > { %v2725_v30 = vsub.f32 0.0, %v2629_v57  ;;  %v2630_v55 = vmul.f32 %v2606_v44, %v5328_v51  ;;  %v3336_v51 = vcvt.f32.s32 %v5809_v47  ;;  %v3338_v20 = vcvt.f32.s32 %v5811_v45 }
 0x340   : > { %v2623_v49 = vmul.f32 %v2599_v39, %v5808_v25  ;;  %v2576_v13 = vmul.f32 %v2552_v15, %v5225_v17  ;;  %v2545_v31 = vadd.f32 -0.16666667, %v2521_v54  ;;  %v2522_v32 = vmul.f32 %v2498_v4, %v5421_v58 }
 0x341   : > { %v2749_v19 = vsel %vm2701_vm13, %v2725_v30, %v2629_v57  ;;  %v2726_v2 = vsub.f32 0.0, %v2630_v55  ;;  %v2665_v8 = vand.u32 1, %v3336_v51  ;;  %vm2696_vm1 = vcmp.eq.s32.totalorder %v2672_v59, 1 }
 0x342   : > { %2861 = vmatpush.msra.mxu2 %v2749_v19  ;;  %v2719_v10 = vsub.f32 0.0, %v2623_v49  ;;  %v2600_v12 = vadd.f32 1.0, %v2576_v13  ;;  %v2569_v38 = vmul.f32 %v2545_v31, %v5197_v36  ;;  %v2546_v53 = vadd.f32 -0.16666667, %v2522_v32 }
 0x343   : > { %v2750_v61 = vsel %vm2702_vm14, %v2726_v2, %v2630_v55  ;;  %vm2689_vm2 = vcmp.eq.s32.totalorder %v2665_v8, 1  ;;  %v2666_v9 = vand.u32 1, %v3338_v20  ;;  %vm3046_vm7 = vcmask 1043459  }
 0x344   : > { %2881 = vmatpush.msra.mxu3 %v2750_v61  ;;  %v2743_v34 = vsel %vm2695_vm15, %v2719_v10, %v2623_v49  ;;  %v2624_v17 = vmul.f32 %v2600_v12, %v5810_v23  ;;  %v2593_v41 = vadd.f32 1.0, %v2569_v38  ;;  %v2570_v0 = vmul.f32 %v2546_v53, %v5421_v58  ;;  %v2762_v58 = vpop.permute.xlu0 %2761 }
 0x345   : > { %2862 = vmatpush.msra.mxu2 %v2743_v34  ;;  %vm2690_vm3 = vcmp.eq.s32.totalorder %v2666_v9, 1  ;;  %v2764_v6 = vperm.slane %v2762_v58, 0  ;;  %vm3043_vm8 = vcmask 1040384   ;;  %vm3048_vm11 = vcmask 1044483  }
 0x346   : > { %v2720_v3 = vsub.f32 0.0, %v2624_v17  ;;  %v2617_v14 = vmul.f32 %v2593_v41, %v5812_v24  ;;  %v2594_v56 = vadd.f32 1.0, %v2570_v0  ;;  %vm3050_vm13 = vcmask 1042432  }
 0x348   : > { %v2744_v36 = vsel %vm2696_vm1, %v2720_v3, %v2624_v17  ;;  %v2713_v5 = vsub.f32 0.0, %v2617_v14  ;;  %v2618_v48 = vmul.f32 %v2594_v56, %v5187_v18 }
 0x349   : > { %2882 = vmatpush.msra.mxu3 %v2744_v36 }
 0x34a   : > { %v2737_v22 = vsel %vm2689_vm2, %v2713_v5, %v2617_v14  ;;  %v2714_v1 = vsub.f32 0.0, %v2618_v48 }
 0x34b   : > { %2863 = vmatpush.msra.mxu2 %v2737_v22 }
 0x34c   : > { %3225 = vmatmul.msk.f32.vlgmr.msra.gmra.mxu2 %vm1204_vm12, %v5336_v33  ;;  %v2738_v11 = vsel %vm2690_vm3, %v2714_v1, %v2618_v48 }
 0x34d   : > { %2883 = vmatpush.msra.mxu3 %v2738_v11 }
 0x34e   : > { %3226 = vmatmul.msk.f32.vlgmr.msra.gmra.mxu3 %vm1204_vm12, %v5336_v33 }
 0x395   : > { %v2785_v28 = vpop.f32.mrf.mxu2 }
 0x396   : > { %v2786_v21 = vadd.f32 %v2785_v28, %v2764_v6 }
 0x398   : > { %v2888_v37 = vmul.f32 0.31830987, %v2786_v21 }
 0x39a   : > { %v2894_v7 = vadd.f32 0.5, %v2888_v37 }
 0x39c   : > { %v5474_v60 = vfloor.f32 %v2894_v7 }
 0x39e   : > { %v2906_v35 = vmul.f32 3.140625, %v5474_v60  ;;  %v2918_v19 = vmul.f32 0.0009676536, %v5474_v60 }
 0x3a0   : > { %v2805_v27 = vpop.f32.mrf.mxu3  ;;  %v2912_v49 = vsub.f32 %v2786_v21, %v2906_v35 }
 0x3a1   : > { %v2806_v42 = vadd.f32 %v2805_v27, %v2764_v6 }
 0x3a2   : > { %v5495_v10 = vsub.f32 %v2912_v49, %v2918_v19 }
 0x3a3   : > { %v2889_v40 = vmul.f32 0.31830987, %v2806_v42 }
 0x3a4   : > { %v5504_v38 = vmul.f32 %v5495_v10, %v5495_v10 }
 0x3a5   : > { %v2895_v26 = vadd.f32 0.5, %v2889_v40 }
 0x3a6   : > { %v2936_v8 = vmul.f32 -2.3889859e-08, %v5504_v38 }
 0x3a7   : > { %v5468_v16 = vfloor.f32 %v2895_v26 }
 0x3a8   : > { %v2942_v5 = vadd.f32 2.7525562e-06, %v2936_v8 }
 0x3a9   : > { %v2907_v33 = vmul.f32 3.140625, %v5468_v16  ;;  %v2919_v50 = vmul.f32 0.0009676536, %v5468_v16 }
 0x3aa   : > { %v2948_v27 = vmul.f32 %v2942_v5, %v5504_v38 }
 0x3ab   : > { %v2913_v39 = vsub.f32 %v2806_v42, %v2907_v33 }
 0x3ad   : > { %v5479_v54 = vsub.f32 %v2913_v39, %v2919_v50 }
 0x3af   : > { %v5488_v2 = vmul.f32 %v5479_v54, %v5479_v54 }
 0x3b1   : > { %v2937_v51 = vmul.f32 -2.3889859e-08, %v5488_v2 }
 0x3b3   : > { %v2943_v17 = vadd.f32 2.7525562e-06, %v2937_v51 }
 0x3b5   : > { %v2825_v18 = vpop.f32.mrf.mxu2  ;;  %v2949_v24 = vmul.f32 %v2943_v17, %v5488_v2 }
 0x3b6   : > { %v2826_v62 = vadd.f32 %v2825_v18, %v2764_v6 }
 0x3b7   : > { %v2955_v9 = vadd.f32 -0.00019840874, %v2949_v24 }
 0x3b8   : > { %v2890_v43 = vmul.f32 0.31830987, %v2826_v62  ;;  %v2845_v63 = vpop.f32.mrf.mxu3 }
 0x3b9   : > { %v2846_v52 = vadd.f32 %v2845_v63, %v2764_v6  ;;  %v2961_v21 = vmul.f32 %v2955_v9, %v5488_v2 }
 0x3ba   : > { %v2896_v29 = vadd.f32 0.5, %v2890_v43  ;;  %v2954_v43 = vadd.f32 -0.00019840874, %v2948_v27  ;;  %v3378_v27 = vcvt.f32.s32 %v5468_v16 }
 0x3bb   : > { %v2891_v30 = vmul.f32 0.31830987, %v2846_v52  ;;  %v2967_v33 = vadd.f32 0.008333331, %v2961_v21 }
 0x3bc   : > { %v5470_v57 = vfloor.f32 %v2896_v29 }
 0x3bd   : > { %v2897_v46 = vadd.f32 0.5, %v2891_v30  ;;  %v2973_v30 = vmul.f32 %v2967_v33, %v5488_v2 }
 0x3be   : > { %v2908_v44 = vmul.f32 3.140625, %v5470_v57  ;;  %v2920_v55 = vmul.f32 0.0009676536, %v5470_v57  ;;  %v3380_v21 = vcvt.f32.s32 %v5470_v57 }
 0x3bf   : > { %v5483_v13 = vfloor.f32 %v2897_v46  ;;  %v2979_v51 = vadd.f32 -0.16666667, %v2973_v30 }
 0x3c0   : > { %v2914_v15 = vsub.f32 %v2826_v62, %v2908_v44 }
 0x3c1   : > { %v2909_v31 = vmul.f32 3.140625, %v5483_v13  ;;  %v2921_v47 = vmul.f32 0.0009676536, %v5483_v13  ;;  %v2985_v8 = vmul.f32 %v2979_v51, %v5488_v2  ;;  %v3382_v2 = vcvt.f32.s32 %v5483_v13 }
 0x3c2   : > { %v5481_v25 = vsub.f32 %v2914_v15, %v2920_v55 }
 0x3c3   : > { %v2915_v12 = vsub.f32 %v2846_v52, %v2909_v31  ;;  %v2960_v52 = vmul.f32 %v2954_v43, %v5504_v38  ;;  %v2991_v9 = vadd.f32 1.0, %v2985_v8 }
 0x3c4   : > { %v5493_v4 = vmul.f32 %v5481_v25, %v5481_v25 }
 0x3c5   : > { %v5499_v61 = vsub.f32 %v2915_v12, %v2921_v47  ;;  %v2966_v31 = vadd.f32 0.008333331, %v2960_v52 }
 0x3c6   : > { %v2938_v59 = vmul.f32 -2.3889859e-08, %v5493_v4 }
 0x3c7   : > { %v2933_v32 = vmul.f32 %v5499_v61, %v5499_v61 }
 0x3c8   : > { %v2944_v53 = vadd.f32 2.7525562e-06, %v2938_v59 }
 0x3c9   : > { %v2939_v41 = vmul.f32 -2.3889859e-08, %v2933_v32 }
 0x3ca   : > { %v2950_v0 = vmul.f32 %v2944_v53, %v5493_v4 }
 0x3cb   : > { %v2945_v45 = vadd.f32 2.7525562e-06, %v2939_v41  ;;  %v2972_v41 = vmul.f32 %v2966_v31, %v5504_v38 }
 0x3cc   : > { %v2956_v1 = vadd.f32 -0.00019840874, %v2950_v0 }
 0x3cd   : > { %v2951_v14 = vmul.f32 %v2945_v45, %v2933_v32  ;;  %v2978_v0 = vadd.f32 -0.16666667, %v2972_v41 }
 0x3ce   : > { %v2962_v26 = vmul.f32 %v2956_v1, %v5493_v4 }
 0x3cf   : > { %v2865_v34 = vpop.f32.mrf.mxu2  ;;  %v2957_v22 = vadd.f32 -0.00019840874, %v2951_v14 }
 0x3d0   : > { %v2866_v23 = vadd.f32 %v2865_v34, %v2764_v6  ;;  %v2968_v63 = vadd.f32 0.008333331, %v2962_v26 }
 0x3d1   : > { %v2885_v48 = vpop.f32.mrf.mxu3  ;;  %v2963_v18 = vmul.f32 %v2957_v22, %v2933_v32 }
 0x3d2   : > { %v2892_v3 = vmul.f32 0.31830987, %v2866_v23  ;;  %v2886_v28 = vadd.f32 %v2885_v48, %v2764_v6  ;;  %v2974_v46 = vmul.f32 %v2968_v63, %v5493_v4 }
 0x3d3   : > { %v2969_v44 = vadd.f32 0.008333331, %v2963_v18 }
 0x3d4   : > { %v2898_v20 = vadd.f32 0.5, %v2892_v3  ;;  %v2893_v40 = vmul.f32 0.31830987, %v2886_v28  ;;  %v2980_v34 = vadd.f32 -0.16666667, %v2974_v46 }
 0x3d5   : > { %v2975_v55 = vmul.f32 %v2969_v44, %v2933_v32  ;;  %v3010_v44 = vand.u32 1, %v3380_v21 }
 0x3d6   : > { %v5511_v36 = vfloor.f32 %v2898_v20  ;;  %v2899_v37 = vadd.f32 0.5, %v2893_v40  ;;  %v2986_v20 = vmul.f32 %v2980_v34, %v5493_v4  ;;  %v2997_v40 = vmul.f32 %v2991_v9, %v5479_v54 }
 0x3d7   : > { %v2981_v59 = vadd.f32 -0.16666667, %v2975_v55  ;;  %v3376_v54 = vcvt.f32.s32 %v5474_v60  ;;  %vm3016_vm6 = vcmp.eq.s32.totalorder %v3010_v44, 1 }
 0x3d8   : > { %v2910_v56 = vmul.f32 3.140625, %v5511_v36  ;;  %v2922_v58 = vmul.f32 0.0009676536, %v5511_v36  ;;  %v5518_v7 = vfloor.f32 %v2899_v37  ;;  %v2992_v48 = vadd.f32 1.0, %v2986_v20 }
 0x3d9   : > { %v2987_v45 = vmul.f32 %v2981_v59, %v2933_v32  ;;  %v3021_v16 = vsub.f32 0.0, %v2997_v40 }
 0x3da   : > { %v2916_v11 = vsub.f32 %v2866_v23, %v2910_v56  ;;  %v2911_v6 = vmul.f32 3.140625, %v5518_v7  ;;  %v2923_v50 = vmul.f32 0.0009676536, %v5518_v7  ;;  %v2998_v26 = vmul.f32 %v2992_v48, %v5481_v25 }
 0x3db   : > { %v2993_v22 = vadd.f32 1.0, %v2987_v45 }
 0x3dc   : > { %v2928_v42 = vsub.f32 %v2916_v11, %v2922_v58  ;;  %v2917_v35 = vsub.f32 %v2886_v28, %v2911_v6  ;;  %v3384_v11 = vcvt.f32.s32 %v5511_v36  ;;  %v2984_v28 = vmul.f32 %v2978_v0, %v5504_v38 }
 0x3dd   : > { %v2999_v18 = vmul.f32 %v2993_v22, %v5499_v61  ;;  %v3011_v38 = vand.u32 1, %v3382_v2  ;;  %v3022_v63 = vsub.f32 0.0, %v2998_v26 }
 0x3de   : > { %v2934_v62 = vmul.f32 %v2928_v42, %v2928_v42  ;;  %v2929_v19 = vsub.f32 %v2917_v35, %v2923_v50  ;;  %v2990_v36 = vadd.f32 1.0, %v2984_v28  ;;  %v3008_v35 = vand.u32 1, %v3376_v54 }
 0x3df   : > { %v3023_v13 = vsub.f32 0.0, %v2999_v18  ;;  %vm3017_vm5 = vcmp.eq.s32.totalorder %v3011_v38, 1  ;;  %v3028_v50 = vsel %vm3016_vm6, %v3022_v63, %v2998_v26 }
 0x3e0   : > { %v2940_v29 = vmul.f32 -2.3889859e-08, %v2934_v62  ;;  %v2935_v47 = vmul.f32 %v2929_v19, %v2929_v19  ;;  %v2996_v61 = vmul.f32 %v2990_v36, %v5495_v10  ;;  %v3039_v31 = vrot.slane %v3028_v50, 6 }
 0x3e1   : > { %v3029_v52 = vsel %vm3017_vm5, %v3023_v13, %v2999_v18  ;;  %vm3014_vm10 = vcmp.eq.s32.totalorder %v3008_v35, 1 }
 0x3e2   : > { %v2946_v39 = vadd.f32 2.7525562e-06, %v2940_v29  ;;  %v2941_v17 = vmul.f32 -2.3889859e-08, %v2935_v47  ;;  %v3009_v29 = vand.u32 1, %v3378_v27  ;;  %v3020_v55 = vsub.f32 0.0, %v2996_v61 }
 0x3e3   : > { %v3040_v46 = vrot.slane %v3029_v52, 5 }
 0x3e4   : > { %v2952_v15 = vmul.f32 %v2946_v39, %v2934_v62  ;;  %v2947_v3 = vadd.f32 2.7525562e-06, %v2941_v17  ;;  %vm3015_vm4 = vcmp.eq.s32.totalorder %v3009_v29, 1  ;;  %v3026_v51 = vsel %vm3014_vm10, %v3020_v55, %v2996_v61 }
 0x3e5   : > { %v3027_v6 = vsel %vm3015_vm4, %v3021_v16, %v2997_v40 }
 0x3e6   : > { %v2958_v49 = vadd.f32 -0.00019840874, %v2952_v15  ;;  %v2953_v14 = vmul.f32 %v2947_v3, %v2935_v47  ;;  %v3038_v60 = vrot.slane %v3027_v6, 7 }
 0x3e8   : > { %v2964_v12 = vmul.f32 %v2958_v49, %v2934_v62  ;;  %v2959_v56 = vadd.f32 -0.00019840874, %v2953_v14  ;;  %v3053_v49 = vlaneseq  ;;  %v3044_v59 = vsel %vm3043_vm8, %v3026_v51, %v3038_v60 }
 0x3e9   : > { %v3045_v34 = vsel %vm413_vm0, %v3044_v59, %v3039_v31 }
 0x3ea   : > { %v2970_v23 = vadd.f32 0.008333331, %v2964_v12  ;;  %v2965_v58 = vmul.f32 %v2959_v56, %v2935_v47  ;;  %vm3055_vm14 = vcmp.lt.s32.totalorder %v3053_v49, 768 }
 0x3ec   : > { %v2976_v53 = vmul.f32 %v2970_v23, %v2934_v62  ;;  %v2971_v4 = vadd.f32 0.008333331, %v2965_v58 }
 0x3ee   : > { %v2982_v24 = vadd.f32 -0.16666667, %v2976_v53  ;;  %v2977_v37 = vmul.f32 %v2971_v4, %v2935_v47 }
 0x3f0   : > { %v2988_v5 = vmul.f32 %v2982_v24, %v2934_v62  ;;  %v3012_v62 = vand.u32 1, %v3384_v11  ;;  %v2983_v33 = vadd.f32 -0.16666667, %v2977_v37 }
 0x3f2   : > { %v2994_v1 = vadd.f32 1.0, %v2988_v5  ;;  %vm3018_vm12 = vcmp.eq.s32.totalorder %v3012_v62, 1  ;;  %v2989_v57 = vmul.f32 %v2983_v33, %v2935_v47 }
 0x3f4   : > { %v3000_v32 = vmul.f32 %v2994_v1, %v2928_v42  ;;  %v3386_v42 = vcvt.f32.s32 %v5518_v7  ;;  %v2995_v39 = vadd.f32 1.0, %v2989_v57 }
 0x3f6   : > { %v3024_v43 = vsub.f32 0.0, %v3000_v32  ;;  %v3013_v15 = vand.u32 1, %v3386_v42  ;;  %v3001_v7 = vmul.f32 %v2995_v39, %v2929_v19 }
 0x3f8   : > { %v3030_v25 = vsel %vm3018_vm12, %v3024_v43, %v3000_v32  ;;  %v3025_v10 = vsub.f32 0.0, %v3001_v7  ;;  %vm3019_vm9 = vcmp.eq.s32.totalorder %v3013_v15, 1 }
 0x3f9   : > { %v3041_v30 = vrot.slane %v3030_v25, 4 }
 0x3fa   : > { %v3031_v47 = vsel %vm3019_vm9, %v3025_v10, %v3001_v7 }
 0x3fb   : > { %v3047_v12 = vsel %vm3046_vm7, %v3040_v46, %v3041_v30  ;;  %v3042_v19 = vrot.slane %v3031_v47, 3  ;;  %3065 = sbr.rel (!%p3594_p5) target bundleno = 1063 (0x427), region = 60 }
 0x3fd   : > { %v3049_v23 = vsel %vm3048_vm11, %v3047_v12, %v3042_v19 }
 0x3fe   : > { %v3051_v17 = vsel %vm3050_vm13, %v3045_v34, %v3049_v23 }
 0x3ff   : > { %3057 = vst.msk [vmem:[%s340_s28] sm:$0x3f] %vm3055_vm14, %v3051_v17 }
 0x400   : > { %s3067_s30 = ssub.s32 8, %s3607_s24 }
 0x401   : > { %p3068_p11 = scmp.lt.s32.totalorder %s3067_s30, 6 }
 0x403   : > { %s5821_s30 = smov (!%p3068_p11, %s3067_s30), 6 }
 0x404   : > { %s3070_s10 = ssub.s32 6, %s5821_s30 }
 0x405   : > { %s3071_s8 = sshll.u32 %s3070_s10, 4 }
 0x406   : > { %3072 = vsyncadd %s5547_s29, %s3071_s8  ;;  %p3227_p12 = scmp.ne.s32.totalorder %s5821_s30, 0  ;;  %s3074_s20 = scalar_lea.hbm %s5615_s9, %s3607_s24 }
 0x407   : > { %s3075_s18 = sshll.u32 %s5821_s30, 4  ;;  %s5562_s22 = sshll.u32 %s340_s28, 4  ;;  %s5681_s22 = int_to_ptr.vmem [resolvable:$true] %s5562_s22 }
 0x408   : > { %5813 = sst [smem:[#allocation33_spill]] %s5562_s22  ;;  %s5565_s23 = sshll.u32 %s3074_s20, 4  ;;  %s3079_s23 = int_to_ptr.hbm [resolvable:$true] %s5565_s23 }
 0x409   : > { %s3429_s25 = sshra.s32 %s5681_s22, 4  ;;  %s3431_s26 = sshrl.u32 %s3075_s18, 4  ;;  %s3430_s25 = int_to_ptr.vmem [resolvable:$true] %s3429_s25 }
 0x40a   : > { %s3436_s27 = scalar_lea.vmem %s3430_s25, %s3431_s26  ;;  %s3505_s24 = smov [#allocation3]  }
 0x40b   : > { %p3437_p13 = scmp.ne.s32.totalorder %s3430_s25, %s3436_s27  ;;  %s3440_s28 = scalar_lea.vmem %s3505_s24, 12 }
 0x40c   : > { %p3442_p2 = scmp.lt.s32.totalorder %s3440_s28, %s3436_s27 }
 0x40d   : > { %p3438_p0 = pnand %p3437_p13, %p3227_p12 }
 0x40f   : > { %p3439_p1 = pneg %p3438_p0 }
 0x411   : > { %p3444_p3 = pnand %p3442_p2, %p3439_p1 }
 0x413   : > { %3447 = shalt.err (!%p3444_p3)
}
 0x414   : > { %s3448_s10 = sshra.s32 %s3079_s23, 4  ;;  %s3459_s20 = scalar_lea.hbm %s5615_s9, 8  ;;  %s3449_s10 = int_to_ptr.hbm [resolvable:$true] %s3448_s10 }
 0x415   : > { %s3455_s8 = scalar_lea.hbm %s3449_s10, %s3431_s26  ;;  %p3460_p8 = scmp.lt.s32.totalorder %s3449_s10, %s5615_s9 }
 0x416   : > { %p3456_p4 = scmp.ne.s32.totalorder %s3449_s10, %s3455_s8  ;;  %p3461_p9 = scmp.lt.s32.totalorder %s3459_s20, %s3455_s8 }
 0x418   : > { %p3457_p5 = pnand %p3456_p4, %p3227_p12  ;;  %p3462_p10 = por %p3461_p9, %p3460_p8 }
 0x41a   : > { %p3458_p7 = pneg %p3457_p5 }
 0x41c   : > { %p3463_p11 = pnand %p3462_p10, %p3458_p7 }
 0x41e   : > { %3466 = shalt.err (!%p3463_p11)
}
 0x41f   : > { %s5814_s26 = sld [smem:[#allocation33_spill]] }
 0x425   : > { %s5815_s27 = int_to_ptr.vmem [resolvable:$true] %s5814_s26 }
 0x426   : > { %3081 = dma.vmem_to_hbm [thread:$0]  (%p3227_p12), %s5815_s27, %s3075_s18, %s3079_s23, %s5547_s29  }
 0x427 PF: > { %p3392_p13 = scmp.ge.s32.totalorder %s3502_s14, 2  ;;  %s3090_s22 = sand.u32 1, %s3490_s11  }
 0x428   : > { %s3091_s24 = scalar_lea.sflag [#allocation4], %s3090_s22 }
 0x429   : > { %p3389_p0 = pnand %p3392_p13, %p3598_p6 }
 0x42b   : > { %p3390_p1 = pneg %p3389_p0 }
 0x42d   : > { %3485 = dma.done.wait (%p3390_p1), %s3091_s24, 96  }
 0x42e   : > { %3487 = vsyncadd (%p3390_p1), %s3091_s24, 4294967200  ;;  %p21_p2 = scmp.ge.s32.totalorder %s3582_s16, 4   ;;  %s5816_s11 = smov %s3494_s12 }
 0x42f   : > { %s5817_s12 = smov %s3498_s13  ;;  %s5818_s13 = smov %s3592_s19 }
 0x430   : > { %s5819_s14 = smov %s3582_s16  ;;  %23 = sbr.rel (!%p21_p2) target bundleno = 6 (0x6), region = 92 }
 0x435   :  { %3097 = vsyncpa [#allocation4], 1 }
 0x436   :  { %3099 = vsyncpa [#allocation4 + $0x1], 1 }

</bundles_post_ra>
